<compile_context>
chip_gen: v5e
topology: v5e:2x2
jax: 0.10.0
libtpu: 0.0.40
codegen_flags: <defaults>
</compile_context>

<pallas_src>
import functools

import jax
import jax.numpy as jnp
from jax import lax
from jax.experimental import pallas as pl
from jax.experimental.pallas import tpu as pltpu

# ---- small config (consistent with the module's __init__) ----
N_EMBD = 32
N_HEAD = 4
N_LAYER = 2
BLOCK_SIZE = 16
VOCAB_SIZE = 64
VOCAB_PAD = 128          # lane-dense lm_head output; sliced back to VOCAB_SIZE outside
EPS = 1e-5               # nn.LayerNorm default
HEAD_DIM = N_EMBD // N_HEAD
HIDDEN = 4 * N_EMBD
LANE = 128               # padded lane width for the consolidated bias buffer


def _layernorm(x, w, b):
    # x: (R, C) f32 ; w, b: (1, C)
    mu = jnp.mean(x, axis=-1, keepdims=True)
    var = jnp.mean((x - mu) ** 2, axis=-1, keepdims=True)
    return (x - mu) * lax.rsqrt(var + EPS) * w + b


# ---------------- fully fused forward kernel (single grid step) ----------------
def fused_forward_kernel(x_ref, ln_ref, w_qkv_ref, w_proj_ref,
                         w_fc1_ref, w_fc2_ref, bias_ref, w_lm_ref,
                         o_ref, *, batch, seq):
    B, T, C, D = batch, seq, N_EMBD, HEAD_DIM

    x = x_ref[...].astype(jnp.float32)                        # (R, C), R = B*T

    # causal mask for the (batch, head)-stacked score tensor (B*H*T, T)
    row = lax.broadcasted_iota(jnp.int32, (B * N_HEAD * T, T), 0) % T
    col = lax.broadcasted_iota(jnp.int32, (B * N_HEAD * T, T), 1)
    causal = col <= row

    for l in range(N_LAYER):
        bias_l = bias_ref[l]                                   # (4, 128)

        # ---- attention block:  x = x + c_proj(attn(ln_1(x))) ----
        lnp = ln_ref[2 * l]                                    # (2, C)
        h = _layernorm(x, lnp[0:1, :], lnp[1:2, :])
        # fused QKV matmul; q columns / bias are pre-scaled by 1/sqrt(D) at pack time
        qkv = jnp.dot(h, w_qkv_ref[l], preferred_element_type=jnp.float32) \
            + bias_l[0:1, :3 * C]                              # (R, 3C)
        q = qkv[:, :C]
        k = qkv[:, C:2 * C]
        v = qkv[:, 2 * C:]

        # per-(batch, head) scores, stacked on sublanes -> ONE softmax per layer
        s_parts = []
        for b in range(B):
            rs = slice(b * T, (b + 1) * T)
            for hd in range(N_HEAD):
                cs = slice(hd * D, (hd + 1) * D)
                s_parts.append(lax.dot_general(                # q @ k^T, no transpose
                    q[rs, cs], k[rs, cs], (((1,), (1,)), ((), ())),
                    preferred_element_type=jnp.float32))
        s = jnp.concatenate(s_parts, axis=0)                   # (B*H*T, T)
        s = jnp.where(causal, s, -1e30)                        # finite mask (robust)
        s = s - jnp.max(s, axis=-1, keepdims=True)
        p = jnp.exp(s)
        p = p * pl.reciprocal(jnp.sum(p, axis=-1, keepdims=True), approx=False)

        # per-(batch, head) PV, reassembled into one lane-dense (R, C) tensor
        y_rows = []
        for b in range(B):
            rs = slice(b * T, (b + 1) * T)
            y_heads = []
            for hd in range(N_HEAD):
                idx = b * N_HEAD + hd
                cs = slice(hd * D, (hd + 1) * D)
                y_heads.append(jnp.dot(p[idx * T:(idx + 1) * T, :], v[rs, cs],
                                       preferred_element_type=jnp.float32))
            y_rows.append(jnp.concatenate(y_heads, axis=1))    # (T, C)
        y = jnp.concatenate(y_rows, axis=0)                    # (R, C)

        # single fused output projection
        attn = jnp.dot(y, w_proj_ref[l], preferred_element_type=jnp.float32) \
            + bias_l[1:2, :C]
        x = x + attn

        # ---- MLP block:  x = x + fc2(gelu(fc1(ln_2(x))))  (dropout = identity) ----
        lnp = ln_ref[2 * l + 1]
        h = _layernorm(x, lnp[0:1, :], lnp[1:2, :])
        h = jnp.dot(h, w_fc1_ref[l], preferred_element_type=jnp.float32) \
            + bias_l[2:3, :HIDDEN]
        # exact (erf-based) GELU to match nn.GELU()
        h = 0.5 * h * (1.0 + lax.erf(h * jnp.float32(0.7071067811865476)))
        h = jnp.dot(h, w_fc2_ref[l], preferred_element_type=jnp.float32) \
            + bias_l[3:4, :C]
        x = x + h

    # ---- final:  lm_head(ln_f(x)) -> lane-dense padded vocab ----
    lnp = ln_ref[2 * N_LAYER]
    h = _layernorm(x, lnp[0:1, :], lnp[1:2, :])
    o_ref[...] = jnp.dot(h, w_lm_ref[...],
                         preferred_element_type=jnp.float32).astype(o_ref.dtype)


# ---------------- pallas_call wrapper ----------------
_WEIGHT_ORDER = ("ln", "w_qkv", "w_proj", "w_fc1", "w_fc2", "biases", "w_lm_pad")


def _full_spec(arr):
    # full-array block, single grid step
    return pl.BlockSpec(arr.shape, lambda i, _nd=arr.ndim: (0,) * _nd)


def lumina_fused_call(hidden, packed):
    B, T, C = hidden.shape
    R = B * T
    x2d = hidden.reshape(R, C)                       # whole batch resident in one step
    weights = [packed[k] for k in _WEIGHT_ORDER]
    kernel = functools.partial(fused_forward_kernel, batch=B, seq=T)
    logits_pad = pl.pallas_call(
        kernel,
        out_shape=jax.ShapeDtypeStruct((R, VOCAB_PAD), jnp.float32),
        grid=(1,),
        in_specs=[_full_spec(x2d)] + [_full_spec(w) for w in weights],
        out_specs=pl.BlockSpec((R, VOCAB_PAD), lambda i: (0, 0)),
        compiler_params=pltpu.CompilerParams(dimension_semantics=("arbitrary",)),
    )(x2d, *weights)
    return logits_pad.reshape(B, T, VOCAB_PAD)[:, :, :VOCAB_SIZE]


# ---------------- parameter init (deterministic; synthetic weights) ----------------
def init_params(key):
    C, V = N_EMBD, VOCAB_SIZE

    def nrm(k, shape, scale=0.02):
        return scale * jax.random.normal(k, shape, dtype=jnp.float32)

    keys = jax.random.split(key, 4 + N_LAYER)
    params = {
        # TODO(synk): embeddings.load_pretrained_embeddings() / tokenizer not available;
        # wte is a synthetic deterministic embedding table instead of a checkpoint.
        "wte": nrm(keys[0], (V, C)),
        "wpe": nrm(keys[1], (BLOCK_SIZE, C)),
        "lnf_w": jnp.ones((1, C), jnp.float32),
        "lnf_b": jnp.zeros((1, C), jnp.float32),
        "w_lm": nrm(keys[2], (C, V)),
        "layers": [],
    }
    for li in range(N_LAYER):
        lk = jax.random.split(keys[4 + li], 8)
        params["layers"].append({
            "ln1_w": jnp.ones((1, C), jnp.float32),
            "ln1_b": jnp.zeros((1, C), jnp.float32),
            "w_qkv": nrm(lk[0], (C, 3 * C)),
            "b_qkv": nrm(lk[1], (1, 3 * C)),
            "w_proj": nrm(lk[2], (C, C)),
            "b_proj": nrm(lk[3], (1, C)),
            "ln2_w": jnp.ones((1, C), jnp.float32),
            "ln2_b": jnp.zeros((1, C), jnp.float32),
            "w_fc1": nrm(lk[4], (C, HIDDEN)),
            "b_fc1": nrm(lk[5], (1, HIDDEN)),
            "w_fc2": nrm(lk[6], (HIDDEN, C)),
            "b_fc2": nrm(lk[7], (1, C)),
        })
    return params


def pack_params(params):
    """One-time wrapper-side relayout (pure layout plumbing):
       - stack per-layer weights: w_qkv (L,C,3C), w_proj (L,C,C), w_fc1, w_fc2
       - fold 1/sqrt(head_dim) into the q columns of w_qkv / b_qkv
       - consolidate all LayerNorm params into one (2L+1, 2, C) array
       - consolidate all Linear biases into one (L, 4, 128) lane-padded array
       - pad lm_head to a lane-dense 128-wide output."""
    C, L = N_EMBD, N_LAYER
    layers = params["layers"]
    scale = 1.0 / jnp.sqrt(jnp.float32(HEAD_DIM))

    def stack(key):
        return jnp.stack([layer[key] for layer in layers], axis=0)

    # LayerNorm params: index 2*l -> ln_1 of layer l, 2*l+1 -> ln_2, 2*L -> ln_f
    ln_rows = []
    for layer in layers:
        ln_rows.append(jnp.stack([layer["ln1_w"][0], layer["ln1_b"][0]]))
        ln_rows.append(jnp.stack([layer["ln2_w"][0], layer["ln2_b"][0]]))
    ln_rows.append(jnp.stack([params["lnf_w"][0], params["lnf_b"][0]]))
    ln = jnp.stack(ln_rows, axis=0)                              # (2L+1, 2, C)

    w_qkv = stack("w_qkv")                                       # (L, C, 3C)
    w_qkv = w_qkv.at[:, :, :C].multiply(scale)                   # fold attn scale into q
    w_proj = stack("w_proj")                                     # (L, C, C)
    w_fc1 = stack("w_fc1")                                       # (L, C, 4C)
    w_fc2 = stack("w_fc2")                                       # (L, 4C, C)

    b_qkv = stack("b_qkv")[:, 0, :]                              # (L, 3C)
    b_qkv = b_qkv.at[:, :C].multiply(scale)
    biases = jnp.zeros((L, 4, LANE), jnp.float32)
    biases = biases.at[:, 0, :3 * C].set(b_qkv)
    biases = biases.at[:, 1, :C].set(stack("b_proj")[:, 0, :])
    biases = biases.at[:, 2, :HIDDEN].set(stack("b_fc1")[:, 0, :])
    biases = biases.at[:, 3, :C].set(stack("b_fc2")[:, 0, :])

    w_lm_pad = jnp.zeros((C, VOCAB_PAD), jnp.float32).at[:, :VOCAB_SIZE].set(params["w_lm"])

    return {
        "wte": params["wte"], "wpe": params["wpe"],
        "ln": ln, "w_qkv": w_qkv, "w_proj": w_proj,
        "w_fc1": w_fc1, "w_fc2": w_fc2,
        "biases": biases, "w_lm_pad": w_lm_pad,
    }


def lumina_forward(packed, input_ids):
    B, T = input_ids.shape
    pos = jnp.arange(T, dtype=jnp.int32)
    # token/position embedding gather is glue outside the kernel
    hidden = packed["wte"][input_ids] + packed["wpe"][pos][None, :, :]   # (B, T, C)
    return lumina_fused_call(hidden, packed)                             # (B, T, V)


if __name__ == "__main__":
    key = jax.random.PRNGKey(0)
    k_param, k_ids = jax.random.split(key)
    params = init_params(k_param)
    packed = pack_params(params)

    B, T = 2, 8
    input_ids = jax.random.randint(k_ids, (B, T), 0, VOCAB_SIZE, dtype=jnp.int32)

    logits = jax.jit(lumina_forward)(packed, input_ids)
    jax.block_until_ready(logits)
    assert logits.shape == (B, T, VOCAB_SIZE)
    print("KERNEL_OK")
</pallas_src>

<mosaic_0001>
module attributes {stable_mosaic.version = 11 : i64} {
  func.func @fused_forward_kernel(%arg0: i32, %arg1: memref<16x32xf32, #tpu.memory_space<vmem>>, %arg2: memref<5x2x32xf32, #tpu.memory_space<vmem>>, %arg3: memref<2x32x96xf32, #tpu.memory_space<vmem>>, %arg4: memref<2x32x32xf32, #tpu.memory_space<vmem>>, %arg5: memref<2x32x128xf32, #tpu.memory_space<vmem>>, %arg6: memref<2x128x32xf32, #tpu.memory_space<vmem>>, %arg7: memref<2x4x128xf32, #tpu.memory_space<vmem>>, %arg8: memref<32x128xf32, #tpu.memory_space<vmem>>, %arg9: memref<16x128xf32, #tpu.memory_space<vmem>>) attributes {dimension_semantics = [#tpu.dimension_semantics<arbitrary>], iteration_bounds = array<i64: 1>, scalar_prefetch = 0 : i64, scratch_operands = 0 : i64, tpu.core_type = #tpu.core_type<tc>, window_params = [{pipeline_mode = #tpu.pipeline_mode<synchronous>, transform_indices = @transform_0, window_bounds = array<i64: 16, 32>}, {pipeline_mode = #tpu.pipeline_mode<synchronous>, transform_indices = @transform_1, window_bounds = array<i64: 5, 2, 32>}, {pipeline_mode = #tpu.pipeline_mode<synchronous>, transform_indices = @transform_2, window_bounds = array<i64: 2, 32, 96>}, {pipeline_mode = #tpu.pipeline_mode<synchronous>, transform_indices = @transform_3, window_bounds = array<i64: 2, 32, 32>}, {pipeline_mode = #tpu.pipeline_mode<synchronous>, transform_indices = @transform_4, window_bounds = array<i64: 2, 32, 128>}, {pipeline_mode = #tpu.pipeline_mode<synchronous>, transform_indices = @transform_5, window_bounds = array<i64: 2, 128, 32>}, {pipeline_mode = #tpu.pipeline_mode<synchronous>, transform_indices = @transform_6, window_bounds = array<i64: 2, 4, 128>}, {pipeline_mode = #tpu.pipeline_mode<synchronous>, transform_indices = @transform_7, window_bounds = array<i64: 32, 128>}, {pipeline_mode = #tpu.pipeline_mode<synchronous>, transform_indices = @transform_8, window_bounds = array<i64: 16, 128>}]} {
    %c0 = arith.constant 0 : index
    %c0_0 = arith.constant 0 : index
    %0 = vector.load %arg1[%c0, %c0_0] : memref<16x32xf32, #tpu.memory_space<vmem>>, vector<16x32xf32>
    %1 = tpu.iota {dimensions = array<i32: 0>} : vector<64x8xi32>
    %c8_i32 = arith.constant 8 : i32
    %c0_i32 = arith.constant 0 : i32
    %2 = arith.cmpi eq, %c8_i32, %c0_i32 : i32
    %c1_i32 = arith.constant 1 : i32
    %3 = arith.select %2, %c1_i32, %c8_i32 : i32
    %4 = vector.broadcast %3 : i32 to vector<64x8xi32>
    %5 = arith.remsi %1, %4 : vector<64x8xi32>
    %c0_i32_1 = arith.constant 0 : i32
    %6 = vector.broadcast %c0_i32_1 : i32 to vector<64x8xi32>
    %7 = arith.cmpi ne, %5, %6 : vector<64x8xi32>
    %c0_i32_2 = arith.constant 0 : i32
    %8 = vector.broadcast %c0_i32_2 : i32 to vector<64x8xi32>
    %9 = arith.cmpi slt, %5, %8 : vector<64x8xi32>
    %c0_i32_3 = arith.constant 0 : i32
    %10 = arith.cmpi slt, %3, %c0_i32_3 : i32
    %11 = vector.broadcast %10 : i1 to vector<64x8xi1>
    %12 = vector.broadcast %11 : vector<64x8xi1> to vector<64x8xi1>
    %13 = arith.xori %9, %12 : vector<64x8xi1>
    %14 = arith.andi %13, %7 : vector<64x8xi1>
    %15 = vector.broadcast %3 : i32 to vector<64x8xi32>
    %16 = arith.addi %5, %15 : vector<64x8xi32>
    %17 = arith.select %14, %16, %5 : vector<64x8xi1>, vector<64x8xi32>
    %18 = tpu.iota {dimensions = array<i32: 1>} : vector<64x8xi32>
    %19 = arith.cmpi sle, %18, %17 : vector<64x8xi32>
    %c0_4 = arith.constant 0 : index
    %c0_5 = arith.constant 0 : index
    %c0_6 = arith.constant 0 : index
    %20 = vector.load %arg7[%c0_4, %c0_5, %c0_6] : memref<2x4x128xf32, #tpu.memory_space<vmem>>, vector<1x4x128xf32>
    %21 = vector.shape_cast %20 : vector<1x4x128xf32> to vector<4x128xf32>
    %c0_7 = arith.constant 0 : index
    %c0_8 = arith.constant 0 : index
    %c0_9 = arith.constant 0 : index
    %22 = vector.load %arg2[%c0_7, %c0_8, %c0_9] : memref<5x2x32xf32, #tpu.memory_space<vmem>>, vector<1x2x32xf32>
    %23 = vector.shape_cast %22 : vector<1x2x32xf32> to vector<2x32xf32>
    %24 = vector.extract_strided_slice %23 {offsets = [0, 0], sizes = [1, 32], strides = [1, 1]} : vector<2x32xf32> to vector<1x32xf32>
    %25 = vector.extract_strided_slice %23 {offsets = [1, 0], sizes = [1, 32], strides = [1, 1]} : vector<2x32xf32> to vector<1x32xf32>
    %cst = arith.constant dense<0.000000e+00> : vector<16xf32>
    %26 = vector.multi_reduction <add>, %0, %cst [1] : vector<16x32xf32> to vector<16xf32>
    %27 = vector.shape_cast %26 : vector<16xf32> to vector<16x1xf32>
    %cst_10 = arith.constant 3.200000e+01 : f32
    %28 = vector.broadcast %cst_10 : f32 to vector<16x1xf32>
    %29 = arith.divf %27, %28 : vector<16x1xf32>
    %30 = vector.broadcast %29 : vector<16x1xf32> to vector<16x32xf32>
    %31 = arith.subf %0, %30 : vector<16x32xf32>
    %32 = arith.mulf %31, %31 : vector<16x32xf32>
    %cst_11 = arith.constant dense<0.000000e+00> : vector<16xf32>
    %33 = vector.multi_reduction <add>, %32, %cst_11 [1] : vector<16x32xf32> to vector<16xf32>
    %34 = vector.shape_cast %33 : vector<16xf32> to vector<16x1xf32>
    %cst_12 = arith.constant 3.200000e+01 : f32
    %35 = vector.broadcast %cst_12 : f32 to vector<16x1xf32>
    %36 = arith.divf %34, %35 : vector<16x1xf32>
    %37 = vector.broadcast %29 : vector<16x1xf32> to vector<16x32xf32>
    %38 = arith.subf %0, %37 : vector<16x32xf32>
    %cst_13 = arith.constant 9.99999974E-6 : f32
    %39 = vector.broadcast %cst_13 : f32 to vector<16x1xf32>
    %40 = arith.addf %36, %39 : vector<16x1xf32>
    %41 = math.rsqrt %40 : vector<16x1xf32>
    %42 = vector.broadcast %41 : vector<16x1xf32> to vector<16x32xf32>
    %43 = arith.mulf %38, %42 : vector<16x32xf32>
    %44 = vector.broadcast %24 : vector<1x32xf32> to vector<16x32xf32>
    %45 = arith.mulf %43, %44 : vector<16x32xf32>
    %46 = vector.broadcast %25 : vector<1x32xf32> to vector<16x32xf32>
    %47 = arith.addf %45, %46 : vector<16x32xf32>
    %c0_14 = arith.constant 0 : index
    %c0_15 = arith.constant 0 : index
    %c0_16 = arith.constant 0 : index
    %48 = vector.load %arg3[%c0_14, %c0_15, %c0_16] : memref<2x32x96xf32, #tpu.memory_space<vmem>>, vector<1x32x96xf32>
    %49 = vector.shape_cast %48 : vector<1x32x96xf32> to vector<32x96xf32>
    %cst_17 = arith.constant dense<0.000000e+00> : vector<16x96xf32>
    %50 = tpu.matmul %47, %49, %cst_17 {dimension_numbers = #tpu.dot_dimension_numbers<[1], [0], [0], [1], [0, 0, 1, 1], [], []>} : vector<16x32xf32>, vector<32x96xf32>, vector<16x96xf32> -> vector<16x96xf32>
    %51 = vector.extract_strided_slice %21 {offsets = [0, 0], sizes = [1, 96], strides = [1, 1]} : vector<4x128xf32> to vector<1x96xf32>
    %52 = vector.broadcast %51 : vector<1x96xf32> to vector<16x96xf32>
    %53 = arith.addf %50, %52 : vector<16x96xf32>
    %54 = vector.extract_strided_slice %53 {offsets = [0, 0], sizes = [16, 32], strides = [1, 1]} : vector<16x96xf32> to vector<16x32xf32>
    %55 = vector.extract_strided_slice %53 {offsets = [0, 32], sizes = [16, 32], strides = [1, 1]} : vector<16x96xf32> to vector<16x32xf32>
    %56 = vector.extract_strided_slice %53 {offsets = [0, 64], sizes = [16, 32], strides = [1, 1]} : vector<16x96xf32> to vector<16x32xf32>
    %57 = vector.extract_strided_slice %54 {offsets = [0, 0], sizes = [8, 8], strides = [1, 1]} : vector<16x32xf32> to vector<8x8xf32>
    %58 = vector.extract_strided_slice %55 {offsets = [0, 0], sizes = [8, 8], strides = [1, 1]} : vector<16x32xf32> to vector<8x8xf32>
    %cst_18 = arith.constant dense<0.000000e+00> : vector<8x8xf32>
    %59 = tpu.matmul %57, %58, %cst_18 {dimension_numbers = #tpu.dot_dimension_numbers<[1], [1], [0], [0], [0, 0, 1, 0], [], []>} : vector<8x8xf32>, vector<8x8xf32>, vector<8x8xf32> -> vector<8x8xf32>
    %60 = vector.extract_strided_slice %54 {offsets = [0, 8], sizes = [8, 8], strides = [1, 1]} : vector<16x32xf32> to vector<8x8xf32>
    %61 = vector.extract_strided_slice %55 {offsets = [0, 8], sizes = [8, 8], strides = [1, 1]} : vector<16x32xf32> to vector<8x8xf32>
    %cst_19 = arith.constant dense<0.000000e+00> : vector<8x8xf32>
    %62 = tpu.matmul %60, %61, %cst_19 {dimension_numbers = #tpu.dot_dimension_numbers<[1], [1], [0], [0], [0, 0, 1, 0], [], []>} : vector<8x8xf32>, vector<8x8xf32>, vector<8x8xf32> -> vector<8x8xf32>
    %63 = vector.extract_strided_slice %54 {offsets = [0, 16], sizes = [8, 8], strides = [1, 1]} : vector<16x32xf32> to vector<8x8xf32>
    %64 = vector.extract_strided_slice %55 {offsets = [0, 16], sizes = [8, 8], strides = [1, 1]} : vector<16x32xf32> to vector<8x8xf32>
    %cst_20 = arith.constant dense<0.000000e+00> : vector<8x8xf32>
    %65 = tpu.matmul %63, %64, %cst_20 {dimension_numbers = #tpu.dot_dimension_numbers<[1], [1], [0], [0], [0, 0, 1, 0], [], []>} : vector<8x8xf32>, vector<8x8xf32>, vector<8x8xf32> -> vector<8x8xf32>
    %66 = vector.extract_strided_slice %54 {offsets = [0, 24], sizes = [8, 8], strides = [1, 1]} : vector<16x32xf32> to vector<8x8xf32>
    %67 = vector.extract_strided_slice %55 {offsets = [0, 24], sizes = [8, 8], strides = [1, 1]} : vector<16x32xf32> to vector<8x8xf32>
    %cst_21 = arith.constant dense<0.000000e+00> : vector<8x8xf32>
    %68 = tpu.matmul %66, %67, %cst_21 {dimension_numbers = #tpu.dot_dimension_numbers<[1], [1], [0], [0], [0, 0, 1, 0], [], []>} : vector<8x8xf32>, vector<8x8xf32>, vector<8x8xf32> -> vector<8x8xf32>
    %69 = vector.extract_strided_slice %54 {offsets = [8, 0], sizes = [8, 8], strides = [1, 1]} : vector<16x32xf32> to vector<8x8xf32>
    %70 = vector.extract_strided_slice %55 {offsets = [8, 0], sizes = [8, 8], strides = [1, 1]} : vector<16x32xf32> to vector<8x8xf32>
    %cst_22 = arith.constant dense<0.000000e+00> : vector<8x8xf32>
    %71 = tpu.matmul %69, %70, %cst_22 {dimension_numbers = #tpu.dot_dimension_numbers<[1], [1], [0], [0], [0, 0, 1, 0], [], []>} : vector<8x8xf32>, vector<8x8xf32>, vector<8x8xf32> -> vector<8x8xf32>
    %72 = vector.extract_strided_slice %54 {offsets = [8, 8], sizes = [8, 8], strides = [1, 1]} : vector<16x32xf32> to vector<8x8xf32>
    %73 = vector.extract_strided_slice %55 {offsets = [8, 8], sizes = [8, 8], strides = [1, 1]} : vector<16x32xf32> to vector<8x8xf32>
    %cst_23 = arith.constant dense<0.000000e+00> : vector<8x8xf32>
    %74 = tpu.matmul %72, %73, %cst_23 {dimension_numbers = #tpu.dot_dimension_numbers<[1], [1], [0], [0], [0, 0, 1, 0], [], []>} : vector<8x8xf32>, vector<8x8xf32>, vector<8x8xf32> -> vector<8x8xf32>
    %75 = vector.extract_strided_slice %54 {offsets = [8, 16], sizes = [8, 8], strides = [1, 1]} : vector<16x32xf32> to vector<8x8xf32>
    %76 = vector.extract_strided_slice %55 {offsets = [8, 16], sizes = [8, 8], strides = [1, 1]} : vector<16x32xf32> to vector<8x8xf32>
    %cst_24 = arith.constant dense<0.000000e+00> : vector<8x8xf32>
    %77 = tpu.matmul %75, %76, %cst_24 {dimension_numbers = #tpu.dot_dimension_numbers<[1], [1], [0], [0], [0, 0, 1, 0], [], []>} : vector<8x8xf32>, vector<8x8xf32>, vector<8x8xf32> -> vector<8x8xf32>
    %78 = vector.extract_strided_slice %54 {offsets = [8, 24], sizes = [8, 8], strides = [1, 1]} : vector<16x32xf32> to vector<8x8xf32>
    %79 = vector.extract_strided_slice %55 {offsets = [8, 24], sizes = [8, 8], strides = [1, 1]} : vector<16x32xf32> to vector<8x8xf32>
    %cst_25 = arith.constant dense<0.000000e+00> : vector<8x8xf32>
    %80 = tpu.matmul %78, %79, %cst_25 {dimension_numbers = #tpu.dot_dimension_numbers<[1], [1], [0], [0], [0, 0, 1, 0], [], []>} : vector<8x8xf32>, vector<8x8xf32>, vector<8x8xf32> -> vector<8x8xf32>
    %81 = tpu.concatenate %59, %62, %65, %68, %71, %74, %77, %80 in 0 : vector<8x8xf32>, vector<8x8xf32>, vector<8x8xf32>, vector<8x8xf32>, vector<8x8xf32>, vector<8x8xf32>, vector<8x8xf32>, vector<8x8xf32> -> vector<64x8xf32>
    %cst_26 = arith.constant -1.000000e+30 : f32
    %82 = vector.broadcast %cst_26 : f32 to vector<64x8xf32>
    %83 = arith.select %19, %81, %82 : vector<64x8xi1>, vector<64x8xf32>
    %cst_27 = arith.constant dense<0xFF800000> : vector<64xf32>
    %84 = vector.multi_reduction <maximumf>, %83, %cst_27 [1] : vector<64x8xf32> to vector<64xf32>
    %85 = vector.shape_cast %84 : vector<64xf32> to vector<64x1xf32>
    %86 = vector.broadcast %85 : vector<64x1xf32> to vector<64x8xf32>
    %87 = arith.subf %83, %86 : vector<64x8xf32>
    %88 = math.exp %87 : vector<64x8xf32>
    %cst_28 = arith.constant dense<0.000000e+00> : vector<64xf32>
    %89 = vector.multi_reduction <add>, %88, %cst_28 [1] : vector<64x8xf32> to vector<64xf32>
    %90 = vector.shape_cast %89 : vector<64xf32> to vector<64x1xf32>
    %91 = tpu.reciprocal %90 : vector<64x1xf32> -> vector<64x1xf32>
    %92 = vector.broadcast %91 : vector<64x1xf32> to vector<64x8xf32>
    %93 = arith.mulf %88, %92 : vector<64x8xf32>
    %94 = vector.extract_strided_slice %93 {offsets = [0, 0], sizes = [8, 8], strides = [1, 1]} : vector<64x8xf32> to vector<8x8xf32>
    %95 = vector.extract_strided_slice %56 {offsets = [0, 0], sizes = [8, 8], strides = [1, 1]} : vector<16x32xf32> to vector<8x8xf32>
    %cst_29 = arith.constant dense<0.000000e+00> : vector<8x8xf32>
    %96 = tpu.matmul %94, %95, %cst_29 {dimension_numbers = #tpu.dot_dimension_numbers<[1], [0], [0], [1], [0, 0, 1, 1], [], []>} : vector<8x8xf32>, vector<8x8xf32>, vector<8x8xf32> -> vector<8x8xf32>
    %97 = vector.extract_strided_slice %93 {offsets = [8, 0], sizes = [8, 8], strides = [1, 1]} : vector<64x8xf32> to vector<8x8xf32>
    %98 = vector.extract_strided_slice %56 {offsets = [0, 8], sizes = [8, 8], strides = [1, 1]} : vector<16x32xf32> to vector<8x8xf32>
    %cst_30 = arith.constant dense<0.000000e+00> : vector<8x8xf32>
    %99 = tpu.matmul %97, %98, %cst_30 {dimension_numbers = #tpu.dot_dimension_numbers<[1], [0], [0], [1], [0, 0, 1, 1], [], []>} : vector<8x8xf32>, vector<8x8xf32>, vector<8x8xf32> -> vector<8x8xf32>
    %100 = vector.extract_strided_slice %93 {offsets = [16, 0], sizes = [8, 8], strides = [1, 1]} : vector<64x8xf32> to vector<8x8xf32>
    %101 = vector.extract_strided_slice %56 {offsets = [0, 16], sizes = [8, 8], strides = [1, 1]} : vector<16x32xf32> to vector<8x8xf32>
    %cst_31 = arith.constant dense<0.000000e+00> : vector<8x8xf32>
    %102 = tpu.matmul %100, %101, %cst_31 {dimension_numbers = #tpu.dot_dimension_numbers<[1], [0], [0], [1], [0, 0, 1, 1], [], []>} : vector<8x8xf32>, vector<8x8xf32>, vector<8x8xf32> -> vector<8x8xf32>
    %103 = vector.extract_strided_slice %93 {offsets = [24, 0], sizes = [8, 8], strides = [1, 1]} : vector<64x8xf32> to vector<8x8xf32>
    %104 = vector.extract_strided_slice %56 {offsets = [0, 24], sizes = [8, 8], strides = [1, 1]} : vector<16x32xf32> to vector<8x8xf32>
    %cst_32 = arith.constant dense<0.000000e+00> : vector<8x8xf32>
    %105 = tpu.matmul %103, %104, %cst_32 {dimension_numbers = #tpu.dot_dimension_numbers<[1], [0], [0], [1], [0, 0, 1, 1], [], []>} : vector<8x8xf32>, vector<8x8xf32>, vector<8x8xf32> -> vector<8x8xf32>
    %106 = tpu.concatenate %96, %99, %102, %105 in 1 : vector<8x8xf32>, vector<8x8xf32>, vector<8x8xf32>, vector<8x8xf32> -> vector<8x32xf32>
    %107 = vector.extract_strided_slice %93 {offsets = [32, 0], sizes = [8, 8], strides = [1, 1]} : vector<64x8xf32> to vector<8x8xf32>
    %108 = vector.extract_strided_slice %56 {offsets = [8, 0], sizes = [8, 8], strides = [1, 1]} : vector<16x32xf32> to vector<8x8xf32>
    %cst_33 = arith.constant dense<0.000000e+00> : vector<8x8xf32>
    %109 = tpu.matmul %107, %108, %cst_33 {dimension_numbers = #tpu.dot_dimension_numbers<[1], [0], [0], [1], [0, 0, 1, 1], [], []>} : vector<8x8xf32>, vector<8x8xf32>, vector<8x8xf32> -> vector<8x8xf32>
    %110 = vector.extract_strided_slice %93 {offsets = [40, 0], sizes = [8, 8], strides = [1, 1]} : vector<64x8xf32> to vector<8x8xf32>
    %111 = vector.extract_strided_slice %56 {offsets = [8, 8], sizes = [8, 8], strides = [1, 1]} : vector<16x32xf32> to vector<8x8xf32>
    %cst_34 = arith.constant dense<0.000000e+00> : vector<8x8xf32>
    %112 = tpu.matmul %110, %111, %cst_34 {dimension_numbers = #tpu.dot_dimension_numbers<[1], [0], [0], [1], [0, 0, 1, 1], [], []>} : vector<8x8xf32>, vector<8x8xf32>, vector<8x8xf32> -> vector<8x8xf32>
    %113 = vector.extract_strided_slice %93 {offsets = [48, 0], sizes = [8, 8], strides = [1, 1]} : vector<64x8xf32> to vector<8x8xf32>
    %114 = vector.extract_strided_slice %56 {offsets = [8, 16], sizes = [8, 8], strides = [1, 1]} : vector<16x32xf32> to vector<8x8xf32>
    %cst_35 = arith.constant dense<0.000000e+00> : vector<8x8xf32>
    %115 = tpu.matmul %113, %114, %cst_35 {dimension_numbers = #tpu.dot_dimension_numbers<[1], [0], [0], [1], [0, 0, 1, 1], [], []>} : vector<8x8xf32>, vector<8x8xf32>, vector<8x8xf32> -> vector<8x8xf32>
    %116 = vector.extract_strided_slice %93 {offsets = [56, 0], sizes = [8, 8], strides = [1, 1]} : vector<64x8xf32> to vector<8x8xf32>
    %117 = vector.extract_strided_slice %56 {offsets = [8, 24], sizes = [8, 8], strides = [1, 1]} : vector<16x32xf32> to vector<8x8xf32>
    %cst_36 = arith.constant dense<0.000000e+00> : vector<8x8xf32>
    %118 = tpu.matmul %116, %117, %cst_36 {dimension_numbers = #tpu.dot_dimension_numbers<[1], [0], [0], [1], [0, 0, 1, 1], [], []>} : vector<8x8xf32>, vector<8x8xf32>, vector<8x8xf32> -> vector<8x8xf32>
    %119 = tpu.concatenate %109, %112, %115, %118 in 1 : vector<8x8xf32>, vector<8x8xf32>, vector<8x8xf32>, vector<8x8xf32> -> vector<8x32xf32>
    %120 = tpu.concatenate %106, %119 in 0 : vector<8x32xf32>, vector<8x32xf32> -> vector<16x32xf32>
    %c0_37 = arith.constant 0 : index
    %c0_38 = arith.constant 0 : index
    %c0_39 = arith.constant 0 : index
    %121 = vector.load %arg4[%c0_37, %c0_38, %c0_39] : memref<2x32x32xf32, #tpu.memory_space<vmem>>, vector<1x32x32xf32>
    %122 = vector.shape_cast %121 : vector<1x32x32xf32> to vector<32x32xf32>
    %cst_40 = arith.constant dense<0.000000e+00> : vector<16x32xf32>
    %123 = tpu.matmul %120, %122, %cst_40 {dimension_numbers = #tpu.dot_dimension_numbers<[1], [0], [0], [1], [0, 0, 1, 1], [], []>} : vector<16x32xf32>, vector<32x32xf32>, vector<16x32xf32> -> vector<16x32xf32>
    %124 = vector.extract_strided_slice %21 {offsets = [1, 0], sizes = [1, 32], strides = [1, 1]} : vector<4x128xf32> to vector<1x32xf32>
    %125 = vector.broadcast %124 : vector<1x32xf32> to vector<16x32xf32>
    %126 = arith.addf %123, %125 : vector<16x32xf32>
    %127 = arith.addf %0, %126 : vector<16x32xf32>
    %c1 = arith.constant 1 : index
    %c0_41 = arith.constant 0 : index
    %c0_42 = arith.constant 0 : index
    %128 = vector.load %arg2[%c1, %c0_41, %c0_42] : memref<5x2x32xf32, #tpu.memory_space<vmem>>, vector<1x2x32xf32>
    %129 = vector.shape_cast %128 : vector<1x2x32xf32> to vector<2x32xf32>
    %130 = vector.extract_strided_slice %129 {offsets = [0, 0], sizes = [1, 32], strides = [1, 1]} : vector<2x32xf32> to vector<1x32xf32>
    %131 = vector.extract_strided_slice %129 {offsets = [1, 0], sizes = [1, 32], strides = [1, 1]} : vector<2x32xf32> to vector<1x32xf32>
    %cst_43 = arith.constant dense<0.000000e+00> : vector<16xf32>
    %132 = vector.multi_reduction <add>, %127, %cst_43 [1] : vector<16x32xf32> to vector<16xf32>
    %133 = vector.shape_cast %132 : vector<16xf32> to vector<16x1xf32>
    %cst_44 = arith.constant 3.200000e+01 : f32
    %134 = vector.broadcast %cst_44 : f32 to vector<16x1xf32>
    %135 = arith.divf %133, %134 : vector<16x1xf32>
    %136 = vector.broadcast %135 : vector<16x1xf32> to vector<16x32xf32>
    %137 = arith.subf %127, %136 : vector<16x32xf32>
    %138 = arith.mulf %137, %137 : vector<16x32xf32>
    %cst_45 = arith.constant dense<0.000000e+00> : vector<16xf32>
    %139 = vector.multi_reduction <add>, %138, %cst_45 [1] : vector<16x32xf32> to vector<16xf32>
    %140 = vector.shape_cast %139 : vector<16xf32> to vector<16x1xf32>
    %cst_46 = arith.constant 3.200000e+01 : f32
    %141 = vector.broadcast %cst_46 : f32 to vector<16x1xf32>
    %142 = arith.divf %140, %141 : vector<16x1xf32>
    %143 = vector.broadcast %135 : vector<16x1xf32> to vector<16x32xf32>
    %144 = arith.subf %127, %143 : vector<16x32xf32>
    %cst_47 = arith.constant 9.99999974E-6 : f32
    %145 = vector.broadcast %cst_47 : f32 to vector<16x1xf32>
    %146 = arith.addf %142, %145 : vector<16x1xf32>
    %147 = math.rsqrt %146 : vector<16x1xf32>
    %148 = vector.broadcast %147 : vector<16x1xf32> to vector<16x32xf32>
    %149 = arith.mulf %144, %148 : vector<16x32xf32>
    %150 = vector.broadcast %130 : vector<1x32xf32> to vector<16x32xf32>
    %151 = arith.mulf %149, %150 : vector<16x32xf32>
    %152 = vector.broadcast %131 : vector<1x32xf32> to vector<16x32xf32>
    %153 = arith.addf %151, %152 : vector<16x32xf32>
    %c0_48 = arith.constant 0 : index
    %c0_49 = arith.constant 0 : index
    %c0_50 = arith.constant 0 : index
    %154 = vector.load %arg5[%c0_48, %c0_49, %c0_50] : memref<2x32x128xf32, #tpu.memory_space<vmem>>, vector<1x32x128xf32>
    %155 = vector.shape_cast %154 : vector<1x32x128xf32> to vector<32x128xf32>
    %cst_51 = arith.constant dense<0.000000e+00> : vector<16x128xf32>
    %156 = tpu.matmul %153, %155, %cst_51 {dimension_numbers = #tpu.dot_dimension_numbers<[1], [0], [0], [1], [0, 0, 1, 1], [], []>} : vector<16x32xf32>, vector<32x128xf32>, vector<16x128xf32> -> vector<16x128xf32>
    %157 = vector.extract_strided_slice %21 {offsets = [2, 0], sizes = [1, 128], strides = [1, 1]} : vector<4x128xf32> to vector<1x128xf32>
    %158 = vector.broadcast %157 : vector<1x128xf32> to vector<16x128xf32>
    %159 = arith.addf %156, %158 : vector<16x128xf32>
    %cst_52 = arith.constant 5.000000e-01 : f32
    %160 = vector.broadcast %cst_52 : f32 to vector<16x128xf32>
    %161 = arith.mulf %160, %159 : vector<16x128xf32>
    %cst_53 = arith.constant 0.707106769 : f32
    %162 = vector.broadcast %cst_53 : f32 to vector<16x128xf32>
    %163 = arith.mulf %159, %162 : vector<16x128xf32>
    %164 = math.erf %163 : vector<16x128xf32>
    %cst_54 = arith.constant 1.000000e+00 : f32
    %165 = vector.broadcast %cst_54 : f32 to vector<16x128xf32>
    %166 = arith.addf %165, %164 : vector<16x128xf32>
    %167 = arith.mulf %161, %166 : vector<16x128xf32>
    %c0_55 = arith.constant 0 : index
    %c0_56 = arith.constant 0 : index
    %c0_57 = arith.constant 0 : index
    %168 = vector.load %arg6[%c0_55, %c0_56, %c0_57] : memref<2x128x32xf32, #tpu.memory_space<vmem>>, vector<1x128x32xf32>
    %169 = vector.shape_cast %168 : vector<1x128x32xf32> to vector<128x32xf32>
    %cst_58 = arith.constant dense<0.000000e+00> : vector<16x32xf32>
    %170 = tpu.matmul %167, %169, %cst_58 {dimension_numbers = #tpu.dot_dimension_numbers<[1], [0], [0], [1], [0, 0, 1, 1], [], []>} : vector<16x128xf32>, vector<128x32xf32>, vector<16x32xf32> -> vector<16x32xf32>
    %171 = vector.extract_strided_slice %21 {offsets = [3, 0], sizes = [1, 32], strides = [1, 1]} : vector<4x128xf32> to vector<1x32xf32>
    %172 = vector.broadcast %171 : vector<1x32xf32> to vector<16x32xf32>
    %173 = arith.addf %170, %172 : vector<16x32xf32>
    %174 = arith.addf %127, %173 : vector<16x32xf32>
    %c1_59 = arith.constant 1 : index
    %c0_60 = arith.constant 0 : index
    %c0_61 = arith.constant 0 : index
    %175 = vector.load %arg7[%c1_59, %c0_60, %c0_61] : memref<2x4x128xf32, #tpu.memory_space<vmem>>, vector<1x4x128xf32>
    %176 = vector.shape_cast %175 : vector<1x4x128xf32> to vector<4x128xf32>
    %c2 = arith.constant 2 : index
    %c0_62 = arith.constant 0 : index
    %c0_63 = arith.constant 0 : index
    %177 = vector.load %arg2[%c2, %c0_62, %c0_63] : memref<5x2x32xf32, #tpu.memory_space<vmem>>, vector<1x2x32xf32>
    %178 = vector.shape_cast %177 : vector<1x2x32xf32> to vector<2x32xf32>
    %179 = vector.extract_strided_slice %178 {offsets = [0, 0], sizes = [1, 32], strides = [1, 1]} : vector<2x32xf32> to vector<1x32xf32>
    %180 = vector.extract_strided_slice %178 {offsets = [1, 0], sizes = [1, 32], strides = [1, 1]} : vector<2x32xf32> to vector<1x32xf32>
    %cst_64 = arith.constant dense<0.000000e+00> : vector<16xf32>
    %181 = vector.multi_reduction <add>, %174, %cst_64 [1] : vector<16x32xf32> to vector<16xf32>
    %182 = vector.shape_cast %181 : vector<16xf32> to vector<16x1xf32>
    %cst_65 = arith.constant 3.200000e+01 : f32
    %183 = vector.broadcast %cst_65 : f32 to vector<16x1xf32>
    %184 = arith.divf %182, %183 : vector<16x1xf32>
    %185 = vector.broadcast %184 : vector<16x1xf32> to vector<16x32xf32>
    %186 = arith.subf %174, %185 : vector<16x32xf32>
    %187 = arith.mulf %186, %186 : vector<16x32xf32>
    %cst_66 = arith.constant dense<0.000000e+00> : vector<16xf32>
    %188 = vector.multi_reduction <add>, %187, %cst_66 [1] : vector<16x32xf32> to vector<16xf32>
    %189 = vector.shape_cast %188 : vector<16xf32> to vector<16x1xf32>
    %cst_67 = arith.constant 3.200000e+01 : f32
    %190 = vector.broadcast %cst_67 : f32 to vector<16x1xf32>
    %191 = arith.divf %189, %190 : vector<16x1xf32>
    %192 = vector.broadcast %184 : vector<16x1xf32> to vector<16x32xf32>
    %193 = arith.subf %174, %192 : vector<16x32xf32>
    %cst_68 = arith.constant 9.99999974E-6 : f32
    %194 = vector.broadcast %cst_68 : f32 to vector<16x1xf32>
    %195 = arith.addf %191, %194 : vector<16x1xf32>
    %196 = math.rsqrt %195 : vector<16x1xf32>
    %197 = vector.broadcast %196 : vector<16x1xf32> to vector<16x32xf32>
    %198 = arith.mulf %193, %197 : vector<16x32xf32>
    %199 = vector.broadcast %179 : vector<1x32xf32> to vector<16x32xf32>
    %200 = arith.mulf %198, %199 : vector<16x32xf32>
    %201 = vector.broadcast %180 : vector<1x32xf32> to vector<16x32xf32>
    %202 = arith.addf %200, %201 : vector<16x32xf32>
    %c1_69 = arith.constant 1 : index
    %c0_70 = arith.constant 0 : index
    %c0_71 = arith.constant 0 : index
    %203 = vector.load %arg3[%c1_69, %c0_70, %c0_71] : memref<2x32x96xf32, #tpu.memory_space<vmem>>, vector<1x32x96xf32>
    %204 = vector.shape_cast %203 : vector<1x32x96xf32> to vector<32x96xf32>
    %cst_72 = arith.constant dense<0.000000e+00> : vector<16x96xf32>
    %205 = tpu.matmul %202, %204, %cst_72 {dimension_numbers = #tpu.dot_dimension_numbers<[1], [0], [0], [1], [0, 0, 1, 1], [], []>} : vector<16x32xf32>, vector<32x96xf32>, vector<16x96xf32> -> vector<16x96xf32>
    %206 = vector.extract_strided_slice %176 {offsets = [0, 0], sizes = [1, 96], strides = [1, 1]} : vector<4x128xf32> to vector<1x96xf32>
    %207 = vector.broadcast %206 : vector<1x96xf32> to vector<16x96xf32>
    %208 = arith.addf %205, %207 : vector<16x96xf32>
    %209 = vector.extract_strided_slice %208 {offsets = [0, 0], sizes = [16, 32], strides = [1, 1]} : vector<16x96xf32> to vector<16x32xf32>
    %210 = vector.extract_strided_slice %208 {offsets = [0, 32], sizes = [16, 32], strides = [1, 1]} : vector<16x96xf32> to vector<16x32xf32>
    %211 = vector.extract_strided_slice %208 {offsets = [0, 64], sizes = [16, 32], strides = [1, 1]} : vector<16x96xf32> to vector<16x32xf32>
    %212 = vector.extract_strided_slice %209 {offsets = [0, 0], sizes = [8, 8], strides = [1, 1]} : vector<16x32xf32> to vector<8x8xf32>
    %213 = vector.extract_strided_slice %210 {offsets = [0, 0], sizes = [8, 8], strides = [1, 1]} : vector<16x32xf32> to vector<8x8xf32>
    %cst_73 = arith.constant dense<0.000000e+00> : vector<8x8xf32>
    %214 = tpu.matmul %212, %213, %cst_73 {dimension_numbers = #tpu.dot_dimension_numbers<[1], [1], [0], [0], [0, 0, 1, 0], [], []>} : vector<8x8xf32>, vector<8x8xf32>, vector<8x8xf32> -> vector<8x8xf32>
    %215 = vector.extract_strided_slice %209 {offsets = [0, 8], sizes = [8, 8], strides = [1, 1]} : vector<16x32xf32> to vector<8x8xf32>
    %216 = vector.extract_strided_slice %210 {offsets = [0, 8], sizes = [8, 8], strides = [1, 1]} : vector<16x32xf32> to vector<8x8xf32>
    %cst_74 = arith.constant dense<0.000000e+00> : vector<8x8xf32>
    %217 = tpu.matmul %215, %216, %cst_74 {dimension_numbers = #tpu.dot_dimension_numbers<[1], [1], [0], [0], [0, 0, 1, 0], [], []>} : vector<8x8xf32>, vector<8x8xf32>, vector<8x8xf32> -> vector<8x8xf32>
    %218 = vector.extract_strided_slice %209 {offsets = [0, 16], sizes = [8, 8], strides = [1, 1]} : vector<16x32xf32> to vector<8x8xf32>
    %219 = vector.extract_strided_slice %210 {offsets = [0, 16], sizes = [8, 8], strides = [1, 1]} : vector<16x32xf32> to vector<8x8xf32>
    %cst_75 = arith.constant dense<0.000000e+00> : vector<8x8xf32>
    %220 = tpu.matmul %218, %219, %cst_75 {dimension_numbers = #tpu.dot_dimension_numbers<[1], [1], [0], [0], [0, 0, 1, 0], [], []>} : vector<8x8xf32>, vector<8x8xf32>, vector<8x8xf32> -> vector<8x8xf32>
    %221 = vector.extract_strided_slice %209 {offsets = [0, 24], sizes = [8, 8], strides = [1, 1]} : vector<16x32xf32> to vector<8x8xf32>
    %222 = vector.extract_strided_slice %210 {offsets = [0, 24], sizes = [8, 8], strides = [1, 1]} : vector<16x32xf32> to vector<8x8xf32>
    %cst_76 = arith.constant dense<0.000000e+00> : vector<8x8xf32>
    %223 = tpu.matmul %221, %222, %cst_76 {dimension_numbers = #tpu.dot_dimension_numbers<[1], [1], [0], [0], [0, 0, 1, 0], [], []>} : vector<8x8xf32>, vector<8x8xf32>, vector<8x8xf32> -> vector<8x8xf32>
    %224 = vector.extract_strided_slice %209 {offsets = [8, 0], sizes = [8, 8], strides = [1, 1]} : vector<16x32xf32> to vector<8x8xf32>
    %225 = vector.extract_strided_slice %210 {offsets = [8, 0], sizes = [8, 8], strides = [1, 1]} : vector<16x32xf32> to vector<8x8xf32>
    %cst_77 = arith.constant dense<0.000000e+00> : vector<8x8xf32>
    %226 = tpu.matmul %224, %225, %cst_77 {dimension_numbers = #tpu.dot_dimension_numbers<[1], [1], [0], [0], [0, 0, 1, 0], [], []>} : vector<8x8xf32>, vector<8x8xf32>, vector<8x8xf32> -> vector<8x8xf32>
    %227 = vector.extract_strided_slice %209 {offsets = [8, 8], sizes = [8, 8], strides = [1, 1]} : vector<16x32xf32> to vector<8x8xf32>
    %228 = vector.extract_strided_slice %210 {offsets = [8, 8], sizes = [8, 8], strides = [1, 1]} : vector<16x32xf32> to vector<8x8xf32>
    %cst_78 = arith.constant dense<0.000000e+00> : vector<8x8xf32>
    %229 = tpu.matmul %227, %228, %cst_78 {dimension_numbers = #tpu.dot_dimension_numbers<[1], [1], [0], [0], [0, 0, 1, 0], [], []>} : vector<8x8xf32>, vector<8x8xf32>, vector<8x8xf32> -> vector<8x8xf32>
    %230 = vector.extract_strided_slice %209 {offsets = [8, 16], sizes = [8, 8], strides = [1, 1]} : vector<16x32xf32> to vector<8x8xf32>
    %231 = vector.extract_strided_slice %210 {offsets = [8, 16], sizes = [8, 8], strides = [1, 1]} : vector<16x32xf32> to vector<8x8xf32>
    %cst_79 = arith.constant dense<0.000000e+00> : vector<8x8xf32>
    %232 = tpu.matmul %230, %231, %cst_79 {dimension_numbers = #tpu.dot_dimension_numbers<[1], [1], [0], [0], [0, 0, 1, 0], [], []>} : vector<8x8xf32>, vector<8x8xf32>, vector<8x8xf32> -> vector<8x8xf32>
    %233 = vector.extract_strided_slice %209 {offsets = [8, 24], sizes = [8, 8], strides = [1, 1]} : vector<16x32xf32> to vector<8x8xf32>
    %234 = vector.extract_strided_slice %210 {offsets = [8, 24], sizes = [8, 8], strides = [1, 1]} : vector<16x32xf32> to vector<8x8xf32>
    %cst_80 = arith.constant dense<0.000000e+00> : vector<8x8xf32>
    %235 = tpu.matmul %233, %234, %cst_80 {dimension_numbers = #tpu.dot_dimension_numbers<[1], [1], [0], [0], [0, 0, 1, 0], [], []>} : vector<8x8xf32>, vector<8x8xf32>, vector<8x8xf32> -> vector<8x8xf32>
    %236 = tpu.concatenate %214, %217, %220, %223, %226, %229, %232, %235 in 0 : vector<8x8xf32>, vector<8x8xf32>, vector<8x8xf32>, vector<8x8xf32>, vector<8x8xf32>, vector<8x8xf32>, vector<8x8xf32>, vector<8x8xf32> -> vector<64x8xf32>
    %cst_81 = arith.constant -1.000000e+30 : f32
    %237 = vector.broadcast %cst_81 : f32 to vector<64x8xf32>
    %238 = arith.select %19, %236, %237 : vector<64x8xi1>, vector<64x8xf32>
    %cst_82 = arith.constant dense<0xFF800000> : vector<64xf32>
    %239 = vector.multi_reduction <maximumf>, %238, %cst_82 [1] : vector<64x8xf32> to vector<64xf32>
    %240 = vector.shape_cast %239 : vector<64xf32> to vector<64x1xf32>
    %241 = vector.broadcast %240 : vector<64x1xf32> to vector<64x8xf32>
    %242 = arith.subf %238, %241 : vector<64x8xf32>
    %243 = math.exp %242 : vector<64x8xf32>
    %cst_83 = arith.constant dense<0.000000e+00> : vector<64xf32>
    %244 = vector.multi_reduction <add>, %243, %cst_83 [1] : vector<64x8xf32> to vector<64xf32>
    %245 = vector.shape_cast %244 : vector<64xf32> to vector<64x1xf32>
    %246 = tpu.reciprocal %245 : vector<64x1xf32> -> vector<64x1xf32>
    %247 = vector.broadcast %246 : vector<64x1xf32> to vector<64x8xf32>
    %248 = arith.mulf %243, %247 : vector<64x8xf32>
    %249 = vector.extract_strided_slice %248 {offsets = [0, 0], sizes = [8, 8], strides = [1, 1]} : vector<64x8xf32> to vector<8x8xf32>
    %250 = vector.extract_strided_slice %211 {offsets = [0, 0], sizes = [8, 8], strides = [1, 1]} : vector<16x32xf32> to vector<8x8xf32>
    %cst_84 = arith.constant dense<0.000000e+00> : vector<8x8xf32>
    %251 = tpu.matmul %249, %250, %cst_84 {dimension_numbers = #tpu.dot_dimension_numbers<[1], [0], [0], [1], [0, 0, 1, 1], [], []>} : vector<8x8xf32>, vector<8x8xf32>, vector<8x8xf32> -> vector<8x8xf32>
    %252 = vector.extract_strided_slice %248 {offsets = [8, 0], sizes = [8, 8], strides = [1, 1]} : vector<64x8xf32> to vector<8x8xf32>
    %253 = vector.extract_strided_slice %211 {offsets = [0, 8], sizes = [8, 8], strides = [1, 1]} : vector<16x32xf32> to vector<8x8xf32>
    %cst_85 = arith.constant dense<0.000000e+00> : vector<8x8xf32>
    %254 = tpu.matmul %252, %253, %cst_85 {dimension_numbers = #tpu.dot_dimension_numbers<[1], [0], [0], [1], [0, 0, 1, 1], [], []>} : vector<8x8xf32>, vector<8x8xf32>, vector<8x8xf32> -> vector<8x8xf32>
    %255 = vector.extract_strided_slice %248 {offsets = [16, 0], sizes = [8, 8], strides = [1, 1]} : vector<64x8xf32> to vector<8x8xf32>
    %256 = vector.extract_strided_slice %211 {offsets = [0, 16], sizes = [8, 8], strides = [1, 1]} : vector<16x32xf32> to vector<8x8xf32>
    %cst_86 = arith.constant dense<0.000000e+00> : vector<8x8xf32>
    %257 = tpu.matmul %255, %256, %cst_86 {dimension_numbers = #tpu.dot_dimension_numbers<[1], [0], [0], [1], [0, 0, 1, 1], [], []>} : vector<8x8xf32>, vector<8x8xf32>, vector<8x8xf32> -> vector<8x8xf32>
    %258 = vector.extract_strided_slice %248 {offsets = [24, 0], sizes = [8, 8], strides = [1, 1]} : vector<64x8xf32> to vector<8x8xf32>
    %259 = vector.extract_strided_slice %211 {offsets = [0, 24], sizes = [8, 8], strides = [1, 1]} : vector<16x32xf32> to vector<8x8xf32>
    %cst_87 = arith.constant dense<0.000000e+00> : vector<8x8xf32>
    %260 = tpu.matmul %258, %259, %cst_87 {dimension_numbers = #tpu.dot_dimension_numbers<[1], [0], [0], [1], [0, 0, 1, 1], [], []>} : vector<8x8xf32>, vector<8x8xf32>, vector<8x8xf32> -> vector<8x8xf32>
    %261 = tpu.concatenate %251, %254, %257, %260 in 1 : vector<8x8xf32>, vector<8x8xf32>, vector<8x8xf32>, vector<8x8xf32> -> vector<8x32xf32>
    %262 = vector.extract_strided_slice %248 {offsets = [32, 0], sizes = [8, 8], strides = [1, 1]} : vector<64x8xf32> to vector<8x8xf32>
    %263 = vector.extract_strided_slice %211 {offsets = [8, 0], sizes = [8, 8], strides = [1, 1]} : vector<16x32xf32> to vector<8x8xf32>
    %cst_88 = arith.constant dense<0.000000e+00> : vector<8x8xf32>
    %264 = tpu.matmul %262, %263, %cst_88 {dimension_numbers = #tpu.dot_dimension_numbers<[1], [0], [0], [1], [0, 0, 1, 1], [], []>} : vector<8x8xf32>, vector<8x8xf32>, vector<8x8xf32> -> vector<8x8xf32>
    %265 = vector.extract_strided_slice %248 {offsets = [40, 0], sizes = [8, 8], strides = [1, 1]} : vector<64x8xf32> to vector<8x8xf32>
    %266 = vector.extract_strided_slice %211 {offsets = [8, 8], sizes = [8, 8], strides = [1, 1]} : vector<16x32xf32> to vector<8x8xf32>
    %cst_89 = arith.constant dense<0.000000e+00> : vector<8x8xf32>
    %267 = tpu.matmul %265, %266, %cst_89 {dimension_numbers = #tpu.dot_dimension_numbers<[1], [0], [0], [1], [0, 0, 1, 1], [], []>} : vector<8x8xf32>, vector<8x8xf32>, vector<8x8xf32> -> vector<8x8xf32>
    %268 = vector.extract_strided_slice %248 {offsets = [48, 0], sizes = [8, 8], strides = [1, 1]} : vector<64x8xf32> to vector<8x8xf32>
    %269 = vector.extract_strided_slice %211 {offsets = [8, 16], sizes = [8, 8], strides = [1, 1]} : vector<16x32xf32> to vector<8x8xf32>
    %cst_90 = arith.constant dense<0.000000e+00> : vector<8x8xf32>
    %270 = tpu.matmul %268, %269, %cst_90 {dimension_numbers = #tpu.dot_dimension_numbers<[1], [0], [0], [1], [0, 0, 1, 1], [], []>} : vector<8x8xf32>, vector<8x8xf32>, vector<8x8xf32> -> vector<8x8xf32>
    %271 = vector.extract_strided_slice %248 {offsets = [56, 0], sizes = [8, 8], strides = [1, 1]} : vector<64x8xf32> to vector<8x8xf32>
    %272 = vector.extract_strided_slice %211 {offsets = [8, 24], sizes = [8, 8], strides = [1, 1]} : vector<16x32xf32> to vector<8x8xf32>
    %cst_91 = arith.constant dense<0.000000e+00> : vector<8x8xf32>
    %273 = tpu.matmul %271, %272, %cst_91 {dimension_numbers = #tpu.dot_dimension_numbers<[1], [0], [0], [1], [0, 0, 1, 1], [], []>} : vector<8x8xf32>, vector<8x8xf32>, vector<8x8xf32> -> vector<8x8xf32>
    %274 = tpu.concatenate %264, %267, %270, %273 in 1 : vector<8x8xf32>, vector<8x8xf32>, vector<8x8xf32>, vector<8x8xf32> -> vector<8x32xf32>
    %275 = tpu.concatenate %261, %274 in 0 : vector<8x32xf32>, vector<8x32xf32> -> vector<16x32xf32>
    %c1_92 = arith.constant 1 : index
    %c0_93 = arith.constant 0 : index
    %c0_94 = arith.constant 0 : index
    %276 = vector.load %arg4[%c1_92, %c0_93, %c0_94] : memref<2x32x32xf32, #tpu.memory_space<vmem>>, vector<1x32x32xf32>
    %277 = vector.shape_cast %276 : vector<1x32x32xf32> to vector<32x32xf32>
    %cst_95 = arith.constant dense<0.000000e+00> : vector<16x32xf32>
    %278 = tpu.matmul %275, %277, %cst_95 {dimension_numbers = #tpu.dot_dimension_numbers<[1], [0], [0], [1], [0, 0, 1, 1], [], []>} : vector<16x32xf32>, vector<32x32xf32>, vector<16x32xf32> -> vector<16x32xf32>
    %279 = vector.extract_strided_slice %176 {offsets = [1, 0], sizes = [1, 32], strides = [1, 1]} : vector<4x128xf32> to vector<1x32xf32>
    %280 = vector.broadcast %279 : vector<1x32xf32> to vector<16x32xf32>
    %281 = arith.addf %278, %280 : vector<16x32xf32>
    %282 = arith.addf %174, %281 : vector<16x32xf32>
    %c3 = arith.constant 3 : index
    %c0_96 = arith.constant 0 : index
    %c0_97 = arith.constant 0 : index
    %283 = vector.load %arg2[%c3, %c0_96, %c0_97] : memref<5x2x32xf32, #tpu.memory_space<vmem>>, vector<1x2x32xf32>
    %284 = vector.shape_cast %283 : vector<1x2x32xf32> to vector<2x32xf32>
    %285 = vector.extract_strided_slice %284 {offsets = [0, 0], sizes = [1, 32], strides = [1, 1]} : vector<2x32xf32> to vector<1x32xf32>
    %286 = vector.extract_strided_slice %284 {offsets = [1, 0], sizes = [1, 32], strides = [1, 1]} : vector<2x32xf32> to vector<1x32xf32>
    %cst_98 = arith.constant dense<0.000000e+00> : vector<16xf32>
    %287 = vector.multi_reduction <add>, %282, %cst_98 [1] : vector<16x32xf32> to vector<16xf32>
    %288 = vector.shape_cast %287 : vector<16xf32> to vector<16x1xf32>
    %cst_99 = arith.constant 3.200000e+01 : f32
    %289 = vector.broadcast %cst_99 : f32 to vector<16x1xf32>
    %290 = arith.divf %288, %289 : vector<16x1xf32>
    %291 = vector.broadcast %290 : vector<16x1xf32> to vector<16x32xf32>
    %292 = arith.subf %282, %291 : vector<16x32xf32>
    %293 = arith.mulf %292, %292 : vector<16x32xf32>
    %cst_100 = arith.constant dense<0.000000e+00> : vector<16xf32>
    %294 = vector.multi_reduction <add>, %293, %cst_100 [1] : vector<16x32xf32> to vector<16xf32>
    %295 = vector.shape_cast %294 : vector<16xf32> to vector<16x1xf32>
    %cst_101 = arith.constant 3.200000e+01 : f32
    %296 = vector.broadcast %cst_101 : f32 to vector<16x1xf32>
    %297 = arith.divf %295, %296 : vector<16x1xf32>
    %298 = vector.broadcast %290 : vector<16x1xf32> to vector<16x32xf32>
    %299 = arith.subf %282, %298 : vector<16x32xf32>
    %cst_102 = arith.constant 9.99999974E-6 : f32
    %300 = vector.broadcast %cst_102 : f32 to vector<16x1xf32>
    %301 = arith.addf %297, %300 : vector<16x1xf32>
    %302 = math.rsqrt %301 : vector<16x1xf32>
    %303 = vector.broadcast %302 : vector<16x1xf32> to vector<16x32xf32>
    %304 = arith.mulf %299, %303 : vector<16x32xf32>
    %305 = vector.broadcast %285 : vector<1x32xf32> to vector<16x32xf32>
    %306 = arith.mulf %304, %305 : vector<16x32xf32>
    %307 = vector.broadcast %286 : vector<1x32xf32> to vector<16x32xf32>
    %308 = arith.addf %306, %307 : vector<16x32xf32>
    %c1_103 = arith.constant 1 : index
    %c0_104 = arith.constant 0 : index
    %c0_105 = arith.constant 0 : index
    %309 = vector.load %arg5[%c1_103, %c0_104, %c0_105] : memref<2x32x128xf32, #tpu.memory_space<vmem>>, vector<1x32x128xf32>
    %310 = vector.shape_cast %309 : vector<1x32x128xf32> to vector<32x128xf32>
    %cst_106 = arith.constant dense<0.000000e+00> : vector<16x128xf32>
    %311 = tpu.matmul %308, %310, %cst_106 {dimension_numbers = #tpu.dot_dimension_numbers<[1], [0], [0], [1], [0, 0, 1, 1], [], []>} : vector<16x32xf32>, vector<32x128xf32>, vector<16x128xf32> -> vector<16x128xf32>
    %312 = vector.extract_strided_slice %176 {offsets = [2, 0], sizes = [1, 128], strides = [1, 1]} : vector<4x128xf32> to vector<1x128xf32>
    %313 = vector.broadcast %312 : vector<1x128xf32> to vector<16x128xf32>
    %314 = arith.addf %311, %313 : vector<16x128xf32>
    %cst_107 = arith.constant 5.000000e-01 : f32
    %315 = vector.broadcast %cst_107 : f32 to vector<16x128xf32>
    %316 = arith.mulf %315, %314 : vector<16x128xf32>
    %cst_108 = arith.constant 0.707106769 : f32
    %317 = vector.broadcast %cst_108 : f32 to vector<16x128xf32>
    %318 = arith.mulf %314, %317 : vector<16x128xf32>
    %319 = math.erf %318 : vector<16x128xf32>
    %cst_109 = arith.constant 1.000000e+00 : f32
    %320 = vector.broadcast %cst_109 : f32 to vector<16x128xf32>
    %321 = arith.addf %320, %319 : vector<16x128xf32>
    %322 = arith.mulf %316, %321 : vector<16x128xf32>
    %c1_110 = arith.constant 1 : index
    %c0_111 = arith.constant 0 : index
    %c0_112 = arith.constant 0 : index
    %323 = vector.load %arg6[%c1_110, %c0_111, %c0_112] : memref<2x128x32xf32, #tpu.memory_space<vmem>>, vector<1x128x32xf32>
    %324 = vector.shape_cast %323 : vector<1x128x32xf32> to vector<128x32xf32>
    %cst_113 = arith.constant dense<0.000000e+00> : vector<16x32xf32>
    %325 = tpu.matmul %322, %324, %cst_113 {dimension_numbers = #tpu.dot_dimension_numbers<[1], [0], [0], [1], [0, 0, 1, 1], [], []>} : vector<16x128xf32>, vector<128x32xf32>, vector<16x32xf32> -> vector<16x32xf32>
    %326 = vector.extract_strided_slice %176 {offsets = [3, 0], sizes = [1, 32], strides = [1, 1]} : vector<4x128xf32> to vector<1x32xf32>
    %327 = vector.broadcast %326 : vector<1x32xf32> to vector<16x32xf32>
    %328 = arith.addf %325, %327 : vector<16x32xf32>
    %329 = arith.addf %282, %328 : vector<16x32xf32>
    %c4 = arith.constant 4 : index
    %c0_114 = arith.constant 0 : index
    %c0_115 = arith.constant 0 : index
    %330 = vector.load %arg2[%c4, %c0_114, %c0_115] : memref<5x2x32xf32, #tpu.memory_space<vmem>>, vector<1x2x32xf32>
    %331 = vector.shape_cast %330 : vector<1x2x32xf32> to vector<2x32xf32>
    %332 = vector.extract_strided_slice %331 {offsets = [0, 0], sizes = [1, 32], strides = [1, 1]} : vector<2x32xf32> to vector<1x32xf32>
    %333 = vector.extract_strided_slice %331 {offsets = [1, 0], sizes = [1, 32], strides = [1, 1]} : vector<2x32xf32> to vector<1x32xf32>
    %cst_116 = arith.constant dense<0.000000e+00> : vector<16xf32>
    %334 = vector.multi_reduction <add>, %329, %cst_116 [1] : vector<16x32xf32> to vector<16xf32>
    %335 = vector.shape_cast %334 : vector<16xf32> to vector<16x1xf32>
    %cst_117 = arith.constant 3.200000e+01 : f32
    %336 = vector.broadcast %cst_117 : f32 to vector<16x1xf32>
    %337 = arith.divf %335, %336 : vector<16x1xf32>
    %338 = vector.broadcast %337 : vector<16x1xf32> to vector<16x32xf32>
    %339 = arith.subf %329, %338 : vector<16x32xf32>
    %340 = arith.mulf %339, %339 : vector<16x32xf32>
    %cst_118 = arith.constant dense<0.000000e+00> : vector<16xf32>
    %341 = vector.multi_reduction <add>, %340, %cst_118 [1] : vector<16x32xf32> to vector<16xf32>
    %342 = vector.shape_cast %341 : vector<16xf32> to vector<16x1xf32>
    %cst_119 = arith.constant 3.200000e+01 : f32
    %343 = vector.broadcast %cst_119 : f32 to vector<16x1xf32>
    %344 = arith.divf %342, %343 : vector<16x1xf32>
    %345 = vector.broadcast %337 : vector<16x1xf32> to vector<16x32xf32>
    %346 = arith.subf %329, %345 : vector<16x32xf32>
    %cst_120 = arith.constant 9.99999974E-6 : f32
    %347 = vector.broadcast %cst_120 : f32 to vector<16x1xf32>
    %348 = arith.addf %344, %347 : vector<16x1xf32>
    %349 = math.rsqrt %348 : vector<16x1xf32>
    %350 = vector.broadcast %349 : vector<16x1xf32> to vector<16x32xf32>
    %351 = arith.mulf %346, %350 : vector<16x32xf32>
    %352 = vector.broadcast %332 : vector<1x32xf32> to vector<16x32xf32>
    %353 = arith.mulf %351, %352 : vector<16x32xf32>
    %354 = vector.broadcast %333 : vector<1x32xf32> to vector<16x32xf32>
    %355 = arith.addf %353, %354 : vector<16x32xf32>
    %c0_121 = arith.constant 0 : index
    %c0_122 = arith.constant 0 : index
    %356 = vector.load %arg8[%c0_121, %c0_122] : memref<32x128xf32, #tpu.memory_space<vmem>>, vector<32x128xf32>
    %cst_123 = arith.constant dense<0.000000e+00> : vector<16x128xf32>
    %357 = tpu.matmul %355, %356, %cst_123 {dimension_numbers = #tpu.dot_dimension_numbers<[1], [0], [0], [1], [0, 0, 1, 1], [], []>} : vector<16x32xf32>, vector<32x128xf32>, vector<16x128xf32> -> vector<16x128xf32>
    %c0_124 = arith.constant 0 : index
    %c0_125 = arith.constant 0 : index
    %358 = vector.load %arg9[%c0_124, %c0_125] : memref<16x128xf32, #tpu.memory_space<vmem>>, vector<16x128xf32>
    tpu.vector_store %arg9[%c0_124, %c0_125], %357 {strides = array<i32>} : memref<16x128xf32, #tpu.memory_space<vmem>>, vector<16x128xf32>,
    return
  }
  func.func @transform_0(%arg0: i32) -> (i32, i32) {
    %c0_i32 = arith.constant 0 : i32
    %c0_i32_0 = arith.constant 0 : i32
    %c0_i32_1 = arith.constant 0 : i32
    return %c0_i32, %c0_i32_0 : i32, i32
  }
  func.func @transform_1(%arg0: i32) -> (i32, i32, i32) {
    %c0_i32 = arith.constant 0 : i32
    %c0_i32_0 = arith.constant 0 : i32
    %c0_i32_1 = arith.constant 0 : i32
    %c0_i32_2 = arith.constant 0 : i32
    return %c0_i32, %c0_i32_0, %c0_i32_1 : i32, i32, i32
  }
  func.func @transform_2(%arg0: i32) -> (i32, i32, i32) {
    %c0_i32 = arith.constant 0 : i32
    %c0_i32_0 = arith.constant 0 : i32
    %c0_i32_1 = arith.constant 0 : i32
    %c0_i32_2 = arith.constant 0 : i32
    return %c0_i32, %c0_i32_0, %c0_i32_1 : i32, i32, i32
  }
  func.func @transform_3(%arg0: i32) -> (i32, i32, i32) {
    %c0_i32 = arith.constant 0 : i32
    %c0_i32_0 = arith.constant 0 : i32
    %c0_i32_1 = arith.constant 0 : i32
    %c0_i32_2 = arith.constant 0 : i32
    return %c0_i32, %c0_i32_0, %c0_i32_1 : i32, i32, i32
  }
  func.func @transform_4(%arg0: i32) -> (i32, i32, i32) {
    %c0_i32 = arith.constant 0 : i32
    %c0_i32_0 = arith.constant 0 : i32
    %c0_i32_1 = arith.constant 0 : i32
    %c0_i32_2 = arith.constant 0 : i32
    return %c0_i32, %c0_i32_0, %c0_i32_1 : i32, i32, i32
  }
  func.func @transform_5(%arg0: i32) -> (i32, i32, i32) {
    %c0_i32 = arith.constant 0 : i32
    %c0_i32_0 = arith.constant 0 : i32
    %c0_i32_1 = arith.constant 0 : i32
    %c0_i32_2 = arith.constant 0 : i32
    return %c0_i32, %c0_i32_0, %c0_i32_1 : i32, i32, i32
  }
  func.func @transform_6(%arg0: i32) -> (i32, i32, i32) {
    %c0_i32 = arith.constant 0 : i32
    %c0_i32_0 = arith.constant 0 : i32
    %c0_i32_1 = arith.constant 0 : i32
    %c0_i32_2 = arith.constant 0 : i32
    return %c0_i32, %c0_i32_0, %c0_i32_1 : i32, i32, i32
  }
  func.func @transform_7(%arg0: i32) -> (i32, i32) {
    %c0_i32 = arith.constant 0 : i32
    %c0_i32_0 = arith.constant 0 : i32
    %c0_i32_1 = arith.constant 0 : i32
    return %c0_i32, %c0_i32_0 : i32, i32
  }
  func.func @transform_8(%arg0: i32) -> (i32, i32) {
    %c0_i32 = arith.constant 0 : i32
    %c0_i32_0 = arith.constant 0 : i32
    %c0_i32_1 = arith.constant 0 : i32
    return %c0_i32, %c0_i32_0 : i32, i32
  }
}

</mosaic_0001>

<bundles_post_ra>
// kernel: lumina_forward.1
= control target key start
LH: loop header
LB: loop body
LE: loop exit
PB: predicated region body
PF: predicated region fallthrough
CT: control target
= control target key end

     0   :  { %vm3427_vm0 = vcmask 261120   ;;  %s3418_s0 = inlined_call_operand.vmem [shape: f32[16,32], index: 0, kind: input, shape index: {}]   ;;  %s3419_s1 = inlined_call_operand.vmem [shape: f32[5,2,32], index: 1, kind: input, shape index: {}]   ;;  %s3420_s2 = inlined_call_operand.vmem [shape: f32[2,32,96], index: 2, kind: input, shape index: {}]   ;;  %s3421_s3 = inlined_call_operand.vmem [shape: f32[2,32,32], index: 3, kind: input, shape index: {}]   ;;  %s3422_s4 = inlined_call_operand.vmem [shape: f32[2,32,128], index: 4, kind: input, shape index: {}]   ;;  %s3423_s5 = inlined_call_operand.vmem [shape: f32[2,128,32], index: 5, kind: input, shape index: {}]   ;;  %s3424_s6 = inlined_call_operand.vmem [shape: f32[2,4,128], index: 6, kind: input, shape index: {}]   ;;  %s3425_s7 = inlined_call_operand.vmem [shape: f32[32,128], index: 7, kind: input, shape index: {}]   ;;  %s3426_s8 = inlined_call_operand.hbm [shape: f32[16,128], index: 8, kind: output, shape index: {}]  }
   0x1   :  { %v2598_v0 = vld [vmem:[%s3418_s0] sm:$0xff] }
   0x2   :  { %13 = vsyncpa [#allocation3], 0  ;;  %v150_v1 = vsel %vm3427_vm0, %v2598_v0, 0.0  ;;  %v2605_v2 = vld [vmem:[%s3418_s0 + $0x8] sm:$0xff]  ;;  %v2533_v4 = vmov 32.0   ;;  %v210_v21 = vld [vmem:[%s3420_s2 + $0x18] sm:$0xff] }
   0x3   :  { %151 = vadd.xlane.f32.xlu0 %v150_v1  ;;  %v153_v3 = vsel %vm3427_vm0, %v2605_v2, 0.0  ;;  %2411 = vrcp.f32 %v2533_v4  ;;  %230 = vmatpush.msra.mxu0 %v210_v21  ;;  %v209_v22 = vld [vmem:[%s3420_s2 + $0x10] sm:$0xff]  ;;  %v208_v23 = vld [vmem:[%s3420_s2 + $0x8] sm:$0xff]  ;;  %v207_v24 = vld [vmem:[%s3420_s2] sm:$0xff]  ;;  %s2534_s20 = smov 120   ;;  %s2535_s21 = smov 88  }
   0x4   :  { %v148_v36 = vld [vmem:[%s3419_s1] sm:$0x3]  ;;  %s2536_s22 = smov 104   ;;  %s2537_s23 = smov 96   ;;  %vm3428_vm8 = vcmask 64512  }
   0x5   :  { %231 = vmatpush.msra.mxu0 %v209_v22  ;;  %v201_v40 = vperm.slane %v148_v36, 0  ;;  %v204_v44 = vperm.slane %v148_v36, 1  ;;  %v2639_v54 = vld [vmem:[%s3424_s6] sm:$0xf]  ;;  %s2538_s24 = smov 80   ;;  %s2539_s25 = smov 72  }
   0x6   :  { %v211_v55 = vperm.slane %v2639_v54, 0  ;;  %s2540_s26 = smov 112   ;;  %s2541_s27 = smov 40  }
   0x7   :  { %232 = vmatpush.msra.mxu0 %v208_v23  ;;  %s2542_s28 = smov 48   ;;  %s2543_s29 = smov 56  }
   0x8   :  { %s2544_s30 = smov 64   ;;  %s2545_s0 = smov 8  }
   0x9   :  { %v2412_v5 = vpop.eup %2411  ;;  %233 = vmatpush.msra.mxu0 %v207_v24  ;;  %s2546_s9 = smov 24   ;;  %s2547_s10 = smov 16  }
   0xa   :  { %v157_v6 = vmul.f32 32.0, %v2412_v5  ;;  %vm161_vm1 = vweird.f32 %v2412_v5 }
   0xb   :  { %154 = vadd.xlane.f32.xlu0 %v153_v3 }
   0xc   :  { %v158_v7 = vsub.f32 1.0, %v157_v6 }
   0xe   :  { %v159_v8 = vmul.f32 %v2412_v5, %v158_v7 }
  0x10   :  { %v160_v9 = vadd.f32 %v2412_v5, %v159_v8 }
  0x12   :  { %v2609_v10 = vsel %vm161_vm1, %v2412_v5, %v160_v9 }
  0x76   :  { %v152_v11 = vpop.xlane.xlu0 %151 }
  0x77   :  { %v163_v12 = vmul.f32 %v2609_v10, %v152_v11 }
  0x79   :  { %v165_v13 = vsub.f32 %v2598_v0, %v163_v12 }
  0x7b   :  { %v167_v14 = vmul.f32 %v165_v13, %v165_v13 }
  0x7d   :  { %v169_v15 = vsel %vm3427_vm0, %v167_v14, 0.0 }
  0x7e   :  { %170 = vadd.xlane.f32.xlu1 %v169_v15  ;;  %v155_v16 = vpop.xlane.xlu0 %154 }
  0x7f   :  { %v164_v17 = vmul.f32 %v2609_v10, %v155_v16 }
  0x81   :  { %v166_v18 = vsub.f32 %v2605_v2, %v164_v17 }
  0x83   :  { %v168_v19 = vmul.f32 %v166_v18, %v166_v18 }
  0x85   :  { %v172_v20 = vsel %vm3427_vm0, %v168_v19, 0.0 }
  0x86   :  { %173 = vadd.xlane.f32.xlu1 %v172_v20 }
  0xf1   :  { %v171_v25 = vpop.xlane.xlu1 %170 }
  0xf2   :  { %v175_v26 = vmul.f32 %v171_v25, %v2609_v10 }
  0xf4   :  { %v177_v27 = vadd.f32 1e-05, %v175_v26 }
  0xf6   :  { %2413 = vrsqrt.f32 %v177_v27  ;;  %vm185_vm3 = vweird.f32 %v177_v27 }
  0xf9   :  { %v174_v28 = vpop.xlane.xlu1 %173 }
  0xfa   :  { %v176_v29 = vmul.f32 %v174_v28, %v2609_v10 }
  0xfc   :  { %v2414_v30 = vpop.eup %2413  ;;  %v178_v31 = vadd.f32 1e-05, %v176_v29 }
  0xfd   :  { %v180_v32 = vmul.f32 %v2414_v30, %v177_v27  ;;  %vm186_vm2 = vweird.f32 %v2414_v30 }
  0xfe   :  { %2415 = vrsqrt.f32 %v178_v31  ;;  %vm187_vm4 = vmor %vm185_vm3, %vm186_vm2  ;;  %vm195_vm6 = vweird.f32 %v178_v31 }
  0xff   :  { %v181_v33 = vmul.f32 %v2414_v30, %v180_v32 }
 0x101   :  { %v182_v34 = vmul.f32 0.5, %v181_v33 }
 0x103   :  { %v183_v35 = vsub.f32 1.5, %v182_v34 }
 0x104   :  { %v2416_v37 = vpop.eup %2415 }
 0x105   :  { %v184_v38 = vmul.f32 %v2414_v30, %v183_v35  ;;  %v190_v39 = vmul.f32 %v2416_v37, %v178_v31  ;;  %vm196_vm5 = vweird.f32 %v2416_v37 }
 0x106   :  { %vm197_vm7 = vmor %vm195_vm6, %vm196_vm5 }
 0x107   :  { %v188_v41 = vsel %vm187_vm4, %v2414_v30, %v184_v38  ;;  %v191_v42 = vmul.f32 %v2416_v37, %v190_v39 }
 0x108   :  { %v199_v43 = vmul.f32 %v188_v41, %v165_v13  ;;  %v32_v13 = vlaneseq }
 0x109   :  { %v192_v45 = vmul.f32 0.5, %v191_v42 }
 0x10a   :  { %v202_v46 = vmul.f32 %v201_v40, %v199_v43  ;;  %v33_v14 = vshrl.u32 %v32_v13, 7  ;;  %v138_v19 = vand.u32 127, %v32_v13 }
 0x10b   :  { %v193_v47 = vsub.f32 1.5, %v192_v45 }
 0x10c   :  { %v205_v48 = vadd.f32 %v204_v44, %v202_v46  ;;  %v34_v15 = vadd.s32 8, %v33_v14  ;;  %v36_v16 = vadd.s32 24, %v33_v14  ;;  %v35_v22 = vadd.s32 16, %v33_v14 }
 0x10d   :  { %v194_v49 = vmul.f32 %v2416_v37, %v193_v47  ;;  %v40_v35 = vadd.s32 56, %v33_v14  ;;  %v38_v39 = vadd.s32 40, %v33_v14  ;;  %v45_v43 = vand.u32 7, %v33_v14 }
 0x10e   :  { %2265 = vmatmul.msk.f32.vlgmr.msra.gmra.mxu0 %vm3427_vm0, %v205_v48  ;;  %v66_v20 = vand.u32 7, %v36_v16  ;;  %v59_v28 = vand.u32 7, %v35_v22 }
 0x10f   :  { %v198_v50 = vsel %vm197_vm7, %v2416_v37, %v194_v49  ;;  %v39_v37 = vadd.s32 48, %v33_v14  ;;  %v94_v38 = vand.u32 7, %v40_v35  ;;  %v80_v42 = vand.u32 7, %v38_v39 }
 0x110   :  { %v200_v51 = vmul.f32 %v198_v50, %v166_v18  ;;  %v52_v18 = vand.u32 7, %v34_v15  ;;  %vm2696_vm10 = vcmp.le.s32.totalorder %v138_v19, %v66_v20  ;;  %vm2706_vm11 = vcmp.le.s32.totalorder %v138_v19, %v59_v28 }
 0x111   :  { %vm2713_vm12 = vcmp.le.s32.totalorder %v138_v19, %v94_v38  ;;  %vm2724_vm14 = vcmp.le.s32.totalorder %v138_v19, %v80_v42  ;;  %vm2730_vm15 = vcmp.le.s32.totalorder %v138_v19, %v45_v43 }
 0x112   :  { %v203_v52 = vmul.f32 %v201_v40, %v200_v51  ;;  %vm2692_vm9 = vcmp.le.s32.totalorder %v138_v19, %v52_v18  ;;  %v87_v40 = vand.u32 7, %v39_v37 }
 0x114   :  { %v206_v53 = vadd.f32 %v204_v44, %v203_v52  ;;  %v37_v44 = vadd.s32 32, %v33_v14  ;;  %vm2717_vm13 = vcmp.le.s32.totalorder %v138_v19, %v87_v40 }
 0x116   :  { %2266 = vmatmul.msk.f32.gmra.mxu0 %vm3427_vm0, %v206_v53  ;;  %v73_v53 = vand.u32 7, %v37_v44 }
 0x118   :  { %vm2740_vm1 = vcmp.le.s32.totalorder %v138_v19, %v73_v53 }
 0x18b   :  { %v235_v56 = vpop.f32.mrf.mxu0 }
 0x18c   :  { %v2642_v57 = vadd.f32 %v235_v56, %v211_v55 }
 0x18e   :  { %269 = vrot.lane.b32.xlu0 %v2642_v57, %s2534_s20  ;;  %271 = vrot.lane.b32.xlu2 %v2642_v57, %s2535_s21 }
 0x193   :  { %v238_v58 = vpop.f32.mrf.mxu0 }
 0x194   :  { %v2648_v59 = vadd.f32 %v238_v58, %v211_v55 }
 0x196   :  { %325 = vrot.lane.b32.xlu0 %v2642_v57, %s2536_s22  ;;  %242 = vrot.lane.b32.xlu2 %v2642_v57, %s2537_s23  ;;  %v2381_v38 = vpack.i.bf16 %v2648_v59, %v2642_v57 }
 0x197   :  { %354 = vrot.lane.b32.xlu1 %v2648_v59, %s2537_s23 }
 0x19e   :  { %299 = vrot.lane.b32.xlu2 %v2642_v57, %s2538_s24  ;;  %382 = vrot.lane.b32.xlu0 %v2648_v59, %s2535_s21 }
 0x19f   :  { %436 = vrot.lane.b32.xlu1 %v2648_v59, %s2536_s22 }
 0x1a6   :  { %327 = vrot.lane.b32.xlu2 %v2642_v57, %s2539_s25  ;;  %408 = vrot.lane.b32.xlu0 %v2648_v59, %s2540_s26 }
 0x1a7   :  { %410 = vrot.lane.b32.xlu1 %v2648_v59, %s2538_s24 }
 0x1ae   :  { %297 = vrot.lane.b32.xlu2 %v2642_v57, %s2540_s26 }
 0x1b6   :  { %438 = vrot.lane.b32.xlu2 %v2648_v59, %s2539_s25 }
 0x1be   :  { %380 = vrot.lane.b32.xlu2 %v2648_v59, %s2534_s20 }
 0x1e8   :  { %v272_v60 = vpop.permute.xlu2 %271 }
 0x1e9   :  { %2269 = vmatpush.xpose.msk.msra.mxu3 %vm3428_vm8, %v272_v60 }
 0x1f0   :  { %v243_v61 = vpop.permute.xlu2 %242 }
 0x1f1   :  { %2267 = vmatpush.xpose.msk.msra.mxu1 %vm3428_vm8, %v243_v61 }
 0x1f4   :  { %2268 = vmatmul.msk.f32.vlgmr.msra.gmra.mxu1 %vm3428_vm8, %v2642_v57 }
 0x1f8   :  { %v300_v62 = vpop.permute.xlu2 %299 }
 0x1f9   :  { %2271 = vmatpush.xpose.msk.msrb.mxu3 %vm3428_vm8, %v300_v62 }
 0x200   :  { %v328_v63 = vpop.permute.xlu2 %327  ;;  %v270_v1 = vpop.permute.xlu0 %269 }
 0x201   :  { %2270 = vmatmul.msk.f32.vlgmr.msra.gmra.mxu3 %vm3428_vm8, %v270_v1  ;;  %2273 = vmatpush.xpose.msk.msrb.mxu1 %vm3428_vm8, %v328_v63 }
 0x208   :  { %v298_v3 = vpop.permute.xlu2 %297  ;;  %v326_v4 = vpop.permute.xlu0 %325 }
 0x209   :  { %v355_v5 = vpop.permute.xlu1 %354  ;;  %2272 = vmatmul.msk.f32.vlgmr.msrb.gmra.mxu3 %vm3428_vm8, %v298_v3  ;;  %2274 = vmatmul.msk.f32.vlgmr.msrb.gmra.mxu1 %vm3428_vm8, %v326_v4 }
 0x20a   :  { %2275 = vmatpush.xpose.msk.msra.mxu2 %vm3428_vm8, %v355_v5 }
 0x20d   :  { %2276 = vmatmul.msk.f32.vlgmr.msra.gmra.mxu2 %vm3428_vm8, %v2648_v59 }
 0x210   :  { %v439_v6 = vpop.permute.xlu2 %438  ;;  %v383_v7 = vpop.permute.xlu0 %382 }
 0x211   :  { %v437_v8 = vpop.permute.xlu1 %436  ;;  %2277 = vmatpush.xpose.msk.msra.mxu3 %vm3428_vm8, %v383_v7  ;;  %2281 = vmatpush.xpose.msk.msrb.mxu2 %vm3428_vm8, %v439_v6 }
 0x215   :  { %2282 = vmatmul.msk.f32.vlgmr.msrb.gmra.mxu2 %vm3428_vm8, %v437_v8 }
 0x218   :  { %v381_v9 = vpop.permute.xlu2 %380  ;;  %v409_v12 = vpop.permute.xlu0 %408 }
 0x219   :  { %v411_v11 = vpop.permute.xlu1 %410  ;;  %2278 = vmatmul.msk.f32.vlgmr.msra.gmra.mxu3 %vm3428_vm8, %v381_v9 }
 0x21a   :  { %2279 = vmatpush.xpose.msk.msra.mxu1 %vm3428_vm8, %v411_v11 }
 0x21d   :  { %2280 = vmatmul.msk.f32.vlgmr.msra.gmra.mxu1 %vm3428_vm8, %v409_v12 }
 0x271   :  { %v266_v17 = vpop.f32.mrf.mxu1 }
 0x272   :  { %v464_v61 = vsel %vm2730_vm15, %v266_v17, -1e+30 }
 0x273   :  { %v472_v63 = vsel %vm3428_vm8, %v464_v61, -inf }
 0x284   :  { %v294_v23 = vpop.f32.mrf.mxu3 }
 0x285   :  { %v465_v25 = vsel %vm2692_vm9, %v294_v23, -1e+30 }
 0x286   :  { %v350_v26 = vpop.f32.mrf.mxu1  ;;  %v475_v27 = vsel %vm3428_vm8, %v465_v25, -inf }
 0x287   :  { %v467_v29 = vsel %vm2696_vm10, %v350_v26, -1e+30  ;;  %476 = vmax.xlane.f32.xlu1 %v475_v27 }
 0x288   :  { %v481_v30 = vsel %vm3428_vm8, %v467_v29, -inf }
 0x289   :  { %482 = vmax.xlane.f32.xlu2 %v481_v30 }
 0x28c   :  { %v322_v32 = vpop.f32.mrf.mxu3 }
 0x28d   :  { %v466_v33 = vsel %vm2706_vm11, %v322_v32, -1e+30 }
 0x28e   :  { %v478_v34 = vsel %vm3428_vm8, %v466_v33, -inf }
 0x28f   :  { %479 = vmax.xlane.f32.xlu0 %v478_v34 }
 0x290   :  { %v377_v36 = vpop.f32.mrf.mxu2 }
 0x291   :  { %v468_v1 = vsel %vm2740_vm1, %v377_v36, -1e+30 }
 0x292   :  { %v484_v3 = vsel %vm3428_vm8, %v468_v1, -inf }
 0x298   :  { %v461_v45 = vpop.f32.mrf.mxu2 }
 0x299   :  { %v471_v47 = vsel %vm2713_vm12, %v461_v45, -1e+30 }
 0x29a   :  { %v433_v48 = vpop.f32.mrf.mxu1  ;;  %v493_v49 = vsel %vm3428_vm8, %v471_v47, -inf }
 0x29b   :  { %v470_v51 = vsel %vm2717_vm13, %v433_v48, -1e+30  ;;  %494 = vmax.xlane.f32.xlu2 %v493_v49 }
 0x29c   :  { %v405_v55 = vpop.f32.mrf.mxu3  ;;  %v490_v56 = vsel %vm3428_vm8, %v470_v51, -inf }
 0x29d   :  { %v469_v58 = vsel %vm2724_vm14, %v405_v55, -1e+30  ;;  %491 = vmax.xlane.f32.xlu0 %v490_v56 }
 0x29e   :  { %v487_v60 = vsel %vm3428_vm8, %v469_v58, -inf }
 0x29f   :  { %488 = vmax.xlane.f32.xlu1 %v487_v60 }
 0x2a3   :  { %473 = vmax.xlane.f32.xlu2 %v472_v63 }
 0x2a7   :  { %485 = vmax.xlane.f32.xlu1 %v484_v3 }
 0x2fa   :  { %v477_v4 = vpop.xlane.xlu1 %476 }
 0x2fb   :  { %v497_v5 = vsub.f32 %v465_v25, %v477_v4 }
 0x2fc   :  { %v483_v6 = vpop.xlane.xlu2 %482 }
 0x2fd   :  { %v506_v7 = vmul.f32 1.442695, %v497_v5  ;;  %v499_v8 = vsub.f32 %v467_v29, %v483_v6 }
 0x2ff   :  { %2417 = vpow2.f32 %v506_v7  ;;  %v510_v9 = vmul.f32 1.442695, %v499_v8 }
 0x301   :  { %2419 = vpow2.f32 %v510_v9 }
 0x302   :  { %v480_v11 = vpop.xlane.xlu0 %479 }
 0x303   :  { %v498_v12 = vsub.f32 %v466_v33, %v480_v11 }
 0x305   :  { %v2748_v13 = vpop.eup %2417  ;;  %v508_v14 = vmul.f32 1.442695, %v498_v12 }
 0x306   :  { %v523_v15 = vsel %vm3428_vm8, %v2748_v13, 0.0 }
 0x307   :  { %v2752_v16 = vpop.eup %2419  ;;  %2421 = vpow2.f32 %v508_v14  ;;  %524 = vadd.xlane.f32.xlu2 %v523_v15 }
 0x308   :  { %v529_v17 = vsel %vm3428_vm8, %v2752_v16, 0.0 }
 0x309   :  { %530 = vadd.xlane.f32.xlu0 %v529_v17 }
 0x30d   :  { %v2756_v18 = vpop.eup %2421 }
 0x30e   :  { %v495_v19 = vpop.xlane.xlu2 %494  ;;  %v526_v20 = vsel %vm3428_vm8, %v2756_v18, 0.0 }
 0x30f   :  { %v503_v22 = vsub.f32 %v471_v47, %v495_v19  ;;  %527 = vadd.xlane.f32.xlu1 %v526_v20 }
 0x310   :  { %v492_v23 = vpop.xlane.xlu0 %491 }
 0x311   :  { %v518_v25 = vmul.f32 1.442695, %v503_v22  ;;  %v502_v26 = vsub.f32 %v470_v51, %v492_v23 }
 0x312   :  { %v489_v27 = vpop.xlane.xlu1 %488 }
 0x313   :  { %2423 = vpow2.f32 %v518_v25  ;;  %v516_v28 = vmul.f32 1.442695, %v502_v26  ;;  %v501_v29 = vsub.f32 %v469_v58, %v489_v27 }
 0x315   :  { %2425 = vpow2.f32 %v516_v28  ;;  %v514_v30 = vmul.f32 1.442695, %v501_v29 }
 0x316   :  { %v474_v39 = vpop.xlane.xlu2 %473 }
 0x317   :  { %2427 = vpow2.f32 %v514_v30  ;;  %v496_v40 = vsub.f32 %v464_v61, %v474_v39 }
 0x319   :  { %v2760_v32 = vpop.eup %2423  ;;  %v504_v42 = vmul.f32 1.442695, %v496_v40 }
 0x31a   :  { %v541_v33 = vsel %vm3428_vm8, %v2760_v32, 0.0  ;;  %v486_v43 = vpop.xlane.xlu1 %485 }
 0x31b   :  { %v2764_v34 = vpop.eup %2425  ;;  %542 = vadd.xlane.f32.xlu0 %v541_v33  ;;  %v500_v44 = vsub.f32 %v468_v1, %v486_v43  ;;  %2429 = vpow2.f32 %v504_v42 }
 0x31c   :  { %v538_v35 = vsel %vm3428_vm8, %v2764_v34, 0.0 }
 0x31d   :  { %v2768_v36 = vpop.eup %2427  ;;  %539 = vadd.xlane.f32.xlu1 %v538_v35  ;;  %v512_v45 = vmul.f32 1.442695, %v500_v44 }
 0x31e   :  { %v535_v37 = vsel %vm3428_vm8, %v2768_v36, 0.0 }
 0x31f   :  { %536 = vadd.xlane.f32.xlu2 %v535_v37  ;;  %2431 = vpow2.f32 %v512_v45 }
 0x321   :  { %v2781_v47 = vpop.eup %2429 }
 0x322   :  { %v520_v48 = vsel %vm3428_vm8, %v2781_v47, 0.0 }
 0x325   :  { %v2785_v49 = vpop.eup %2431 }
 0x32f   :  { %2382 = vrot.lane.b32.xlu0 %v2381_v38, %s2541_s27 }
 0x336   :  { %2392 = vrot.lane.b32.xlu1 %v2381_v38, %s2542_s28 }
 0x337   :  { %2387 = vrot.lane.b32.xlu2 %v2381_v38, %s2543_s29 }
 0x33e   :  { %664 = vrot.lane.b32.xlu1 %v2642_v57, %s2544_s30  ;;  %v532_v57 = vsel %vm3428_vm8, %v2785_v49, 0.0 }
 0x346   :  { %785 = vrot.lane.b32.xlu1 %v2648_v59, %s2544_s30 }
 0x359   :  { %521 = vadd.xlane.f32.xlu0 %v520_v48 }
 0x360   :  { %533 = vadd.xlane.f32.xlu2 %v532_v57 }
 0x37a   :  { %v525_v59 = vpop.xlane.xlu2 %524 }
 0x37b   :  { %2433 = vrcp.f32 %v525_v59  ;;  %v569_v8 = vand.u32 2147483648, %v525_v59  ;;  %vm563_vm3 = vweird.f32 %v525_v59  ;;  %v567_v11 = vand.u32 2147483647, %v525_v59 }
 0x37c   :  { %v531_v51 = vpop.xlane.xlu0 %530 }
 0x37d   :  { %2435 = vrcp.f32 %v531_v51  ;;  %v570_v19 = vor.u32 1.1754944e-38, %v569_v8  ;;  %vm568_vm6 = vcmp.eq.f32.partialorder %v567_v11, 8.507059e+37  ;;  %vm591_vm7 = vweird.f32 %v531_v51 }
 0x37e   :  { %v595_v26 = vand.u32 2147483647, %v531_v51  ;;  %v597_v27 = vand.u32 2147483648, %v531_v51 }
 0x380   :  { %v598_v45 = vor.u32 1.1754944e-38, %v597_v27 }
 0x381   :  { %v2434_v53 = vpop.eup %2433 }
 0x382   :  { %v559_v55 = vmul.f32 %v2434_v53, %v525_v59  ;;  %v2789_v58 = vpop.xlane.xlu1 %527  ;;  %vm564_vm2 = vweird.f32 %v2434_v53 }
 0x383   :  { %v2436_v56 = vpop.eup %2435  ;;  %2437 = vrcp.f32 %v2789_v58  ;;  %vm565_vm4 = vmor %vm563_vm3, %vm564_vm2  ;;  %vm596_vm2 = vcmp.eq.f32.partialorder %v595_v26, 8.507059e+37  ;;  %vm577_vm3 = vweird.f32 %v2789_v58 }
 0x384   :  { %v560_v60 = vsub.f32 1.0, %v559_v55  ;;  %v587_v61 = vmul.f32 %v2436_v56, %v531_v51  ;;  %vm592_vm5 = vweird.f32 %v2436_v56  ;;  %v581_v55 = vand.u32 2147483647, %v2789_v58 }
 0x385   :  { %vm2808_vm0 = vmor %vm591_vm7, %vm592_vm5 }
 0x386   :  { %v561_v63 = vmul.f32 %v2434_v53, %v560_v60  ;;  %v588_v3 = vsub.f32 1.0, %v587_v61 }
 0x388   :  { %v562_v6 = vadd.f32 %v2434_v53, %v561_v63  ;;  %v589_v9 = vmul.f32 %v2436_v56, %v588_v3 }
 0x389   :  { %v2797_v5 = vpop.eup %2437 }
 0x38a   :  { %v573_v12 = vmul.f32 %v2797_v5, %v2789_v58  ;;  %v566_v17 = vsel %vm565_vm4, %v2434_v53, %v562_v6  ;;  %v590_v20 = vadd.f32 %v2436_v56, %v589_v9  ;;  %vm578_vm4 = vweird.f32 %v2797_v5 }
 0x38b   :  { %v571_v29 = vsel %vm568_vm6, %v570_v19, %v566_v17 }
 0x38c   :  { %v574_v23 = vsub.f32 1.0, %v573_v12  ;;  %v594_v37 = vsel %vm2808_vm0, %v2436_v56, %v590_v20  ;;  %v657_v44 = vmul.f32 %v2748_v13, %v571_v29  ;;  %v583_v13 = vand.u32 2147483648, %v2789_v58 }
 0x38d   :  { %v599_v53 = vsel %vm596_vm2, %v598_v45, %v594_v37 }
 0x38e   :  { %v2792_v1 = vpop.xlane.xlu0 %542  ;;  %v575_v40 = vmul.f32 %v2797_v5, %v574_v23  ;;  %v659_v19 = vmul.f32 %v2752_v16, %v599_v53 }
 0x38f   :  { %2439 = vrcp.f32 %v2792_v1  ;;  %v653_v3 = vand.u32 2147483648, %v2792_v1  ;;  %vm647_vm6 = vweird.f32 %v2792_v1 }
 0x390   :  { %v2795_v4 = vpop.xlane.xlu1 %539  ;;  %v576_v56 = vadd.f32 %v2797_v5, %v575_v40 }
 0x391   :  { %2441 = vrcp.f32 %v2795_v4 }
 0x392   :  { %v537_v7 = vpop.xlane.xlu2 %536 }
 0x393   :  { %2443 = vrcp.f32 %v537_v7  ;;  %v625_v57 = vand.u32 2147483648, %v537_v7  ;;  %v623_v51 = vand.u32 2147483647, %v537_v7  ;;  %vm619_vm5 = vweird.f32 %v537_v7 }
 0x395   :  { %v2802_v14 = vpop.eup %2439  ;;  %v626_v6 = vor.u32 1.1754944e-38, %v625_v57  ;;  %vm624_vm2 = vcmp.eq.f32.partialorder %v623_v51, 8.507059e+37 }
 0x396   :  { %v643_v15 = vmul.f32 %v2802_v14, %v2792_v1 }
 0x397   :  { %v2806_v22 = vpop.eup %2441 }
 0x398   :  { %v644_v28 = vsub.f32 1.0, %v643_v15  ;;  %v629_v42 = vmul.f32 %v2806_v22, %v2795_v4  ;;  %v651_v15 = vand.u32 2147483647, %v2792_v1  ;;  %v654_v1 = vor.u32 1.1754944e-38, %v653_v3 }
 0x399   :  { %v2444_v25 = vpop.eup %2443 }
 0x39a   :  { %v615_v33 = vmul.f32 %v2444_v25, %v537_v7  ;;  %v2388_v35 = vpop.permute.xlu2 %2387  ;;  %v645_v48 = vmul.f32 %v2802_v14, %v644_v28  ;;  %vm620_vm0 = vweird.f32 %v2444_v25  ;;  %v630_v60 = vsub.f32 1.0, %v629_v42 }
 0x39b   :  { %v2390_v38 = vunpack.i.h.bf16 %v2388_v35  ;;  %v2389_v39 = vunpack.i.l.bf16 %v2388_v35  ;;  %vm621_vm7 = vmor %vm619_vm5, %vm620_vm0  ;;  %vm3451_vm0 = vweird.f32 %v2802_v14 }
 0x39c   :  { %v616_v43 = vsub.f32 1.0, %v615_v33  ;;  %v646_v63 = vadd.f32 %v2802_v14, %v645_v48  ;;  %vm649_vm5 = vmor %vm647_vm6, %vm3451_vm0  ;;  %v631_v58 = vmul.f32 %v2806_v22, %v630_v60  ;;  %vm634_vm6 = vweird.f32 %v2806_v22 }
 0x39d   :  { %711 = vmatpush.msrb.mxu0 %v2389_v39 }
 0x39e   :  { %v617_v59 = vmul.f32 %v2444_v25, %v616_v43  ;;  %2284 = vmatmul.msk.f32.vlgmr.msrb.gmra.mxu0 %vm3428_vm8, %v657_v44  ;;  %vm2833_vm8 = vmor %vm577_vm3, %vm578_vm4  ;;  %v650_v26 = vsel %vm649_vm5, %v2802_v14, %v646_v63  ;;  %vm3452_vm3 = vcmask 64512   ;;  %vm582_vm4 = vcmp.eq.f32.partialorder %v581_v55, 8.507059e+37 }
 0x39f   :  { %832 = vmatpush.msra.mxu0 %v2390_v38  ;;  %v580_v20 = vsel %vm2833_vm8, %v2797_v5, %v576_v56  ;;  %vm652_vm8 = vcmp.eq.f32.partialorder %v651_v15, 8.507059e+37  ;;  %v632_v27 = vadd.f32 %v2806_v22, %v631_v58  ;;  %v637_v14 = vand.u32 2147483647, %v2795_v4  ;;  %vm3454_vm5 = vmmov %vm3452_vm3  ;;  %v906_v58 = vld [vmem:[%s3421_s3 + $0x10] sm:$0xff] }
 0x3a0   :  { %v618_v61 = vadd.f32 %v2444_v25, %v617_v59  ;;  %v655_v5 = vsel %vm652_vm8, %v654_v1, %v650_v26 }
 0x3a1   :  { %v2383_v8 = vpop.permute.xlu0 %2382  ;;  %v663_v35 = vmul.f32 %v2760_v32, %v655_v5 }
 0x3a2   :  { %v622_v9 = vsel %vm621_vm7, %v2444_v25, %v618_v61  ;;  %v2385_v11 = vunpack.i.h.bf16 %v2383_v8  ;;  %v2384_v12 = vunpack.i.l.bf16 %v2383_v8  ;;  %v584_v25 = vor.u32 1.1754944e-38, %v583_v13  ;;  %vm3453_vm7 = vmmov %vm3452_vm3 }
 0x3a3   :  { %v627_v17 = vsel %vm624_vm2, %v626_v6, %v622_v9  ;;  %vm633_vm2 = vweird.f32 %v2795_v4 }
 0x3a4   :  { %763 = vmatpush.msra.mxu2 %v2384_v12  ;;  %v661_v23 = vmul.f32 %v2768_v36, %v627_v17  ;;  %v585_v16 = vsel %vm582_vm4, %v584_v25, %v580_v20  ;;  %v639_v36 = vand.u32 2147483648, %v2795_v4  ;;  %vm635_vm0 = vmor %vm633_vm2, %vm634_vm6  ;;  %vm638_vm4 = vcmp.eq.f32.partialorder %v637_v14, 8.507059e+37  ;;  %v907_v20 = vld [vmem:[%s3421_s3 + $0x18] sm:$0xff]  ;;  %v904_v25 = vld [vmem:[%s3421_s3] sm:$0xff] }
 0x3a5   :  { %2286 = vmatmul.msk.f32.vlgmr.msra.gmra.mxu2 %vm3452_vm3, %v659_v19  ;;  %v658_v33 = vmul.f32 %v2756_v18, %v585_v16  ;;  %v636_v37 = vsel %vm635_vm0, %v2806_v22, %v632_v27 }
 0x3a6   :  { %884 = vmatpush.msrb.mxu2 %v2385_v11  ;;  %2288 = vmatmul.msk.f32.vlgmr.msra.gmra.mxu0 %vm3453_vm7, %v661_v23  ;;  %v640_v38 = vor.u32 1.1754944e-38, %v639_v36  ;;  %vm3455_vm7 = vmmov %vm3452_vm3  ;;  %v905_v23 = vld [vmem:[%s3421_s3 + $0x8] sm:$0xff] }
 0x3a8   :  { %v2393_v28 = vpop.permute.xlu1 %2392  ;;  %v641_v39 = vsel %vm638_vm4, %v640_v38, %v636_v37 }
 0x3a9   :  { %v2395_v29 = vunpack.i.h.bf16 %v2393_v28  ;;  %v2394_v30 = vunpack.i.l.bf16 %v2393_v28  ;;  %v662_v4 = vmul.f32 %v2764_v34, %v641_v39  ;;  %v908_v39 = vperm.slane %v2639_v54, 1 }
 0x3ab   :  { %737 = vmatpush.msrb.mxu1 %v2394_v30 }
 0x3ac   :  { %2285 = vmatmul.msk.f32.vlgmr.msrb.gmra.mxu1 %vm3454_vm5, %v658_v33 }
 0x3ad   :  { %858 = vmatpush.msra.mxu1 %v2395_v29  ;;  %2290 = vmatmul.msk.f32.vlgmr.msrb.gmra.mxu2 %vm3452_vm3, %v663_v35 }
 0x3b0   :  { %v665_v40 = vpop.permute.xlu1 %664 }
 0x3b1   :  { %685 = vmatpush.msrb.mxu3 %v665_v40 }
 0x3b4   :  { %2289 = vmatmul.msk.f32.vlgmr.msra.gmra.mxu1 %vm3455_vm7, %v662_v4 }
 0x3b8   :  { %v786_v18 = vpop.permute.xlu1 %785 }
 0x3b9   :  { %806 = vmatpush.msra.mxu3 %v786_v18 }
 0x3cc   :  { %v522_v42 = vpop.xlane.xlu0 %521 }
 0x3cd   :  { %2445 = vrcp.f32 %v522_v42  ;;  %v555_v45 = vand.u32 2147483648, %v522_v42  ;;  %v553_v57 = vand.u32 2147483647, %v522_v42  ;;  %vm549_vm6 = vweird.f32 %v522_v42 }
 0x3cf   :  { %v556_v34 = vor.u32 1.1754944e-38, %v555_v45  ;;  %vm554_vm0 = vcmp.eq.f32.partialorder %v553_v57, 8.507059e+37 }
 0x3d3   :  { %v2446_v32 = vpop.eup %2445  ;;  %v534_v22 = vpop.xlane.xlu2 %533 }
 0x3d4   :  { %v545_v43 = vmul.f32 %v2446_v32, %v522_v42  ;;  %2447 = vrcp.f32 %v534_v22  ;;  %vm550_vm8 = vweird.f32 %v2446_v32  ;;  %v611_v60 = vand.u32 2147483648, %v534_v22 }
 0x3d5   :  { %vm551_vm2 = vmor %vm549_vm6, %vm550_vm8  ;;  %v609_v3 = vand.u32 2147483647, %v534_v22  ;;  %vm605_vm4 = vweird.f32 %v534_v22 }
 0x3d6   :  { %v546_v44 = vsub.f32 1.0, %v545_v43  ;;  %v612_v8 = vor.u32 1.1754944e-38, %v611_v60  ;;  %vm3456_vm6 = vmmov %vm3452_vm3  ;;  %v993_v60 = vld [vmem:[%s3422_s4 + $0x8] sm:$0xff] }
 0x3d7   :  { %vm610_vm8 = vcmp.eq.f32.partialorder %v609_v3, 8.507059e+37 }
 0x3d8   :  { %v547_v48 = vmul.f32 %v2446_v32, %v546_v44 }
 0x3da   :  { %v2448_v59 = vpop.eup %2447  ;;  %v548_v51 = vadd.f32 %v2446_v32, %v547_v48 }
 0x3db   :  { %v601_v53 = vmul.f32 %v2448_v59, %v534_v22  ;;  %vm606_vm5 = vweird.f32 %v2448_v59 }
 0x3dc   :  { %v552_v55 = vsel %vm551_vm2, %v2446_v32, %v548_v51  ;;  %vm607_vm7 = vmor %vm605_vm4, %vm606_vm5  ;;  %vm3430_vm2 = vcmask 130048  }
 0x3dd   :  { %v557_v13 = vsel %vm554_vm0, %v556_v34, %v552_v55  ;;  %v602_v56 = vsub.f32 1.0, %v601_v53  ;;  %vm3429_vm0 = vcmask 195584   ;;  %vm3457_vm5 = vmmov %vm3452_vm3 }
 0x3de   :  { %v656_v61 = vmul.f32 %v2781_v47, %v557_v13  ;;  %vm3459_vm4 = vmmov %vm3457_vm5  ;;  %v995_v13 = vld [vmem:[%s3422_s4 + $0x18] sm:$0xff] }
 0x3df   :  { %v603_v63 = vmul.f32 %v2448_v59, %v602_v56  ;;  %1015 = vmatpush.msra.mxu2 %v995_v13  ;;  %v994_v56 = vld [vmem:[%s3422_s4 + $0x10] sm:$0xff]  ;;  %v1119_v13 = vld [vmem:[%s3423_s5 + $0x28] sm:$0xff] }
 0x3e0   :  { %2283 = vmatmul.msk.f32.vlgmr.msrb.gmra.mxu3 %vm3452_vm3, %v656_v61  ;;  %vm3458_vm3 = vcmask 261120   ;;  %v992_v61 = vld [vmem:[%s3422_s4] sm:$0xff] }
 0x3e1   :  { %v604_v6 = vadd.f32 %v2448_v59, %v603_v63  ;;  %927 = vmatpush.msrb.mxu3 %v907_v20  ;;  %1016 = vmatpush.msra.mxu2 %v994_v56 }
 0x3e3   :  { %v608_v9 = vsel %vm607_vm7, %v2448_v59, %v604_v6  ;;  %928 = vmatpush.msrb.mxu3 %v906_v58  ;;  %vm3460_vm7 = vmmov %vm3458_vm3  ;;  %1017 = vmatpush.msra.mxu2 %v993_v60 }
 0x3e4   :  { %v613_v11 = vsel %vm610_vm8, %v612_v8, %v608_v9  ;;  %vm3461_vm8 = vmmov %vm3458_vm3 }
 0x3e5   :  { %v660_v12 = vmul.f32 %v2785_v49, %v613_v11  ;;  %929 = vmatpush.msrb.mxu3 %v905_v23  ;;  %1018 = vmatpush.msra.mxu2 %v992_v61  ;;  %v1118_v61 = vld [vmem:[%s3423_s5 + $0x20] sm:$0xff] }
 0x3e7   :  { %930 = vmatpush.msrb.mxu3 %v904_v25 }
 0x3e8   :  { %2287 = vmatmul.msk.f32.vlgmr.msra.gmra.mxu3 %vm3456_vm6, %v660_v12  ;;  %vm3462_vm6 = vmmov %vm3458_vm3 }
 0x41b   :  { %v713_v7 = vpop.f32.mrf.mxu0 }
 0x41c   :  { %769 = vrot.lane.b32.xlu1 %v713_v7, %s2545_s0 }
 0x423   :  { %v834_v17 = vpop.f32.mrf.mxu0 }
 0x428   :  { %v765_v47 = vpop.f32.mrf.mxu2 }
 0x429   :  { %v739_v15 = vpop.f32.mrf.mxu1  ;;  %777 = vrot.lane.b32.xlu0 %v765_v47, %s2546_s9 }
 0x42a   :  { %773 = vrot.lane.b32.xlu1 %v739_v15, %s2547_s10  ;;  %v2293_v15 = vld [vmem:[%s3419_s1 + $0x2] sm:$0x3] }
 0x42b   :  { %v986_v20 = vperm.slane %v2293_v15, 0  ;;  %v989_v25 = vperm.slane %v2293_v15, 1 }
 0x430   :  { %v886_v49 = vpop.f32.mrf.mxu2 }
 0x431   :  { %v860_v19 = vpop.f32.mrf.mxu1 }
 0x432   :  { %890 = vrot.lane.b32.xlu1 %v834_v17, %s2545_s0  ;;  %894 = vrot.lane.b32.xlu2 %v860_v19, %s2547_s10 }
 0x43a   :  { %898 = vrot.lane.b32.xlu1 %v886_v49, %s2546_s9 }
 0x463   :  { %v687_v1 = vpop.f32.mrf.mxu3 }
 0x46b   :  { %v808_v30 = vpop.f32.mrf.mxu3 }
 0x48c   :  { %v895_v33 = vpop.permute.xlu2 %894 }
 0x48e   :  { %v770_v26 = vpop.permute.xlu1 %769 }
 0x48f   :  { %v780_v16 = vsel %vm3457_vm5, %v687_v1, %v770_v26  ;;  %vm3463_vm5 = vmmov %vm3458_vm3 }
 0x49b   :  { %v778_v27 = vpop.permute.xlu0 %777 }
 0x49c   :  { %v774_v5 = vpop.permute.xlu1 %773 }
 0x49d   :  { %v782_v28 = vsel %vm3430_vm2, %v780_v16, %v774_v5 }
 0x49e   :  { %v784_v36 = vsel %vm3429_vm0, %v782_v28, %v778_v27 }
 0x49f   :  { %2291 = vmatmul.msk.f32.vlgmr.msrb.gmra.mxu3 %vm3458_vm3, %v784_v36 }
 0x4a4   :  { %v891_v29 = vpop.permute.xlu1 %890 }
 0x4a5   :  { %v901_v14 = vsel %vm3459_vm4, %v808_v30, %v891_v29 }
 0x4a6   :  { %v902_v37 = vsel %vm3430_vm2, %v901_v14, %v895_v33 }
 0x4ac   :  { %v899_v35 = vpop.permute.xlu1 %898 }
 0x4ad   :  { %v903_v38 = vsel %vm3429_vm0, %v902_v37, %v899_v35  ;;  %v1129_v37 = vld [vmem:[%s3423_s5 + $0x78] sm:$0xff] }
 0x4ae   :  { %2292 = vmatmul.msk.f32.gmra.mxu3 %vm3460_vm7, %v903_v38  ;;  %1131 = vmatpush.msrb.mxu1 %v1129_v37  ;;  %v1128_v38 = vld [vmem:[%s3423_s5 + $0x70] sm:$0xff] }
 0x4b0   :  { %1132 = vmatpush.msrb.mxu1 %v1128_v38 }
 0x522   :  { %v932_v40 = vpop.f32.mrf.mxu3 }
 0x523   :  { %v933_v4 = vadd.f32 %v932_v40, %v908_v39  ;;  %v996_v40 = vperm.slane %v2639_v54, 2 }
 0x525   :  { %v2894_v18 = vadd.f32 %v933_v4, %v2598_v0  ;;  %v1126_v4 = vld [vmem:[%s3423_s5 + $0x60] sm:$0xff] }
 0x527   :  { %v942_v42 = vsel %vm3461_vm8, %v2894_v18, 0.0 }
 0x528   :  { %943 = vadd.xlane.f32.xlu1 %v942_v42  ;;  %v1125_v42 = vld [vmem:[%s3423_s5 + $0x58] sm:$0xff] }
 0x531   :  { %v935_v32 = vpop.f32.mrf.mxu3 }
 0x532   :  { %v936_v22 = vadd.f32 %v935_v32, %v908_v39  ;;  %v1127_v39 = vld [vmem:[%s3423_s5 + $0x68] sm:$0xff] }
 0x533   :  { %1133 = vmatpush.msrb.mxu1 %v1127_v39 }
 0x534   :  { %v2899_v43 = vadd.f32 %v936_v22, %v2605_v2 }
 0x535   :  { %1134 = vmatpush.msrb.mxu1 %v1126_v4 }
 0x536   :  { %v945_v44 = vsel %vm3462_vm6, %v2899_v43, 0.0  ;;  %vm3464_vm6 = vmmov %vm3458_vm3 }
 0x537   :  { %946 = vadd.xlane.f32.xlu0 %v945_v44  ;;  %1135 = vmatpush.msrb.mxu1 %v1125_v42  ;;  %v1124_v44 = vld [vmem:[%s3423_s5 + $0x50] sm:$0xff] }
 0x539   :  { %1136 = vmatpush.msrb.mxu1 %v1124_v44 }
 0x59b   :  { %v944_v45 = vpop.xlane.xlu1 %943 }
 0x59c   :  { %v948_v48 = vmul.f32 %v944_v45, %v2609_v10  ;;  %v1123_v45 = vld [vmem:[%s3423_s5 + $0x48] sm:$0xff] }
 0x59d   :  { %1137 = vmatpush.msrb.mxu1 %v1123_v45 }
 0x59e   :  { %v950_v57 = vsub.f32 %v2894_v18, %v948_v48 }
 0x5a0   :  { %v952_v0 = vmul.f32 %v950_v57, %v950_v57 }
 0x5a2   :  { %v954_v59 = vsel %vm3463_vm5, %v952_v0, 0.0 }
 0x5a3   :  { %955 = vadd.xlane.f32.xlu2 %v954_v59  ;;  %v1121_v59 = vld [vmem:[%s3423_s5 + $0x38] sm:$0xff] }
 0x5aa   :  { %v947_v51 = vpop.xlane.xlu0 %946 }
 0x5ab   :  { %v949_v34 = vmul.f32 %v947_v51, %v2609_v10 }
 0x5ad   :  { %v951_v53 = vsub.f32 %v2899_v43, %v949_v34 }
 0x5af   :  { %v953_v2 = vmul.f32 %v951_v53, %v951_v53 }
 0x5b1   :  { %v957_v55 = vsel %vm3458_vm3, %v953_v2, 0.0 }
 0x5b2   :  { %958 = vadd.xlane.f32.xlu1 %v957_v55 }
 0x616   :  { %v956_v63 = vpop.xlane.xlu2 %955 }
 0x617   :  { %v960_v3 = vmul.f32 %v956_v63, %v2609_v10 }
 0x619   :  { %v962_v6 = vadd.f32 1e-05, %v960_v3 }
 0x61b   :  { %2449 = vrsqrt.f32 %v962_v6  ;;  %vm970_vm7 = vweird.f32 %v962_v6 }
 0x621   :  { %v2450_v8 = vpop.eup %2449 }
 0x622   :  { %v965_v9 = vmul.f32 %v2450_v8, %v962_v6  ;;  %vm971_vm4 = vweird.f32 %v2450_v8 }
 0x623   :  { %vm972_vm8 = vmor %vm970_vm7, %vm971_vm4 }
 0x624   :  { %v966_v11 = vmul.f32 %v2450_v8, %v965_v9  ;;  %vm3465_vm4 = vmmov %vm3464_vm6 }
 0x625   :  { %v959_v12 = vpop.xlane.xlu1 %958 }
 0x626   :  { %v967_v7 = vmul.f32 0.5, %v966_v11  ;;  %v961_v47 = vmul.f32 %v959_v12, %v2609_v10  ;;  %v1116_v12 = vld [vmem:[%s3423_s5 + $0x10] sm:$0xff] }
 0x628   :  { %v968_v17 = vsub.f32 1.5, %v967_v7  ;;  %v963_v19 = vadd.f32 1e-05, %v961_v47 }
 0x62a   :  { %v969_v49 = vmul.f32 %v2450_v8, %v968_v17  ;;  %2451 = vrsqrt.f32 %v963_v19  ;;  %vm980_vm3 = vweird.f32 %v963_v19  ;;  %v1115_v17 = vld [vmem:[%s3423_s5 + $0x8] sm:$0xff] }
 0x62c   :  { %v973_v58 = vsel %vm972_vm8, %v2450_v8, %v969_v49  ;;  %v1117_v8 = vld [vmem:[%s3423_s5 + $0x18] sm:$0xff]  ;;  %v1114_v49 = vld [vmem:[%s3423_s5] sm:$0xff] }
 0x62d   :  { %v984_v23 = vmul.f32 %v973_v58, %v950_v57  ;;  %v1122_v57 = vld [vmem:[%s3423_s5 + $0x40] sm:$0xff] }
 0x62e   :  { %1138 = vmatpush.msrb.mxu1 %v1122_v57 }
 0x62f   :  { %v987_v26 = vmul.f32 %v986_v20, %v984_v23 }
 0x630   :  { %v2452_v1 = vpop.eup %2451  ;;  %1139 = vmatpush.msrb.mxu1 %v1121_v59 }
 0x631   :  { %v975_v16 = vmul.f32 %v2452_v1, %v963_v19  ;;  %v990_v5 = vadd.f32 %v989_v25, %v987_v26  ;;  %vm981_vm5 = vweird.f32 %v2452_v1 }
 0x632   :  { %vm982_vm0 = vmor %vm980_vm3, %vm981_vm5 }
 0x633   :  { %v976_v27 = vmul.f32 %v2452_v1, %v975_v16  ;;  %2294 = vmatmul.msk.f32.vlgmr.msra.gmra.mxu2 %vm3464_vm6, %v990_v5 }
 0x635   :  { %v977_v28 = vmul.f32 0.5, %v976_v27 }
 0x637   :  { %v978_v36 = vsub.f32 1.5, %v977_v28 }
 0x639   :  { %v979_v29 = vmul.f32 %v2452_v1, %v978_v36 }
 0x63b   :  { %v983_v30 = vsel %vm982_vm0, %v2452_v1, %v979_v29 }
 0x63c   :  { %v985_v14 = vmul.f32 %v983_v30, %v951_v53  ;;  %v1120_v53 = vld [vmem:[%s3423_s5 + $0x30] sm:$0xff] }
 0x63d   :  { %1140 = vmatpush.msrb.mxu1 %v1120_v53 }
 0x63e   :  { %v988_v33 = vmul.f32 %v986_v20, %v985_v14 }
 0x63f   :  { %1141 = vmatpush.msrb.mxu1 %v1119_v13 }
 0x640   :  { %v991_v35 = vadd.f32 %v989_v25, %v988_v33 }
 0x641   :  { %1142 = vmatpush.msrb.mxu1 %v1118_v61 }
 0x642   :  { %2295 = vmatmul.msk.f32.gmra.mxu2 %vm3465_vm4, %v991_v35 }
 0x643   :  { %1143 = vmatpush.msrb.mxu1 %v1117_v8 }
 0x645   :  { %1144 = vmatpush.msrb.mxu1 %v1116_v12 }
 0x647   :  { %1145 = vmatpush.msrb.mxu1 %v1115_v17 }
 0x649   :  { %1146 = vmatpush.msrb.mxu1 %v1114_v49 }
 0x6b6   :  { %v1020_v32 = vpop.f32.mrf.mxu2 }
 0x6b7   :  { %v2944_v22 = vadd.f32 %v1020_v32, %v996_v40 }
 0x6b9   :  { %v2950_v54 = vmul.f32 0.70710677, %v2944_v22 }
 0x6bb   :  { %v1030_v48 = vmul.f32 %v2950_v54, %v2950_v54 }
 0x6bd   :  { %v1031_v0 = vmin.f32 %v1030_v48, 16.0 }
 0x6bf   :  { %v1032_v51 = vmul.f32 2.1237322e-06, %v1031_v0  ;;  %v1043_v34 = vmul.f32 3.8918573e-05, %v1031_v0 }
 0x6c1   :  { %v1033_v2 = vadd.f32 0.00028619796, %v1032_v51  ;;  %v1044_v55 = vadd.f32 0.001143296, %v1043_v34 }
 0x6c3   :  { %v1034_v56 = vmul.f32 %v1033_v2, %v1031_v0  ;;  %v1045_v60 = vmul.f32 %v1044_v55, %v1031_v0 }
 0x6c5   :  { %v1035_v63 = vadd.f32 0.0036580483, %v1034_v56  ;;  %v1046_v3 = vadd.f32 0.014752088, %v1045_v60  ;;  %v1023_v6 = vpop.f32.mrf.mxu2 }
 0x6c6   :  { %v2975_v9 = vadd.f32 %v1023_v6, %v996_v40 }
 0x6c7   :  { %v1047_v11 = vmul.f32 %v1046_v3, %v1031_v0  ;;  %v1036_v47 = vmul.f32 %v1035_v63, %v1031_v0 }
 0x6c8   :  { %v2981_v7 = vmul.f32 0.70710677, %v2975_v9 }
 0x6c9   :  { %v1048_v15 = vadd.f32 0.112945676, %v1047_v11  ;;  %v1037_v23 = vadd.f32 0.05243302, %v1036_v47  ;;  %v1026_v11 = vmul.f32 0.5, %v2944_v22 }
 0x6ca   :  { %v1070_v19 = vmul.f32 %v2981_v7, %v2981_v7 }
 0x6cb   :  { %v1049_v20 = vmul.f32 %v1048_v15, %v1031_v0  ;;  %v1038_v28 = vmul.f32 %v1037_v23, %v1031_v0 }
 0x6cc   :  { %v1071_v58 = vmin.f32 %v1070_v19, 16.0 }
 0x6cd   :  { %v1050_v25 = vadd.f32 0.4994258, %v1049_v20  ;;  %v1039_v33 = vadd.f32 0.18741608, %v1038_v28 }
 0x6ce   :  { %v1072_v26 = vmul.f32 2.1237322e-06, %v1071_v58  ;;  %v1083_v1 = vmul.f32 3.8918573e-05, %v1071_v58 }
 0x6cf   :  { %v1051_v16 = vmul.f32 %v1050_v25, %v1031_v0  ;;  %v1040_v40 = vmul.f32 %v1039_v33, %v1031_v0 }
 0x6d0   :  { %v1073_v5 = vadd.f32 0.00028619796, %v1072_v26  ;;  %v1084_v27 = vadd.f32 0.001143296, %v1083_v1 }
 0x6d1   :  { %v1052_v36 = vadd.f32 1.0, %v1051_v16  ;;  %v1041_v48 = vadd.f32 1.1283791, %v1040_v40 }
 0x6d2   :  { %v1074_v29 = vmul.f32 %v1073_v5, %v1071_v58  ;;  %v1085_v30 = vmul.f32 %v1084_v27, %v1071_v58  ;;  %v1027_v27 = vmul.f32 0.5, %v2975_v9 }
 0x6d3   :  { %2453 = vrcp.f32 %v1052_v36  ;;  %v1064_v57 = vand.u32 2147483648, %v1052_v36  ;;  %v1062_v34 = vand.u32 2147483647, %v1052_v36  ;;  %vm1058_vm7 = vweird.f32 %v1052_v36 }
 0x6d4   :  { %v1086_v14 = vadd.f32 0.014752088, %v1085_v30  ;;  %v1075_v35 = vadd.f32 0.0036580483, %v1074_v29  ;;  %v1042_v0 = vmul.f32 %v1041_v48, %v2950_v54  ;;  %v2505_v29 = vld [vmem:[%s3424_s6] sm:$0xf] }
 0x6d5   :  { %v1065_v13 = vor.u32 1.1754944e-38, %v1064_v57  ;;  %vm1063_vm6 = vcmp.eq.f32.partialorder %v1062_v34, 8.507059e+37  ;;  %v1130_v30 = vperm.slane %v2505_v29, 3  ;;  %v2301_v34 = vld [vmem:[%s3420_s2 + $0x28] sm:$0xff] }
 0x6d6   :  { %v1087_v37 = vmul.f32 %v1086_v14, %v1071_v58  ;;  %v1076_v4 = vmul.f32 %v1075_v35, %v1071_v58 }
 0x6d8   :  { %v1088_v38 = vadd.f32 0.112945676, %v1087_v37  ;;  %v1077_v59 = vadd.f32 0.05243302, %v1076_v4 }
 0x6d9   :  { %v2454_v39 = vpop.eup %2453 }
 0x6da   :  { %v1054_v42 = vmul.f32 %v2454_v39, %v1052_v36  ;;  %v1089_v32 = vmul.f32 %v1088_v38, %v1071_v58  ;;  %vm1059_vm0 = vweird.f32 %v2454_v39  ;;  %v1078_v56 = vmul.f32 %v1077_v59, %v1071_v58  ;;  %v2303_v59 = vld [vmem:[%s3420_s2 + $0x38] sm:$0xff] }
 0x6db   :  { %vm1060_vm8 = vmor %vm1058_vm7, %vm1059_vm0  ;;  %vm3466_vm7 = vcmask 261120   ;;  %1234 = vmatpush.msrb.mxu2 %v2303_v59 }
 0x6dc   :  { %v1055_v44 = vsub.f32 1.0, %v1054_v42  ;;  %v1090_v45 = vadd.f32 0.4994258, %v1089_v32  ;;  %v1079_v3 = vadd.f32 0.18741608, %v1078_v56 }
 0x6de   :  { %v1056_v51 = vmul.f32 %v2454_v39, %v1055_v44  ;;  %v1091_v53 = vmul.f32 %v1090_v45, %v1071_v58  ;;  %v1080_v47 = vmul.f32 %v1079_v3, %v1071_v58 }
 0x6e0   :  { %v1057_v2 = vadd.f32 %v2454_v39, %v1056_v51  ;;  %v1092_v55 = vadd.f32 1.0, %v1091_v53  ;;  %v1081_v20 = vadd.f32 1.1283791, %v1080_v47  ;;  %v2302_v51 = vld [vmem:[%s3420_s2 + $0x30] sm:$0xff]  ;;  %v2300_v53 = vld [vmem:[%s3420_s2 + $0x20] sm:$0xff] }
 0x6e1   :  { %1235 = vmatpush.msrb.mxu2 %v2302_v51 }
 0x6e2   :  { %v1061_v60 = vsel %vm1060_vm8, %v2454_v39, %v1057_v2  ;;  %2455 = vrcp.f32 %v1092_v55  ;;  %v1104_v49 = vand.u32 2147483648, %v1092_v55  ;;  %v1102_v54 = vand.u32 2147483647, %v1092_v55  ;;  %vm3467_vm8 = vmmov %vm3466_vm7 }
 0x6e3   :  { %v1066_v61 = vsel %vm1063_vm6, %v1065_v13, %v1061_v60  ;;  %vm1098_vm3 = vweird.f32 %v1092_v55  ;;  %v1082_v1 = vmul.f32 %v1081_v20, %v2981_v7  ;;  %vm3468_vm6 = vmmov %vm3466_vm7  ;;  %1236 = vmatpush.msrb.mxu2 %v2301_v34 }
 0x6e4   :  { %v1067_v63 = vmul.f32 %v1066_v61, %v1042_v0  ;;  %v1105_v26 = vor.u32 1.1754944e-38, %v1104_v49  ;;  %vm1103_vm0 = vcmp.eq.f32.partialorder %v1102_v54, 8.507059e+37 }
 0x6e5   :  { %1237 = vmatpush.msrb.mxu2 %v2300_v53 }
 0x6e6   :  { %v2296_v6 = vclamps-f32 %v1067_v63, 1.0 }
 0x6e8   :  { %v2456_v8 = vpop.eup %2455  ;;  %v1110_v12 = vadd.f32 1.0, %v2296_v6  ;;  %v2299_v6 = vld [vmem:[%s3419_s1 + $0x4] sm:$0x3] }
 0x6e9   :  { %v1094_v15 = vmul.f32 %v2456_v8, %v1092_v55  ;;  %vm1099_vm5 = vweird.f32 %v2456_v8  ;;  %v1204_v47 = vperm.slane %v2299_v6, 0 }
 0x6ea   :  { %v1112_v17 = vmul.f32 %v1110_v12, %v1026_v11  ;;  %vm1100_vm4 = vmor %vm1098_vm3, %vm1099_vm5 }
 0x6eb   :  { %v1095_v19 = vsub.f32 1.0, %v1094_v15  ;;  %vm3469_vm5 = vmmov %vm3468_vm6 }
 0x6ec   :  { %1147 = vmatmul.f32.vlgmr.msrb.gmra.mxu1 %v1112_v17 }
 0x6ed   :  { %v1096_v23 = vmul.f32 %v2456_v8, %v1095_v19  ;;  %v1207_v19 = vperm.slane %v2299_v6, 1 }
 0x6ef   :  { %v1097_v25 = vadd.f32 %v2456_v8, %v1096_v23 }
 0x6f1   :  { %v1101_v16 = vsel %vm1100_vm4, %v2456_v8, %v1097_v25 }
 0x6f2   :  { %v1106_v22 = vsel %vm1103_vm0, %v1105_v26, %v1101_v16 }
 0x6f3   :  { %v1107_v5 = vmul.f32 %v1106_v22, %v1082_v1 }
 0x6f5   :  { %v2297_v58 = vclamps-f32 %v1107_v5, 1.0 }
 0x6f7   :  { %v1111_v28 = vadd.f32 1.0, %v2297_v58 }
 0x6f9   :  { %v1113_v36 = vmul.f32 %v1111_v28, %v1027_v27  ;;  %v3036_v28 = vld [vmem:[%s3424_s6 + $0x4] sm:$0xf] }
 0x6fb   :  { %1150 = vmatmul.f32.gmra.mxu1 %v1113_v36  ;;  %v1215_v36 = vperm.slane %v3036_v28, 0 }
 0x769   :  { %v1148_v14 = vpop.f32.mrf.mxu1 }
 0x76a   :  { %v1149_v33 = vadd.f32 %v1148_v14, %v1130_v30 }
 0x76c   :  { %v2999_v35 = vadd.f32 %v1149_v33, %v2894_v18 }
 0x76e   :  { %v1160_v7 = vsel %vm3466_vm7, %v2999_v35, 0.0  ;;  %vm3470_vm7 = vmmov %vm3469_vm5 }
 0x76f   :  { %1161 = vadd.xlane.f32.xlu0 %v1160_v7 }
 0x778   :  { %v1151_v37 = vpop.f32.mrf.mxu1 }
 0x779   :  { %v1152_v38 = vadd.f32 %v1151_v37, %v1130_v30 }
 0x77b   :  { %v3004_v9 = vadd.f32 %v1152_v38, %v2899_v43 }
 0x77d   :  { %v1163_v39 = vsel %vm3467_vm8, %v3004_v9, 0.0 }
 0x77e   :  { %1164 = vadd.xlane.f32.xlu1 %v1163_v39 }
 0x7e2   :  { %v1162_v40 = vpop.xlane.xlu0 %1161 }
 0x7e3   :  { %v1166_v4 = vmul.f32 %v1162_v40, %v2609_v10 }
 0x7e5   :  { %v1168_v42 = vsub.f32 %v2999_v35, %v1166_v4 }
 0x7e7   :  { %v1170_v18 = vmul.f32 %v1168_v42, %v1168_v42 }
 0x7e9   :  { %v1172_v32 = vsel %vm3468_vm6, %v1170_v18, 0.0 }
 0x7ea   :  { %1173 = vadd.xlane.f32.xlu0 %v1172_v32 }
 0x7f1   :  { %v1165_v44 = vpop.xlane.xlu1 %1164 }
 0x7f2   :  { %v1167_v45 = vmul.f32 %v1165_v44, %v2609_v10 }
 0x7f4   :  { %v1169_v48 = vsub.f32 %v3004_v9, %v1167_v45 }
 0x7f6   :  { %v1171_v43 = vmul.f32 %v1169_v48, %v1169_v48 }
 0x7f8   :  { %v1175_v57 = vsel %vm3469_vm5, %v1171_v43, 0.0 }
 0x7f9   :  { %1176 = vadd.xlane.f32.xlu2 %v1175_v57 }
 0x85d   :  { %v1174_v2 = vpop.xlane.xlu0 %1173 }
 0x85e   :  { %v1178_v55 = vmul.f32 %v1174_v2, %v2609_v10 }
 0x860   :  { %v1180_v13 = vadd.f32 1e-05, %v1178_v55 }
 0x862   :  { %2457 = vrsqrt.f32 %v1180_v13  ;;  %vm1188_vm4 = vweird.f32 %v1180_v13 }
 0x868   :  { %v2458_v56 = vpop.eup %2457 }
 0x869   :  { %v1183_v0 = vmul.f32 %v2458_v56, %v1180_v13  ;;  %vm1189_vm3 = vweird.f32 %v2458_v56 }
 0x86a   :  { %vm1190_vm0 = vmor %vm1188_vm4, %vm1189_vm3  ;;  %vm3472_vm4 = vcmask 64512  }
 0x86b   :  { %v1184_v60 = vmul.f32 %v2458_v56, %v1183_v0  ;;  %vm3471_vm3 = vmmov %vm3470_vm7 }
 0x86c   :  { %v1177_v61 = vpop.xlane.xlu2 %1176 }
 0x86d   :  { %v1185_v63 = vmul.f32 0.5, %v1184_v60  ;;  %v1179_v3 = vmul.f32 %v1177_v61, %v2609_v10 }
 0x86f   :  { %v1186_v8 = vsub.f32 1.5, %v1185_v63  ;;  %v1181_v11 = vadd.f32 1e-05, %v1179_v3 }
 0x871   :  { %v1187_v12 = vmul.f32 %v2458_v56, %v1186_v8  ;;  %2459 = vrsqrt.f32 %v1181_v11  ;;  %vm1198_vm6 = vweird.f32 %v1181_v11 }
 0x873   :  { %v1191_v15 = vsel %vm1190_vm0, %v2458_v56, %v1187_v12  ;;  %vm3473_vm0 = vmmov %vm3472_vm4 }
 0x874   :  { %v1202_v17 = vmul.f32 %v1191_v15, %v1168_v42  ;;  %vm3479_vm2 = vmmov %vm3473_vm0 }
 0x876   :  { %v1205_v49 = vmul.f32 %v1204_v47, %v1202_v17 }
 0x877   :  { %v2460_v20 = vpop.eup %2459 }
 0x878   :  { %v1193_v23 = vmul.f32 %v2460_v20, %v1181_v11  ;;  %v1208_v54 = vadd.f32 %v1207_v19, %v1205_v49  ;;  %vm1199_vm8 = vweird.f32 %v2460_v20 }
 0x879   :  { %vm1200_vm5 = vmor %vm1198_vm6, %vm1199_vm8 }
 0x87a   :  { %v1194_v25 = vmul.f32 %v2460_v20, %v1193_v23  ;;  %2304 = vmatmul.msk.f32.vlgmr.msrb.gmra.mxu2 %vm3470_vm7, %v1208_v54  ;;  %vm3474_vm7 = vmmov %vm3473_vm0 }
 0x87b   :  { %vm3475_vm8 = vmmov %vm3473_vm0 }
 0x87c   :  { %v1195_v26 = vmul.f32 0.5, %v1194_v25  ;;  %vm3476_vm6 = vmmov %vm3473_vm0 }
 0x87e   :  { %v1196_v1 = vsub.f32 1.5, %v1195_v26 }
 0x880   :  { %v1197_v16 = vmul.f32 %v2460_v20, %v1196_v1 }
 0x882   :  { %v1201_v22 = vsel %vm1200_vm5, %v2460_v20, %v1197_v16  ;;  %vm3477_vm5 = vmmov %vm3473_vm0 }
 0x883   :  { %v1203_v5 = vmul.f32 %v1201_v22, %v1169_v48 }
 0x885   :  { %v1206_v58 = vmul.f32 %v1204_v47, %v1203_v5 }
 0x887   :  { %v1209_v27 = vadd.f32 %v1207_v19, %v1206_v58 }
 0x889   :  { %2305 = vmatmul.msk.f32.gmra.mxu2 %vm3471_vm3, %v1209_v27  ;;  %vm3478_vm3 = vmmov %vm3473_vm0 }
 0x8fd   :  { %v1239_v29 = vpop.f32.mrf.mxu2 }
 0x8fe   :  { %v3039_v30 = vadd.f32 %v1239_v29, %v1215_v36 }
 0x900   :  { %1302 = vrot.lane.b32.xlu0 %v3039_v30, %s2538_s24  ;;  %1246 = vrot.lane.b32.xlu1 %v3039_v30, %s2537_s23 }
 0x901   :  { %1300 = vrot.lane.b32.xlu2 %v3039_v30, %s2540_s26 }
 0x908   :  { %1274 = vrot.lane.b32.xlu0 %v3039_v30, %s2535_s21  ;;  %1330 = vrot.lane.b32.xlu1 %v3039_v30, %s2539_s25 }
 0x90c   :  { %v1242_v14 = vpop.f32.mrf.mxu2 }
 0x90d   :  { %v3051_v33 = vadd.f32 %v1242_v14, %v1215_v36 }
 0x90f   :  { %1385 = vrot.lane.b32.xlu2 %v3051_v33, %s2535_s21 }
 0x910   :  { %1272 = vrot.lane.b32.xlu0 %v3039_v30, %s2534_s20  ;;  %1328 = vrot.lane.b32.xlu1 %v3039_v30, %s2536_s22 }
 0x917   :  { %1383 = vrot.lane.b32.xlu2 %v3051_v33, %s2534_s20 }
 0x918   :  { %1413 = vrot.lane.b32.xlu1 %v3051_v33, %s2538_s24  ;;  %1357 = vrot.lane.b32.xlu0 %v3051_v33, %s2537_s23 }
 0x91f   :  { %1411 = vrot.lane.b32.xlu2 %v3051_v33, %s2540_s26 }
 0x920   :  { %1439 = vrot.lane.b32.xlu1 %v3051_v33, %s2536_s22  ;;  %1441 = vrot.lane.b32.xlu0 %v3051_v33, %s2539_s25 }
 0x95b   :  { %v1301_v7 = vpop.permute.xlu2 %1300 }
 0x969   :  { %v1386_v39 = vpop.permute.xlu2 %1385 }
 0x971   :  { %v1384_v42 = vpop.permute.xlu2 %1383 }
 0x972   :  { %v1303_v37 = vpop.permute.xlu0 %1302  ;;  %v1247_v38 = vpop.permute.xlu1 %1246 }
 0x973   :  { %2306 = vmatpush.xpose.msk.msra.mxu3 %vm3472_vm4, %v1247_v38  ;;  %2310 = vmatpush.xpose.msk.msra.mxu2 %vm3473_vm0, %v1303_v37  ;;  %vm3480_vm4 = vmmov %vm3473_vm0 }
 0x976   :  { %2307 = vmatmul.msk.f32.vlgmr.msra.gmra.mxu3 %vm3475_vm8, %v3039_v30  ;;  %2311 = vmatmul.msk.f32.vlgmr.msra.gmra.mxu2 %vm3476_vm6, %v1301_v7  ;;  %vm3482_vm8 = vmmov %vm3473_vm0 }
 0x977   :  { %2316 = vmatpush.xpose.msk.msrb.mxu2 %vm3474_vm7, %v1386_v39  ;;  %vm3481_vm7 = vmmov %vm3473_vm0 }
 0x978   :  { %vm3483_vm6 = vmmov %vm3473_vm0 }
 0x979   :  { %v1412_v48 = vpop.permute.xlu2 %1411 }
 0x97a   :  { %v1275_v40 = vpop.permute.xlu0 %1274  ;;  %v1331_v4 = vpop.permute.xlu1 %1330 }
 0x97b   :  { %2308 = vmatpush.xpose.msk.msrb.mxu0 %vm3477_vm5, %v1275_v40  ;;  %2312 = vmatpush.xpose.msk.msrb.mxu3 %vm3478_vm3, %v1331_v4  ;;  %vm3484_vm5 = vmmov %vm3473_vm0 }
 0x97c   :  { %vm3486_vm3 = vmmov %vm3473_vm0 }
 0x97e   :  { %2317 = vmatmul.msk.f32.vlgmr.msrb.gmra.mxu2 %vm3479_vm2, %v1384_v42  ;;  %vm3485_vm2 = vmmov %vm3473_vm0 }
 0x982   :  { %v1273_v18 = vpop.permute.xlu0 %1272  ;;  %v1329_v32 = vpop.permute.xlu1 %1328 }
 0x983   :  { %2309 = vmatmul.msk.f32.vlgmr.msrb.gmra.mxu0 %vm3480_vm4, %v1273_v18  ;;  %2313 = vmatmul.msk.f32.vlgmr.msrb.gmra.mxu3 %vm3473_vm0, %v1329_v32  ;;  %vm3487_vm4 = vmmov %vm3473_vm0 }
 0x98a   :  { %v1358_v44 = vpop.permute.xlu0 %1357  ;;  %v1414_v45 = vpop.permute.xlu1 %1413 }
 0x98b   :  { %2314 = vmatpush.xpose.msk.msra.mxu0 %vm3481_vm7, %v1358_v44  ;;  %2318 = vmatpush.xpose.msk.msra.mxu3 %vm3482_vm8, %v1414_v45  ;;  %vm3489_vm7 = vmmov %vm3473_vm0  ;;  %v2396_v45 = vpack.i.bf16 %v3051_v33, %v3039_v30 }
 0x98c   :  { %vm3497_vm8 = vmmov %vm3473_vm0 }
 0x98e   :  { %2315 = vmatmul.msk.f32.vlgmr.msra.gmra.mxu0 %vm3483_vm6, %v3051_v33  ;;  %2319 = vmatmul.msk.f32.vlgmr.msra.gmra.mxu3 %vm3484_vm5, %v1412_v48  ;;  %vm3498_vm6 = vmmov %vm3473_vm0 }
 0x98f   :  { %vm3499_vm5 = vmmov %vm3473_vm0 }
 0x992   :  { %v1442_v43 = vpop.permute.xlu0 %1441  ;;  %v1440_v57 = vpop.permute.xlu1 %1439 }
 0x993   :  { %2320 = vmatpush.xpose.msk.msrb.mxu0 %vm3485_vm2, %v1442_v43  ;;  %vm3500_vm2 = vmmov %vm3473_vm0 }
 0x996   :  { %2321 = vmatmul.msk.f32.vlgmr.msrb.gmra.mxu0 %vm3486_vm3, %v1440_v57  ;;  %vm3501_vm3 = vmmov %vm3473_vm0 }
 0x9f9   :  { %v1325_v59 = vpop.f32.mrf.mxu2  ;;  %v1269_v53 = vpop.f32.mrf.mxu3 }
 0x9fa   :  { %v1469_v51 = vsel %vm2706_vm11, %v1325_v59, -1e+30  ;;  %vm3488_vm11 = vmmov %vm3473_vm0  ;;  %v3103_v21 = vsel %vm2730_vm15, %v1269_v53, -1e+30 }
 0x9fb   :  { %v1481_v34 = vsel %vm3487_vm4, %v1469_v51, -inf  ;;  %vm3493_vm15 = vmmov %vm3473_vm0 }
 0x9fc   :  { %1482 = vmax.xlane.f32.xlu0 %v1481_v34 }
 0xa00   :  { %v1297_v2 = vpop.f32.mrf.mxu0 }
 0xa01   :  { %v1468_v55 = vsel %vm2692_vm9, %v1297_v2, -1e+30  ;;  %v1408_v56 = vpop.f32.mrf.mxu2  ;;  %vm3490_vm9 = vmmov %vm3473_vm0 }
 0xa02   :  { %v1478_v13 = vsel %vm3473_vm0, %v1468_v55, -inf  ;;  %v1472_v60 = vsel %vm2724_vm14, %v1408_v56, -1e+30  ;;  %v1475_v50 = vsel %vm3490_vm9, %v3103_v21, -inf  ;;  %vm3492_vm14 = vmmov %vm3473_vm0 }
 0xa03   :  { %1479 = vmax.xlane.f32.xlu2 %v1478_v13  ;;  %v1490_v63 = vsel %vm3489_vm7, %v1472_v60, -inf }
 0xa06   :  { %v1353_v0 = vpop.f32.mrf.mxu3 }
 0xa07   :  { %v1470_v31 = vsel %vm2696_vm10, %v1353_v0, -1e+30  ;;  %vm3491_vm10 = vmmov %vm3473_vm0 }
 0xa08   :  { %v1484_v61 = vsel %vm3488_vm11, %v1470_v31, -inf }
 0xa09   :  { %1485 = vmax.xlane.f32.xlu1 %v1484_v61 }
 0xa0b   :  { %v1380_v3 = vpop.f32.mrf.mxu0  ;;  %1491 = vmax.xlane.f32.xlu2 %v1490_v63 }
 0xa0c   :  { %v1471_v52 = vsel %vm2740_vm1, %v1380_v3, -1e+30  ;;  %vm3496_vm1 = vmmov %vm3473_vm0 }
 0xa0d   :  { %v1487_v46 = vsel %vm3493_vm15, %v1471_v52, -inf }
 0xa11   :  { %v1436_v6 = vpop.f32.mrf.mxu3 }
 0xa12   :  { %v1473_v8 = vsel %vm2717_vm13, %v1436_v6, -1e+30  ;;  %vm3495_vm13 = vmmov %vm3473_vm0 }
 0xa13   :  { %1476 = vmax.xlane.f32.xlu2 %v1475_v50  ;;  %v1464_v24 = vpop.f32.mrf.mxu0  ;;  %v1493_v11 = vsel %vm3491_vm10, %v1473_v8, -inf }
 0xa14   :  { %v1474_v12 = vsel %vm2713_vm12, %v1464_v24, -1e+30  ;;  %1494 = vmax.xlane.f32.xlu0 %v1493_v11  ;;  %vm3494_vm12 = vmmov %vm3473_vm0 }
 0xa15   :  { %v1496_v47 = vsel %vm3492_vm14, %v1474_v12, -inf }
 0xa16   :  { %1497 = vmax.xlane.f32.xlu1 %v1496_v47 }
 0xa1c   :  { %1488 = vmax.xlane.f32.xlu0 %v1487_v46 }
 0xa6f   :  { %v1483_v15 = vpop.xlane.xlu0 %1482 }
 0xa70   :  { %v1501_v17 = vsub.f32 %v1469_v51, %v1483_v15 }
 0xa72   :  { %v1511_v19 = vmul.f32 1.442695, %v1501_v17 }
 0xa74   :  { %2461 = vpow2.f32 %v1511_v19 }
 0xa76   :  { %v1480_v49 = vpop.xlane.xlu2 %1479 }
 0xa77   :  { %v1500_v20 = vsub.f32 %v1468_v55, %v1480_v49 }
 0xa79   :  { %v1509_v23 = vmul.f32 1.442695, %v1500_v20 }
 0xa7a   :  { %v3116_v54 = vpop.eup %2461 }
 0xa7b   :  { %2463 = vpow2.f32 %v1509_v23  ;;  %v1529_v41 = vsel %vm3494_vm12, %v3116_v54, 0.0 }
 0xa7c   :  { %1530 = vadd.xlane.f32.xlu2 %v1529_v41  ;;  %v1486_v25 = vpop.xlane.xlu1 %1485 }
 0xa7d   :  { %v1502_v62 = vsub.f32 %v1470_v31, %v1486_v25 }
 0xa7e   :  { %v1492_v26 = vpop.xlane.xlu2 %1491 }
 0xa7f   :  { %v1513_v1 = vmul.f32 1.442695, %v1502_v62  ;;  %v1504_v16 = vsub.f32 %v1472_v60, %v1492_v26 }
 0xa81   :  { %v3120_v22 = vpop.eup %2463  ;;  %2465 = vpow2.f32 %v1513_v1  ;;  %v1517_v5 = vmul.f32 1.442695, %v1504_v16 }
 0xa82   :  { %v1526_v58 = vsel %vm3495_vm13, %v3120_v22, 0.0 }
 0xa83   :  { %2467 = vpow2.f32 %v1517_v5  ;;  %1527 = vadd.xlane.f32.xlu1 %v1526_v58 }
 0xa86   :  { %v1477_v48 = vpop.xlane.xlu2 %1476 }
 0xa87   :  { %v3124_v27 = vpop.eup %2465  ;;  %v1495_v36 = vpop.xlane.xlu0 %1494  ;;  %v1499_v43 = vsub.f32 %v3103_v21, %v1477_v48 }
 0xa88   :  { %v1505_v29 = vsub.f32 %v1473_v8, %v1495_v36  ;;  %v1532_v14 = vsel %vm3496_vm1, %v3124_v27, 0.0 }
 0xa89   :  { %v3128_v7 = vpop.eup %2467  ;;  %1533 = vadd.xlane.f32.xlu0 %v1532_v14  ;;  %v1498_v37 = vpop.xlane.xlu1 %1497  ;;  %v1507_v59 = vmul.f32 1.442695, %v1499_v43 }
 0xa8a   :  { %v1519_v38 = vmul.f32 1.442695, %v1505_v29  ;;  %v1506_v39 = vsub.f32 %v1474_v12, %v1498_v37  ;;  %v1538_v40 = vsel %vm3497_vm8, %v3128_v7, 0.0 }
 0xa8b   :  { %1539 = vadd.xlane.f32.xlu1 %v1538_v40 }
 0xa8c   :  { %2469 = vpow2.f32 %v1519_v38  ;;  %v1521_v4 = vmul.f32 1.442695, %v1506_v39 }
 0xa8e   :  { %2471 = vpow2.f32 %v1521_v4 }
 0xa8f   :  { %v1489_v57 = vpop.xlane.xlu0 %1488  ;;  %2473 = vpow2.f32 %v1507_v59 }
 0xa90   :  { %v1503_v51 = vsub.f32 %v1471_v52, %v1489_v57 }
 0xa92   :  { %v3132_v42 = vpop.eup %2469  ;;  %v1515_v34 = vmul.f32 1.442695, %v1503_v51 }
 0xa93   :  { %v1541_v18 = vsel %vm3498_vm6, %v3132_v42, 0.0 }
 0xa94   :  { %v3136_v32 = vpop.eup %2471  ;;  %1542 = vadd.xlane.f32.xlu2 %v1541_v18  ;;  %2475 = vpow2.f32 %v1515_v34 }
 0xa95   :  { %v1544_v44 = vsel %vm3499_vm5, %v3136_v32, 0.0  ;;  %v3150_v53 = vpop.eup %2473 }
 0xa96   :  { %1545 = vadd.xlane.f32.xlu0 %v1544_v44  ;;  %v1523_v2 = vsel %vm3500_vm2, %v3150_v53, 0.0 }
 0xa9a   :  { %v3154_v55 = vpop.eup %2475 }
 0xaa4   :  { %2397 = vrot.lane.b32.xlu1 %v2396_v45, %s2543_s29 }
 0xaaa   :  { %2407 = vrot.lane.b32.xlu0 %v2396_v45, %s2541_s27 }
 0xaac   :  { %2402 = vrot.lane.b32.xlu2 %v2396_v45, %s2542_s28 }
 0xab4   :  { %1667 = vrot.lane.b32.xlu2 %v3039_v30, %s2544_s30  ;;  %v1535_v30 = vsel %vm3501_vm3, %v3154_v55, 0.0 }
 0xabc   :  { %1786 = vrot.lane.b32.xlu2 %v3051_v33, %s2544_s30 }
 0xace   :  { %1524 = vadd.xlane.f32.xlu1 %v1523_v2 }
 0xad4   :  { %1536 = vadd.xlane.f32.xlu0 %v1535_v30 }
 0xaef   :  { %v1531_v13 = vpop.xlane.xlu2 %1530 }
 0xaf0   :  { %2477 = vrcp.f32 %v1531_v13  ;;  %v1586_v12 = vand.u32 2147483648, %v1531_v13  ;;  %vm1580_vm0 = vweird.f32 %v1531_v13  ;;  %v1584_v52 = vand.u32 2147483647, %v1531_v13 }
 0xaf2   :  { %v1587_v20 = vor.u32 1.1754944e-38, %v1586_v12  ;;  %vm1585_vm7 = vcmp.eq.f32.partialorder %v1584_v52, 8.507059e+37 }
 0xaf6   :  { %v1528_v33 = vpop.xlane.xlu1 %1527  ;;  %v2478_v56 = vpop.eup %2477 }
 0xaf7   :  { %2479 = vrcp.f32 %v1528_v33  ;;  %v1576_v0 = vmul.f32 %v2478_v56, %v1531_v13  ;;  %vm1581_vm4 = vweird.f32 %v2478_v56  ;;  %v1570_v49 = vand.u32 2147483647, %v1528_v33 }
 0xaf8   :  { %vm1582_vm11 = vmor %vm1580_vm0, %vm1581_vm4  ;;  %v1572_v23 = vand.u32 2147483648, %v1528_v33  ;;  %vm1566_vm10 = vweird.f32 %v1528_v33 }
 0xaf9   :  { %v1577_v63 = vsub.f32 1.0, %v1576_v0  ;;  %vm3184_vm14 = vcmp.eq.f32.partialorder %v1570_v49, 8.507059e+37 }
 0xafa   :  { %v1573_v29 = vor.u32 1.1754944e-38, %v1572_v23 }
 0xafb   :  { %v1578_v21 = vmul.f32 %v2478_v56, %v1577_v63  ;;  %v2331_v63 = vld [vmem:[%s3421_s3 + $0x28] sm:$0xff] }
 0xafc   :  { %v3158_v60 = vpop.xlane.xlu0 %1533 }
 0xafd   :  { %v3162_v61 = vpop.eup %2479  ;;  %2481 = vrcp.f32 %v3158_v60  ;;  %v1579_v24 = vadd.f32 %v2478_v56, %v1578_v21  ;;  %vm1594_vm12 = vweird.f32 %v3158_v60  ;;  %v1598_v45 = vand.u32 2147483647, %v3158_v60 }
 0xafe   :  { %v3160_v31 = vpop.xlane.xlu1 %1539  ;;  %v1562_v3 = vmul.f32 %v3162_v61, %v1528_v33  ;;  %vm1567_vm9 = vweird.f32 %v3162_v61  ;;  %v1600_v57 = vand.u32 2147483648, %v3158_v60 }
 0xaff   :  { %2483 = vrcp.f32 %v3160_v31  ;;  %v1583_v19 = vsel %vm1582_vm11, %v2478_v56, %v1579_v24  ;;  %vm3192_vm15 = vmor %vm1566_vm10, %vm1567_vm9  ;;  %vm1622_vm6 = vweird.f32 %v3160_v31  ;;  %v1626_v30 = vand.u32 2147483647, %v3160_v31 }
 0xb00   :  { %v1563_v8 = vsub.f32 1.0, %v1562_v3  ;;  %v1588_v62 = vsel %vm1585_vm7, %v1587_v20, %v1583_v19  ;;  %v1628_v56 = vand.u32 2147483648, %v3160_v31  ;;  %vm1599_vm7 = vcmp.eq.f32.partialorder %v1598_v45, 8.507059e+37  ;;  %vm3508_vm9 = vmmov %vm3496_vm1 }
 0xb01   :  { %v1661_v18 = vmul.f32 %v3116_v54, %v1588_v62  ;;  %vm3509_vm10 = vmmov %vm3496_vm1 }
 0xb02   :  { %v1564_v15 = vmul.f32 %v3162_v61, %v1563_v8  ;;  %v1629_v19 = vor.u32 1.1754944e-38, %v1628_v56 }
 0xb03   :  { %v3167_v6 = vpop.eup %2481 }
 0xb04   :  { %v1590_v47 = vmul.f32 %v3167_v6, %v3158_v60  ;;  %v1565_v26 = vadd.f32 %v3162_v61, %v1564_v15  ;;  %vm1595_vm8 = vweird.f32 %v3167_v6  ;;  %v1601_v60 = vor.u32 1.1754944e-38, %v1600_v57 }
 0xb05   :  { %v3169_v50 = vpop.eup %2483  ;;  %vm3222_vm4 = vmor %vm1594_vm12, %vm1595_vm8 }
 0xb06   :  { %v1618_v17 = vmul.f32 %v3169_v50, %v3160_v31  ;;  %v1591_v41 = vsub.f32 1.0, %v1590_v47  ;;  %v1569_v44 = vsel %vm3192_vm15, %v3162_v61, %v1565_v26  ;;  %vm1623_vm2 = vweird.f32 %v3169_v50 }
 0xb07   :  { %v3171_v11 = vpop.xlane.xlu2 %1542  ;;  %v1574_v2 = vsel %vm3184_vm14, %v1573_v29, %v1569_v44  ;;  %vm1624_vm11 = vmor %vm1622_vm6, %vm1623_vm2  ;;  %vm1627_vm14 = vcmp.eq.f32.partialorder %v1626_v30, 8.507059e+37 }
 0xb08   :  { %2485 = vrcp.f32 %v3171_v11  ;;  %v1619_v1 = vsub.f32 1.0, %v1618_v17  ;;  %v1592_v14 = vmul.f32 %v3167_v6, %v1591_v41  ;;  %v1642_v43 = vand.u32 2147483648, %v3171_v11  ;;  %vm3510_vm6 = vmmov %vm3496_vm1 }
 0xb09   :  { %v3176_v46 = vpop.xlane.xlu0 %1545  ;;  %v1640_v51 = vand.u32 2147483647, %v3171_v11  ;;  %vm1636_vm5 = vweird.f32 %v3171_v11  ;;  %v1660_v52 = vmul.f32 %v3120_v22, %v1574_v2 }
 0xb0a   :  { %2487 = vrcp.f32 %v3176_v46  ;;  %v1620_v48 = vmul.f32 %v3169_v50, %v1619_v1  ;;  %v1593_v54 = vadd.f32 %v3167_v6, %v1592_v14  ;;  %v1643_v0 = vor.u32 1.1754944e-38, %v1642_v43 }
 0xb0b   :  { %vm1641_vm0 = vcmp.eq.f32.partialorder %v1640_v51, 8.507059e+37  ;;  %v1656_v20 = vand.u32 2147483648, %v3176_v46  ;;  %vm1650_vm12 = vweird.f32 %v3176_v46 }
 0xb0c   :  { %v1621_v33 = vadd.f32 %v3169_v50, %v1620_v48 }
 0xb0d   :  { %v1657_v1 = vor.u32 1.1754944e-38, %v1656_v20 }
 0xb0e   :  { %v2486_v25 = vpop.eup %2485  ;;  %v1625_v17 = vsel %vm1624_vm11, %v3169_v50, %v1621_v33  ;;  %v1654_v50 = vand.u32 2147483647, %v3176_v46 }
 0xb0f   :  { %v1632_v5 = vmul.f32 %v2486_v25, %v3171_v11  ;;  %v2403_v58 = vpop.permute.xlu2 %2402  ;;  %vm1637_vm13 = vweird.f32 %v2486_v25  ;;  %v1597_v11 = vsel %vm3222_vm4, %v3167_v6, %v1593_v54  ;;  %v1630_v49 = vsel %vm1627_vm14, %v1629_v19, %v1625_v17 }
 0xb10   :  { %v3189_v36 = vpop.eup %2487  ;;  %v2405_v37 = vunpack.i.h.bf16 %v2403_v58  ;;  %v2404_v38 = vunpack.i.l.bf16 %v2403_v58  ;;  %vm1638_vm3 = vmor %vm1636_vm5, %vm1637_vm13  ;;  %v1602_v6 = vsel %vm1599_vm7, %v1601_v60, %v1597_v11  ;;  %v1664_v26 = vmul.f32 %v3128_v7, %v1630_v49 }
 0xb11   :  { %v1633_v40 = vsub.f32 1.0, %v1632_v5  ;;  %v1646_v4 = vmul.f32 %v3189_v36, %v3176_v46  ;;  %vm1651_vm15 = vweird.f32 %v3189_v36  ;;  %v1662_v41 = vmul.f32 %v3124_v27, %v1602_v6  ;;  %vm3511_vm5 = vmmov %vm3496_vm1 }
 0xb12   :  { %1740 = vmatpush.msra.mxu0 %v2404_v38  ;;  %vm1652_vm13 = vmor %vm1650_vm12, %vm1651_vm15  ;;  %vm1655_vm8 = vcmp.eq.f32.partialorder %v1654_v50, 8.507059e+37  ;;  %v1910_v49 = vperm.slane %v3036_v28, 1 }
 0xb13   :  { %v1634_v59 = vmul.f32 %v2486_v25, %v1633_v40  ;;  %2324 = vmatmul.msk.f32.vlgmr.msra.gmra.mxu0 %vm3496_vm1, %v1661_v18  ;;  %v1647_v34 = vsub.f32 1.0, %v1646_v4  ;;  %vm3513_vm15 = vmmov %vm3496_vm1 }
 0xb14   :  { %1859 = vmatpush.msrb.mxu0 %v2405_v37  ;;  %vm3514_vm12 = vmmov %vm3496_vm1 }
 0xb15   :  { %v1635_v13 = vadd.f32 %v2486_v25, %v1634_v59  ;;  %v1648_v47 = vmul.f32 %v3189_v36, %v1647_v34 }
 0xb16   :  { %v2398_v61 = vpop.permute.xlu1 %2397 }
 0xb17   :  { %v1639_v3 = vsel %vm1638_vm3, %v2486_v25, %v1635_v13  ;;  %v2400_v21 = vunpack.i.h.bf16 %v2398_v61  ;;  %v2399_v8 = vunpack.i.l.bf16 %v2398_v61  ;;  %v1668_v24 = vpop.permute.xlu2 %1667  ;;  %v1649_v22 = vadd.f32 %v3189_v36, %v1648_v47  ;;  %v2332_v61 = vld [vmem:[%s3421_s3 + $0x30] sm:$0xff] }
 0xb18   :  { %v1644_v12 = vsel %vm1641_vm0, %v1643_v0, %v1639_v3  ;;  %1688 = vmatpush.msra.mxu2 %v1668_v24  ;;  %v2330_v3 = vld [vmem:[%s3421_s3 + $0x20] sm:$0xff] }
 0xb19   :  { %1714 = vmatpush.msrb.mxu3 %v2399_v8  ;;  %v1665_v15 = vmul.f32 %v3132_v42, %v1644_v12  ;;  %v1653_v62 = vsel %vm1652_vm13, %v3189_v36, %v1649_v22  ;;  %vm3515_vm13 = vcmask 130048  }
 0xb1a   :  { %2323 = vmatmul.msk.f32.vlgmr.msrb.gmra.mxu3 %vm3508_vm9, %v1660_v52  ;;  %v1658_v16 = vsel %vm1655_vm8, %v1657_v1, %v1653_v62  ;;  %vm3512_vm9 = vmmov %vm3496_vm1  ;;  %vm3517_vm8 = vcmask 261120  }
 0xb1b   :  { %1833 = vmatpush.msra.mxu3 %v2400_v21  ;;  %2328 = vmatmul.msk.f32.vlgmr.msrb.gmra.mxu0 %vm3509_vm10, %v1665_v15  ;;  %v1666_v46 = vmul.f32 %v3136_v32, %v1658_v16 }
 0xb1c   :  { %v2408_v31 = vpop.permute.xlu0 %2407 }
 0xb1d   :  { %v2410_v42 = vunpack.i.h.bf16 %v2408_v31  ;;  %v2409_v23 = vunpack.i.l.bf16 %v2408_v31 }
 0xb1f   :  { %v1787_v25 = vpop.permute.xlu2 %1786  ;;  %1766 = vmatpush.msra.mxu1 %v2409_v23 }
 0xb20   :  { %2325 = vmatmul.msk.f32.vlgmr.msra.gmra.mxu1 %vm3496_vm1, %v1662_v41  ;;  %1807 = vmatpush.msrb.mxu2 %v1787_v25  ;;  %vm3516_vm1 = vcmask 195584  }
 0xb21   :  { %1885 = vmatpush.msrb.mxu1 %v2410_v42 }
 0xb22   :  { %2327 = vmatmul.msk.f32.vlgmr.msra.gmra.mxu3 %vm3510_vm6, %v1664_v26  ;;  %vm3518_vm6 = vmmov %vm3511_vm5 }
 0xb28   :  { %2329 = vmatmul.msk.f32.vlgmr.msrb.gmra.mxu1 %vm3511_vm5, %v1666_v46  ;;  %vm3519_vm5 = vmmov %vm3515_vm13 }
 0xb41   :  { %v1525_v27 = vpop.xlane.xlu1 %1524 }
 0xb42   :  { %2489 = vrcp.f32 %v1525_v27  ;;  %v1558_v14 = vand.u32 2147483648, %v1525_v27  ;;  %v1556_v7 = vand.u32 2147483647, %v1525_v27  ;;  %vm1552_vm3 = vweird.f32 %v1525_v27 }
 0xb44   :  { %v1559_v4 = vor.u32 1.1754944e-38, %v1558_v14  ;;  %vm1557_vm0 = vcmp.eq.f32.partialorder %v1556_v7, 8.507059e+37  ;;  %v2340_v14 = vld [vmem:[%s3422_s4 + $0x38] sm:$0xff]  ;;  %v2338_v7 = vld [vmem:[%s3422_s4 + $0x28] sm:$0xff] }
 0xb45   :  { %2018 = vmatpush.msrb.mxu3 %v2340_v14  ;;  %v2347_v14 = vld [vmem:[%s3423_s5 + $0x90] sm:$0xff] }
 0xb47   :  { %v1537_v5 = vpop.xlane.xlu0 %1536 }
 0xb48   :  { %v2490_v58 = vpop.eup %2489  ;;  %2491 = vrcp.f32 %v1537_v5  ;;  %v1614_v45 = vand.u32 2147483648, %v1537_v5  ;;  %v1612_v43 = vand.u32 2147483647, %v1537_v5  ;;  %vm1608_vm7 = vweird.f32 %v1537_v5 }
 0xb49   :  { %v1548_v36 = vmul.f32 %v2490_v58, %v1525_v27  ;;  %vm1553_vm2 = vweird.f32 %v2490_v58 }
 0xb4a   :  { %vm1554_vm4 = vmor %vm1552_vm3, %vm1553_vm2  ;;  %v1615_v51 = vor.u32 1.1754944e-38, %v1614_v45  ;;  %vm1613_vm14 = vcmp.eq.f32.partialorder %v1612_v43, 8.507059e+37 }
 0xb4b   :  { %v1549_v29 = vsub.f32 1.0, %v1548_v36  ;;  %vm3520_vm2 = vmmov %vm3516_vm1 }
 0xb4c   :  { %vm3521_vm3 = vmmov %vm3517_vm8 }
 0xb4d   :  { %v1550_v37 = vmul.f32 %v2490_v58, %v1549_v29 }
 0xb4e   :  { %v2492_v38 = vpop.eup %2491 }
 0xb4f   :  { %v1551_v39 = vadd.f32 %v2490_v58, %v1550_v37  ;;  %v1604_v40 = vmul.f32 %v2492_v38, %v1537_v5  ;;  %vm1609_vm11 = vweird.f32 %v2492_v38  ;;  %v2339_v37 = vld [vmem:[%s3422_s4 + $0x30] sm:$0xff] }
 0xb50   :  { %vm1610_vm10 = vmor %vm1608_vm7, %vm1609_vm11  ;;  %2019 = vmatpush.msrb.mxu3 %v2339_v37 }
 0xb51   :  { %v1555_v32 = vsel %vm1554_vm4, %v2490_v58, %v1551_v39  ;;  %v1605_v18 = vsub.f32 1.0, %v1604_v40  ;;  %vm3522_vm4 = vmmov %vm3521_vm3 }
 0xb52   :  { %v1560_v44 = vsel %vm1557_vm0, %v1559_v4, %v1555_v32  ;;  %vm3523_vm0 = vmmov %vm3521_vm3  ;;  %2020 = vmatpush.msrb.mxu3 %v2338_v7 }
 0xb53   :  { %v1606_v48 = vmul.f32 %v2492_v38, %v1605_v18  ;;  %v1659_v57 = vmul.f32 %v3150_v53, %v1560_v44  ;;  %vm3524_vm11 = vmmov %vm3523_vm0 }
 0xb54   :  { %vm3525_vm7 = vmmov %vm3523_vm0 }
 0xb55   :  { %v1607_v59 = vadd.f32 %v2492_v38, %v1606_v48  ;;  %2322 = vmatmul.msk.f32.vlgmr.msra.gmra.mxu2 %vm3512_vm9, %v1659_v57  ;;  %v2336_v48 = vld [vmem:[%s3419_s1 + $0x6] sm:$0x3] }
 0xb57   :  { %v1611_v54 = vsel %vm1610_vm10, %v2492_v38, %v1607_v59  ;;  %v2337_v38 = vld [vmem:[%s3422_s4 + $0x20] sm:$0xff] }
 0xb58   :  { %v1616_v34 = vsel %vm1613_vm14, %v1615_v51, %v1611_v54  ;;  %2021 = vmatpush.msrb.mxu3 %v2337_v38  ;;  %v1988_v54 = vperm.slane %v2336_v48, 0 }
 0xb59   :  { %v1663_v2 = vmul.f32 %v3154_v55, %v1616_v34  ;;  %v2333_v55 = vld [vmem:[%s3421_s3 + $0x38] sm:$0xff] }
 0xb5a   :  { %1929 = vmatpush.msra.mxu2 %v2333_v55 }
 0xb5c   :  { %1930 = vmatpush.msra.mxu2 %v2332_v61 }
 0xb5d   :  { %2326 = vmatmul.msk.f32.vlgmr.msrb.gmra.mxu2 %vm3513_vm15, %v1663_v2  ;;  %vm3526_vm15 = vmmov %vm3523_vm0 }
 0xb5e   :  { %1931 = vmatpush.msra.mxu2 %v2331_v63 }
 0xb60   :  { %1932 = vmatpush.msra.mxu2 %v2330_v3 }
 0xb90   :  { %v1742_v33 = vpop.f32.mrf.mxu0 }
 0xb98   :  { %v1861_v0 = vpop.f32.mrf.mxu0 }
 0xb9d   :  { %v1716_v30 = vpop.f32.mrf.mxu3  ;;  %v1768_v13 = vpop.f32.mrf.mxu1 }
 0xb9e   :  { %1772 = vrot.lane.b32.xlu2 %v1716_v30, %s2545_s0 }
 0xba5   :  { %v1835_v56 = vpop.f32.mrf.mxu3  ;;  %v1887_v53 = vpop.f32.mrf.mxu1 }
 0xba6   :  { %1899 = vrot.lane.b32.xlu0 %v1887_v53, %s2546_s9  ;;  %1776 = vrot.lane.b32.xlu2 %v1742_v33, %s2547_s10 }
 0xba7   :  { %1891 = vrot.lane.b32.xlu1 %v1835_v56, %s2545_s0 }
 0xbae   :  { %1780 = vrot.lane.b32.xlu2 %v1768_v13, %s2546_s9  ;;  %v1991_v13 = vperm.slane %v2336_v48, 1  ;;  %s2253_s9 = sshll.u32 %s3426_s8, 4  ;;  %s2254_s9 = int_to_ptr.hbm [resolvable:$true] %s2253_s9 }
 0xbb6   :  { %1895 = vrot.lane.b32.xlu2 %v1861_v0, %s2547_s10  ;;  %s2549_s10 = smov 128  }
 0xbd8   :  { %v1690_v24 = vpop.f32.mrf.mxu2 }
 0xbe0   :  { %v1809_v60 = vpop.f32.mrf.mxu2 }
 0xbf8   :  { %v1773_v21 = vpop.permute.xlu2 %1772 }
 0xbf9   :  { %v1783_v11 = vsel %vm3514_vm12, %v1690_v24, %v1773_v21 }
 0xc00   :  { %v1777_v8 = vpop.permute.xlu2 %1776 }
 0xc01   :  { %v1784_v12 = vsel %vm3515_vm13, %v1783_v11, %v1777_v8 }
 0xc08   :  { %v1781_v47 = vpop.permute.xlu2 %1780 }
 0xc09   :  { %v1785_v52 = vsel %vm3516_vm1, %v1784_v12, %v1781_v47  ;;  %v2360_v12 = vld [vmem:[%s3423_s5 + $0xf8] sm:$0xff]  ;;  %v2359_v47 = vld [vmem:[%s3423_s5 + $0xf0] sm:$0xff] }
 0xc0a   :  { %2334 = vmatmul.msk.f32.vlgmr.msra.gmra.mxu2 %vm3517_vm8, %v1785_v52  ;;  %vm3527_vm8 = vmmov %vm3523_vm0  ;;  %2135 = vmatpush.msra.mxu0 %v2360_v12  ;;  %v2358_v52 = vld [vmem:[%s3423_s5 + $0xe8] sm:$0xff] }
 0xc0c   :  { %2136 = vmatpush.msra.mxu0 %v2359_v47 }
 0xc0e   :  { %2137 = vmatpush.msra.mxu0 %v2358_v52 }
 0xc10   :  { %v1896_v17 = vpop.permute.xlu2 %1895 }
 0xc18   :  { %v1900_v19 = vpop.permute.xlu0 %1899 }
 0xc19   :  { %v1892_v15 = vpop.permute.xlu1 %1891 }
 0xc1a   :  { %v1902_v6 = vsel %vm3518_vm6, %v1809_v60, %v1892_v15  ;;  %v1999_v60 = vperm.slane %v3036_v28, 2  ;;  %v2357_v15 = vld [vmem:[%s3423_s5 + $0xe0] sm:$0xff] }
 0xc1b   :  { %v1903_v22 = vsel %vm3519_vm5, %v1902_v6, %v1896_v17  ;;  %2138 = vmatpush.msra.mxu0 %v2357_v15  ;;  %v2356_v6 = vld [vmem:[%s3423_s5 + $0xd8] sm:$0xff] }
 0xc1c   :  { %v1904_v31 = vsel %vm3520_vm2, %v1903_v22, %v1900_v19  ;;  %v2355_v22 = vld [vmem:[%s3423_s5 + $0xd0] sm:$0xff] }
 0xc1d   :  { %2335 = vmatmul.msk.f32.gmra.mxu2 %vm3521_vm3, %v1904_v31  ;;  %2139 = vmatpush.msra.mxu0 %v2356_v6  ;;  %v2354_v31 = vld [vmem:[%s3423_s5 + $0xc8] sm:$0xff] }
 0xc1f   :  { %2140 = vmatpush.msra.mxu0 %v2355_v22 }
 0xc21   :  { %2141 = vmatpush.msra.mxu0 %v2354_v31 }
 0xc8d   :  { %v1934_v20 = vpop.f32.mrf.mxu2 }
 0xc8e   :  { %v1935_v42 = vadd.f32 %v1934_v20, %v1910_v49  ;;  %v2353_v20 = vld [vmem:[%s3423_s5 + $0xc0] sm:$0xff] }
 0xc8f   :  { %2142 = vmatpush.msra.mxu0 %v2353_v20 }
 0xc90   :  { %v3283_v23 = vadd.f32 %v1935_v42, %v2999_v35 }
 0xc92   :  { %v1944_v50 = vsel %vm3522_vm4, %v3283_v23, 0.0 }
 0xc93   :  { %1945 = vadd.xlane.f32.xlu2 %v1944_v50  ;;  %v2352_v50 = vld [vmem:[%s3423_s5 + $0xb8] sm:$0xff] }
 0xc94   :  { %2143 = vmatpush.msra.mxu0 %v2352_v50 }
 0xca0   :  { %v1937_v41 = vpop.f32.mrf.mxu2 }
 0xca1   :  { %v1938_v25 = vadd.f32 %v1937_v41, %v1910_v49 }
 0xca3   :  { %v3288_v62 = vadd.f32 %v1938_v25, %v3004_v9 }
 0xca5   :  { %v1947_v26 = vsel %vm3523_vm0, %v3288_v62, 0.0 }
 0xca6   :  { %1948 = vadd.xlane.f32.xlu0 %v1947_v26  ;;  %v2351_v26 = vld [vmem:[%s3423_s5 + $0xb0] sm:$0xff] }
 0xca7   :  { %2144 = vmatpush.msra.mxu0 %v2351_v26 }
 0xd06   :  { %v1946_v1 = vpop.xlane.xlu2 %1945 }
 0xd07   :  { %v1950_v16 = vmul.f32 %v1946_v1, %v2609_v10 }
 0xd09   :  { %v1952_v46 = vsub.f32 %v3283_v23, %v1950_v16 }
 0xd0b   :  { %v1954_v35 = vmul.f32 %v1952_v46, %v1952_v46 }
 0xd0d   :  { %v1956_v27 = vsel %vm3524_vm11, %v1954_v35, 0.0 }
 0xd0e   :  { %1957 = vadd.xlane.f32.xlu1 %v1956_v27 }
 0xd19   :  { %v1949_v5 = vpop.xlane.xlu0 %1948 }
 0xd1a   :  { %v1951_v58 = vmul.f32 %v1949_v5, %v2609_v10  ;;  %v2349_v5 = vld [vmem:[%s3423_s5 + $0xa0] sm:$0xff] }
 0xd1c   :  { %v1953_v36 = vsub.f32 %v3288_v62, %v1951_v58 }
 0xd1e   :  { %v1955_v9 = vmul.f32 %v1953_v36, %v1953_v36 }
 0xd20   :  { %v1959_v29 = vsel %vm3525_vm7, %v1955_v9, 0.0  ;;  %v2348_v9 = vld [vmem:[%s3423_s5 + $0x98] sm:$0xff] }
 0xd21   :  { %1960 = vadd.xlane.f32.xlu2 %v1959_v29 }
 0xd81   :  { %v1958_v39 = vpop.xlane.xlu1 %1957 }
 0xd82   :  { %v1962_v40 = vmul.f32 %v1958_v39, %v2609_v10 }
 0xd84   :  { %v1964_v4 = vadd.f32 1e-05, %v1962_v40  ;;  %v2346_v40 = vld [vmem:[%s3423_s5 + $0x88] sm:$0xff] }
 0xd86   :  { %2493 = vrsqrt.f32 %v1964_v4  ;;  %vm1972_vm10 = vweird.f32 %v1964_v4 }
 0xd8c   :  { %v2494_v32 = vpop.eup %2493 }
 0xd8d   :  { %v1967_v18 = vmul.f32 %v2494_v32, %v1964_v4  ;;  %vm1973_vm9 = vweird.f32 %v2494_v32  ;;  %v2345_v4 = vld [vmem:[%s3423_s5 + $0x80] sm:$0xff] }
 0xd8e   :  { %vm1974_vm14 = vmor %vm1972_vm10, %vm1973_vm9 }
 0xd8f   :  { %v1968_v44 = vmul.f32 %v2494_v32, %v1967_v18  ;;  %vm3528_vm9 = vmmov %vm3527_vm8 }
 0xd90   :  { %vm3529_vm10 = vmmov %vm3527_vm8 }
 0xd91   :  { %v1969_v45 = vmul.f32 0.5, %v1968_v44 }
 0xd93   :  { %v1970_v43 = vsub.f32 1.5, %v1969_v45 }
 0xd94   :  { %v1961_v57 = vpop.xlane.xlu2 %1960 }
 0xd95   :  { %v1971_v59 = vmul.f32 %v2494_v32, %v1970_v43  ;;  %v1963_v51 = vmul.f32 %v1961_v57, %v2609_v10 }
 0xd97   :  { %v1975_v34 = vsel %vm1974_vm14, %v2494_v32, %v1971_v59  ;;  %v1965_v2 = vadd.f32 1e-05, %v1963_v51  ;;  %vm3530_vm14 = vmmov %vm3527_vm8 }
 0xd98   :  { %v1986_v30 = vmul.f32 %v1975_v34, %v1952_v46  ;;  %v2350_v46 = vld [vmem:[%s3423_s5 + $0xa8] sm:$0xff] }
 0xd99   :  { %2495 = vrsqrt.f32 %v1965_v2  ;;  %vm1982_vm13 = vweird.f32 %v1965_v2  ;;  %2145 = vmatpush.msra.mxu0 %v2350_v46 }
 0xd9a   :  { %v1989_v33 = vmul.f32 %v1988_v54, %v1986_v30 }
 0xd9b   :  { %2146 = vmatpush.msra.mxu0 %v2349_v5 }
 0xd9c   :  { %v1992_v56 = vadd.f32 %v1991_v13, %v1989_v33 }
 0xd9d   :  { %2147 = vmatpush.msra.mxu0 %v2348_v9 }
 0xd9e   :  { %2341 = vmatmul.msk.f32.vlgmr.msrb.gmra.mxu3 %vm3526_vm15, %v1992_v56  ;;  %vm3531_vm15 = vmmov %vm3527_vm8 }
 0xd9f   :  { %v2496_v53 = vpop.eup %2495  ;;  %2148 = vmatpush.msra.mxu0 %v2347_v14 }
 0xda0   :  { %v1977_v0 = vmul.f32 %v2496_v53, %v1965_v2  ;;  %vm1983_vm12 = vweird.f32 %v2496_v53 }
 0xda1   :  { %vm1984_vm1 = vmor %vm1982_vm13, %vm1983_vm12  ;;  %2149 = vmatpush.msra.mxu0 %v2346_v40 }
 0xda2   :  { %v1978_v55 = vmul.f32 %v2496_v53, %v1977_v0 }
 0xda3   :  { %2150 = vmatpush.msra.mxu0 %v2345_v4 }
 0xda4   :  { %v1979_v61 = vmul.f32 0.5, %v1978_v55 }
 0xda6   :  { %v1980_v63 = vsub.f32 1.5, %v1979_v61 }
 0xda8   :  { %v1981_v3 = vmul.f32 %v2496_v53, %v1980_v63 }
 0xdaa   :  { %v1985_v21 = vsel %vm1984_vm1, %v2496_v53, %v1981_v3 }
 0xdab   :  { %v1987_v8 = vmul.f32 %v1985_v21, %v1953_v36 }
 0xdad   :  { %v1990_v24 = vmul.f32 %v1988_v54, %v1987_v8 }
 0xdaf   :  { %v1993_v11 = vadd.f32 %v1991_v13, %v1990_v24 }
 0xdb1   :  { %2342 = vmatmul.msk.f32.gmra.mxu3 %vm3527_vm8, %v1993_v11 }
 0xe21   :  { %v2023_v17 = vpop.f32.mrf.mxu3 }
 0xe22   :  { %v3333_v19 = vadd.f32 %v2023_v17, %v1999_v60 }
 0xe24   :  { %v3339_v28 = vmul.f32 0.70710677, %v3333_v19 }
 0xe26   :  { %v2033_v49 = vmul.f32 %v3339_v28, %v3339_v28 }
 0xe28   :  { %v2034_v42 = vmin.f32 %v2033_v49, 16.0 }
 0xe2a   :  { %v2035_v41 = vmul.f32 2.1237322e-06, %v2034_v42  ;;  %v2046_v25 = vmul.f32 3.8918573e-05, %v2034_v42 }
 0xe2c   :  { %v2036_v1 = vadd.f32 0.00028619796, %v2035_v41  ;;  %v2047_v16 = vadd.f32 0.001143296, %v2046_v25 }
 0xe2e   :  { %v2037_v35 = vmul.f32 %v2036_v1, %v2034_v42  ;;  %v2048_v27 = vmul.f32 %v2047_v16, %v2034_v42  ;;  %v2029_v1 = vmul.f32 0.5, %v3333_v19 }
 0xe30   :  { %v2038_v58 = vadd.f32 0.0036580483, %v2037_v35  ;;  %v2049_v36 = vadd.f32 0.014752088, %v2048_v27 }
 0xe32   :  { %v2050_v29 = vmul.f32 %v2049_v36, %v2034_v42  ;;  %v2039_v37 = vmul.f32 %v2038_v58, %v2034_v42 }
 0xe34   :  { %v2051_v7 = vadd.f32 0.112945676, %v2050_v29  ;;  %v2026_v38 = vpop.f32.mrf.mxu3  ;;  %v2040_v44 = vadd.f32 0.05243302, %v2039_v37 }
 0xe35   :  { %v3367_v39 = vadd.f32 %v2026_v38, %v1999_v60 }
 0xe36   :  { %v2052_v32 = vmul.f32 %v2051_v7, %v2034_v42  ;;  %v2041_v59 = vmul.f32 %v2040_v44, %v2034_v42 }
 0xe37   :  { %v3376_v18 = vmul.f32 0.70710677, %v3367_v39  ;;  %v2030_v44 = vmul.f32 0.5, %v3367_v39 }
 0xe38   :  { %v2053_v45 = vadd.f32 0.4994258, %v2052_v32  ;;  %v2042_v13 = vadd.f32 0.18741608, %v2041_v59 }
 0xe39   :  { %v2073_v48 = vmul.f32 %v3376_v18, %v3376_v18 }
 0xe3a   :  { %v2054_v43 = vmul.f32 %v2053_v45, %v2034_v42  ;;  %v2043_v55 = vmul.f32 %v2042_v13, %v2034_v42 }
 0xe3b   :  { %v2074_v57 = vmin.f32 %v2073_v48, 16.0 }
 0xe3c   :  { %v2055_v51 = vadd.f32 1.0, %v2054_v43  ;;  %v2044_v24 = vadd.f32 1.1283791, %v2043_v55  ;;  %v2506_v43 = vld [vmem:[%s3424_s6 + $0x4] sm:$0xf] }
 0xe3d   :  { %v2075_v54 = vmul.f32 2.1237322e-06, %v2074_v57  ;;  %v2086_v34 = vmul.f32 3.8918573e-05, %v2074_v57 }
 0xe3e   :  { %2497 = vrcp.f32 %v2055_v51  ;;  %v2067_v11 = vand.u32 2147483648, %v2055_v51  ;;  %v2065_v52 = vand.u32 2147483647, %v2055_v51  ;;  %vm2061_vm5 = vweird.f32 %v2055_v51 }
 0xe3f   :  { %v2076_v2 = vadd.f32 0.00028619796, %v2075_v54  ;;  %v2087_v30 = vadd.f32 0.001143296, %v2086_v34  ;;  %v2045_v31 = vmul.f32 %v2044_v24, %v3339_v28  ;;  %v2212_v24 = vld [vmem:[%s3425_s7] sm:$0xff] }
 0xe40   :  { %v2068_v6 = vor.u32 1.1754944e-38, %v2067_v11  ;;  %vm2066_vm3 = vcmp.eq.f32.partialorder %v2065_v52, 8.507059e+37 }
 0xe41   :  { %v2077_v33 = vmul.f32 %v2076_v2, %v2074_v57  ;;  %v2088_v56 = vmul.f32 %v2087_v30, %v2074_v57 }
 0xe43   :  { %v2089_v53 = vadd.f32 0.014752088, %v2088_v56  ;;  %v2078_v61 = vadd.f32 0.0036580483, %v2077_v33 }
 0xe44   :  { %v2498_v0 = vpop.eup %2497 }
 0xe45   :  { %v2057_v63 = vmul.f32 %v2498_v0, %v2055_v51  ;;  %v2090_v3 = vmul.f32 %v2089_v53, %v2074_v57  ;;  %v2079_v12 = vmul.f32 %v2078_v61, %v2074_v57  ;;  %vm2062_vm6 = vweird.f32 %v2498_v0 }
 0xe46   :  { %vm2063_vm2 = vmor %vm2061_vm5, %vm2062_vm6 }
 0xe47   :  { %v2058_v21 = vsub.f32 1.0, %v2057_v63  ;;  %v2091_v8 = vadd.f32 0.112945676, %v2090_v3  ;;  %v2080_v22 = vadd.f32 0.05243302, %v2079_v12 }
 0xe49   :  { %v2059_v47 = vmul.f32 %v2498_v0, %v2058_v21  ;;  %v2092_v60 = vmul.f32 %v2091_v8, %v2074_v57  ;;  %v2081_v25 = vmul.f32 %v2080_v22, %v2074_v57  ;;  %v2214_v21 = vld [vmem:[%s3425_s7 + $0x10] sm:$0xff]  ;;  %v2213_v8 = vld [vmem:[%s3425_s7 + $0x8] sm:$0xff] }
 0xe4b   :  { %v2060_v15 = vadd.f32 %v2498_v0, %v2059_v47  ;;  %v2093_v17 = vadd.f32 0.4994258, %v2092_v60  ;;  %v2082_v46 = vadd.f32 0.18741608, %v2081_v25 }
 0xe4d   :  { %v2064_v49 = vsel %vm2063_vm2, %v2498_v0, %v2060_v15  ;;  %v2094_v20 = vmul.f32 %v2093_v17, %v2074_v57  ;;  %v2083_v5 = vmul.f32 %v2082_v46, %v2074_v57  ;;  %v2134_v57 = vperm.slane %v2506_v43, 3 }
 0xe4e   :  { %v2069_v42 = vsel %vm2066_vm3, %v2068_v6, %v2064_v49  ;;  %v2361_v6 = vld [vmem:[%s3419_s1 + $0x8] sm:$0x3]  ;;  %vm3532_vm3 = vmmov %vm3527_vm8  ;;  %s2548_s1 = smov [#allocation2]  }
 0xe4f   :  { %v2070_v50 = vmul.f32 %v2069_v42, %v2045_v31  ;;  %v2095_v41 = vadd.f32 1.0, %v2094_v20  ;;  %v2084_v9 = vadd.f32 1.1283791, %v2083_v5  ;;  %v2206_v42 = vperm.slane %v2361_v6, 0 }
 0xe51   :  { %v2343_v26 = vclamps-f32 %v2070_v50, 1.0  ;;  %2499 = vrcp.f32 %v2095_v41  ;;  %v2107_v28 = vand.u32 2147483648, %v2095_v41  ;;  %v2105_v14 = vand.u32 2147483647, %v2095_v41 }
 0xe52   :  { %vm2101_vm0 = vweird.f32 %v2095_v41  ;;  %v2085_v38 = vmul.f32 %v2084_v9, %v3376_v18 }
 0xe53   :  { %v2113_v16 = vadd.f32 1.0, %v2343_v26  ;;  %v2108_v7 = vor.u32 1.1754944e-38, %v2107_v28  ;;  %vm2106_vm7 = vcmp.eq.f32.partialorder %v2105_v14, 8.507059e+37  ;;  %v2209_v26 = vperm.slane %v2361_v6, 1 }
 0xe55   :  { %v2115_v35 = vmul.f32 %v2113_v16, %v2029_v1 }
 0xe57   :  { %v2500_v27 = vpop.eup %2499  ;;  %2151 = vmatmul.f32.vlgmr.msra.gmra.mxu0 %v2115_v35 }
 0xe58   :  { %v2097_v58 = vmul.f32 %v2500_v27, %v2095_v41  ;;  %vm2102_vm4 = vweird.f32 %v2500_v27 }
 0xe59   :  { %vm2103_vm11 = vmor %vm2101_vm0, %vm2102_vm4 }
 0xe5a   :  { %v2098_v36 = vsub.f32 1.0, %v2097_v58 }
 0xe5c   :  { %v2099_v29 = vmul.f32 %v2500_v27, %v2098_v36 }
 0xe5e   :  { %v2100_v37 = vadd.f32 %v2500_v27, %v2099_v29 }
 0xe60   :  { %v2104_v19 = vsel %vm2103_vm11, %v2500_v27, %v2100_v37 }
 0xe61   :  { %v2109_v40 = vsel %vm2106_vm7, %v2108_v7, %v2104_v19 }
 0xe62   :  { %v2110_v4 = vmul.f32 %v2109_v40, %v2085_v38 }
 0xe64   :  { %v2344_v32 = vclamps-f32 %v2110_v4, 1.0 }
 0xe66   :  { %v2114_v45 = vadd.f32 1.0, %v2344_v32 }
 0xe68   :  { %v2116_v48 = vmul.f32 %v2114_v45, %v2030_v44 }
 0xe6a   :  { %2154 = vmatmul.f32.gmra.mxu0 %v2116_v48 }
 0xed4   :  { %v2152_v59 = vpop.f32.mrf.mxu0 }
 0xed5   :  { %v2153_v51 = vadd.f32 %v2152_v59, %v2134_v57 }
 0xed7   :  { %v2158_v54 = vadd.f32 %v2153_v51, %v3283_v23 }
 0xed9   :  { %v2162_v18 = vsel %vm3528_vm9, %v2158_v54, 0.0 }
 0xeda   :  { %2163 = vadd.xlane.f32.xlu2 %v2162_v18 }
 0xee7   :  { %v2155_v34 = vpop.f32.mrf.mxu0 }
 0xee8   :  { %v2156_v2 = vadd.f32 %v2155_v34, %v2134_v57 }
 0xeea   :  { %v2159_v30 = vadd.f32 %v2156_v2, %v3288_v62  ;;  %v2215_v62 = vld [vmem:[%s3425_s7 + $0x18] sm:$0xff]  ;;  %s2251_s7 = sshll.u32 %s2548_s1, 4  ;;  %s2252_s7 = int_to_ptr.vmem [resolvable:$true] %s2251_s7 }
 0xeeb   :  { %2234 = vmatpush.msra.mxu1 %v2215_v62 }
 0xeec   :  { %v2165_v39 = vsel %vm3529_vm10, %v2159_v30, 0.0 }
 0xeed   :  { %2166 = vadd.xlane.f32.xlu0 %v2165_v39  ;;  %2235 = vmatpush.msra.mxu1 %v2214_v21 }
 0xeef   :  { %2236 = vmatpush.msra.mxu1 %v2213_v8 }
 0xef1   :  { %2237 = vmatpush.msra.mxu1 %v2212_v24 }
 0xf4d   :  { %v2164_v13 = vpop.xlane.xlu2 %2163 }
 0xf4e   :  { %v2168_v33 = vmul.f32 %v2164_v13, %v2609_v10 }
 0xf50   :  { %v2170_v56 = vsub.f32 %v2158_v54, %v2168_v33 }
 0xf52   :  { %v2172_v53 = vmul.f32 %v2170_v56, %v2170_v56 }
 0xf54   :  { %v2174_v0 = vsel %vm3530_vm14, %v2172_v53, 0.0 }
 0xf55   :  { %2175 = vadd.xlane.f32.xlu2 %v2174_v0 }
 0xf60   :  { %v2167_v55 = vpop.xlane.xlu0 %2166 }
 0xf61   :  { %v2169_v23 = vmul.f32 %v2167_v55, %v2609_v10 }
 0xf63   :  { %v2171_v61 = vsub.f32 %v2159_v30, %v2169_v23 }
 0xf65   :  { %v2173_v63 = vmul.f32 %v2171_v61, %v2171_v61 }
 0xf67   :  { %v2177_v3 = vsel %vm3531_vm15, %v2173_v63, 0.0 }
 0xf68   :  { %2178 = vadd.xlane.f32.xlu1 %v2177_v3 }
 0xfc8   :  { %v2176_v11 = vpop.xlane.xlu2 %2175 }
 0xfc9   :  { %v2180_v12 = vmul.f32 %v2176_v11, %v2609_v10 }
 0xfcb   :  { %v2182_v47 = vadd.f32 1e-05, %v2180_v12 }
 0xfcd   :  { %2501 = vrsqrt.f32 %v2182_v47  ;;  %vm2190_vm13 = vweird.f32 %v2182_v47 }
 0xfd3   :  { %v2502_v52 = vpop.eup %2501 }
 0xfd4   :  { %v2185_v60 = vmul.f32 %v2502_v52, %v2182_v47  ;;  %vm2191_vm12 = vweird.f32 %v2502_v52 }
 0xfd5   :  { %vm2192_vm1 = vmor %vm2190_vm13, %vm2191_vm12 }
 0xfd6   :  { %v2186_v15 = vmul.f32 %v2502_v52, %v2185_v60 }
 0xfd8   :  { %v2187_v17 = vmul.f32 0.5, %v2186_v15 }
 0xfda   :  { %v2188_v22 = vsub.f32 1.5, %v2187_v17 }
 0xfdb   :  { %v2179_v31 = vpop.xlane.xlu1 %2178 }
 0xfdc   :  { %v2189_v49 = vmul.f32 %v2502_v52, %v2188_v22  ;;  %v2181_v20 = vmul.f32 %v2179_v31, %v2609_v10 }
 0xfde   :  { %v2193_v50 = vsel %vm2192_vm1, %v2502_v52, %v2189_v49  ;;  %v2183_v41 = vadd.f32 1e-05, %v2181_v20 }
 0xfdf   :  { %v2204_v25 = vmul.f32 %v2193_v50, %v2170_v56 }
 0xfe0   :  { %2503 = vrsqrt.f32 %v2183_v41  ;;  %vm2200_vm5 = vweird.f32 %v2183_v41 }
 0xfe1   :  { %v2207_v1 = vmul.f32 %v2206_v42, %v2204_v25 }
 0xfe3   :  { %v2210_v16 = vadd.f32 %v2209_v26, %v2207_v1 }
 0xfe5   :  { %2362 = vmatmul.msk.f32.vlgmr.msra.gmra.mxu1 %vm3527_vm8, %v2210_v16 }
 0xfe6   :  { %v2504_v46 = vpop.eup %2503 }
 0xfe7   :  { %v2195_v35 = vmul.f32 %v2504_v46, %v2183_v41  ;;  %vm2201_vm6 = vweird.f32 %v2504_v46 }
 0xfe8   :  { %vm2202_vm2 = vmor %vm2200_vm5, %vm2201_vm6 }
 0xfe9   :  { %v2196_v27 = vmul.f32 %v2504_v46, %v2195_v35 }
 0xfeb   :  { %v2197_v5 = vmul.f32 0.5, %v2196_v27 }
 0xfed   :  { %v2198_v58 = vsub.f32 1.5, %v2197_v5 }
 0xfef   :  { %v2199_v36 = vmul.f32 %v2504_v46, %v2198_v58 }
 0xff1   :  { %v2203_v10 = vsel %vm2202_vm2, %v2504_v46, %v2199_v36 }
 0xff2   :  { %v2205_v28 = vmul.f32 %v2203_v10, %v2171_v61 }
 0xff4   :  { %v2208_v9 = vmul.f32 %v2206_v42, %v2205_v28 }
 0xff6   :  { %v2211_v29 = vadd.f32 %v2209_v26, %v2208_v9 }
 0xff8   :  { %2363 = vmatmul.msk.f32.gmra.mxu1 %vm3532_vm3, %v2211_v29 }
0x1062   :  { %v2239_v14 = vpop.f32.mrf.mxu1 }
0x1063   :  { %2245 = vst [vmem:[#allocation2] sm:$0xff] %v2239_v14 }
0x1075   :  { %v2242_v37 = vpop.f32.mrf.mxu1 }
0x1076   :  { %2246 = vst [vmem:[#allocation2 + $0x8] sm:$0xff] %v2242_v37 }
0x1077   :  { %2259 = dma.vmem_to_hbm [thread:$0]  %s2252_s7, 256, %s2254_s9, [#allocation3], %s2549_s10, %s2549_s10, %s2545_s0  }
0x1078   :  { %2531 = dma.done.wait [#allocation3], 256  }
0x1079   :  { %2532 = vsyncadd [#allocation3], 4294967040 }
0x107a   :  { %2264 = vsyncpa [#allocation3], 1 }

</bundles_post_ra>
